<compile_context>
chip_gen: v5e
topology: v5e:2x2
jax: 0.10.0
libtpu: 0.0.40
codegen_flags: <defaults>
</compile_context>

<pallas_src>
import numpy as np
import jax
import jax.numpy as jnp
from jax.experimental import pallas as pl
from jax.experimental.pallas import tpu as pltpu

COMPUTE_DTYPE = jnp.bfloat16   # MXU operand dtype; accumulation is always f32.

# (output-row parity r, input-row offset t0, kernel row kh) combos for
# ConvTranspose2d(k=3, stride=2, padding=1, output_padding=1).
_CONVT_COMBOS = ((0, 0, 1), (1, 0, 2), (1, 1, 0))


# ---------------------------------------------------------------------------
# One-time (host-side) weight / selection-matrix packing
# ---------------------------------------------------------------------------
def _conv_col_weights(w, W):
    """Conv2d(k=3, stride=2, pad=1) weights with the W-direction selection folded in.

    w: (Cout, Cin, 3, 3) -> M: (3, W*Cin, (W//2)*Cout) with
       M[i, wcol*Cin + c, wo*Cout + co] = w[co, c, i, j],  j = wcol - 2*wo + 1.
    """
    w = np.asarray(w, np.float32)
    Cout, Cin, _, _ = w.shape
    Wo = W // 2
    M = np.zeros((3, W * Cin, Wo * Cout), np.float32)
    for i in range(3):
        for wo in range(Wo):
            for j in range(3):
                wcol = 2 * wo + j - 1
                if 0 <= wcol < W:
                    M[i, wcol * Cin:(wcol + 1) * Cin,
                      wo * Cout:(wo + 1) * Cout] = w[:, :, i, j].T
    return M


def _convt_col_weights(wt, W):
    """ConvTranspose2d(k=3, s=2, p=1, out_pad=1) weights with the output-column
    scatter folded in.

    wt: (Cin, Cout, 3, 3) -> MT: (3, W*Cin, 2W*Cout) with, for combo c=(r,t0,kh):
       MT[c, iw*Cin + ci, ow*Cout + co] = wt[ci, co, kh, kw],  kw = ow - 2*iw + 1.
    """
    wt = np.asarray(wt, np.float32)
    Cin, Cout, _, _ = wt.shape
    MT = np.zeros((3, W * Cin, 2 * W * Cout), np.float32)
    for c, (_r, _t0, kh) in enumerate(_CONVT_COMBOS):
        for iw in range(W):
            for kw in range(3):
                ow = 2 * iw - 1 + kw
                if 0 <= ow < 2 * W:
                    MT[c, iw * Cin:(iw + 1) * Cin,
                       ow * Cout:(ow + 1) * Cout] = wt[:, :, kh, kw]
    return MT


def _conv_row_select(N, H):
    """0/1 matrices selecting input row 2*ho + i - 1 per output row (stride-2 conv)."""
    Ho = H // 2
    A = np.zeros((3, N * Ho, N * H), np.float32)
    for i in range(3):
        for n in range(N):
            for ho in range(Ho):
                h = 2 * ho + i - 1
                if 0 <= h < H:
                    A[i, n * Ho + ho, n * H + h] = 1.0
    return A


def _convt_row_select(N, H):
    """0/1 matrices selecting input row oh//2 + t0 per output row of parity r."""
    B = np.zeros((3, N * 2 * H, N * H), np.float32)
    for c, (r, t0, _kh) in enumerate(_CONVT_COMBOS):
        for n in range(N):
            for oh in range(2 * H):
                if oh % 2 != r:
                    continue
                ih = oh // 2 + t0
                if 0 <= ih < H:
                    B[c, n * 2 * H + oh, n * H + ih] = 1.0
    return B


def pack_params(params, hw=16):
    """One-time host-side weight repack into the kernel's matmul layout.

    hw is the spatial size of the model input (the W-direction selection folded
    into the weight matrices is spatial-size dependent).  Call once at init,
    NOT inside the jitted forward.
    """
    assert hw % 8 == 0
    (w1, b1), (w2, b2), (w3, b3), (t1, tb1), (t2, tb2), (t3, tb3) = params
    enc_w = (hw, hw // 2, hw // 4)        # conv input widths
    dec_w = (hw // 8, hw // 4, hw // 2)   # conv-transpose input widths

    def enc(w, b, W):
        m = jnp.asarray(_conv_col_weights(w, W), COMPUTE_DTYPE)
        bt = jnp.asarray(np.tile(np.asarray(b, np.float32), W // 2)[None, :])
        return m, bt

    def dec(wt, b, W):
        m = jnp.asarray(_convt_col_weights(wt, W), COMPUTE_DTYPE)
        bt = jnp.asarray(np.tile(np.asarray(b, np.float32), 2 * W)[None, :])
        return m, bt

    return (enc(w1, b1, enc_w[0]), enc(w2, b2, enc_w[1]), enc(w3, b3, enc_w[2]),
            dec(t1, tb1, dec_w[0]), dec(t2, tb2, dec_w[1]), dec(t3, tb3, dec_w[2]))


# ---------------------------------------------------------------------------
# Fused Pallas kernel: all 6 layers, everything VMEM-resident
# ---------------------------------------------------------------------------
def _layer(xr, sel_ref, m_ref, b_ref, act):
    """One (transposed) conv layer: act(sum_t (sel_t @ xr) @ M_t + b).

    xr:      (rows_in, W*Cin) bf16 activation, spatial rows x (w, c) lanes.
    sel_ref: (3, rows_out, rows_in) constant 0/1 row selection (H-direction taps).
    m_ref:   (3, W*Cin, Wout*Cout) weights with the W-direction selection folded in.
    b_ref:   (1, Wout*Cout) bias pre-tiled over output columns.
    """
    acc = None
    for t in range(3):
        rows = jnp.dot(sel_ref[t], xr, preferred_element_type=jnp.float32)
        part = jnp.dot(rows.astype(COMPUTE_DTYPE), m_ref[t],
                       preferred_element_type=jnp.float32)
        acc = part if acc is None else acc + part
    acc = acc + b_ref[...]
    if act == "relu":
        return jnp.maximum(acc, 0.0).astype(COMPUTE_DTYPE)
    # sigmoid: exp and the approximate reciprocal both run on the EUP slot.
    return pl.reciprocal(1.0 + jnp.exp(-acc), approx=True)


def _autoencoder_kernel(*refs):
    x_ref, o_ref = refs[0], refs[-1]
    h = x_ref[...]
    acts = ("relu", "relu", "relu", "relu", "relu", "sigmoid")
    for l, act in enumerate(acts):
        sel_ref, m_ref, b_ref = refs[1 + 3 * l: 4 + 3 * l]
        h = _layer(h, sel_ref, m_ref, b_ref, act)
    o_ref[...] = h


def autoencoder_forward(packed, x):
    """x: (N, 6, H, W) float32 NCHW -> (N, 6, H, W), like AutoEncoder.forward."""
    N, C, H, W = x.shape
    assert C == 6 and H == W and H % 8 == 0, (N, C, H, W)

    # Single NCHW -> (N*H, W*C) relayout at the model boundary.
    xr = jnp.transpose(x, (0, 2, 3, 1)).reshape(N * H, W * C).astype(COMPUTE_DTYPE)

    # Constant 0/1 row-selection matrices (shape-only -> baked in as jit constants).
    enc_h = (H, H // 2, H // 4)
    dec_h = (H // 8, H // 4, H // 2)
    sels = [jnp.asarray(_conv_row_select(N, h), COMPUTE_DTYPE) for h in enc_h] + \
           [jnp.asarray(_convt_row_select(N, h), COMPUTE_DTYPE) for h in dec_h]

    inputs = [xr]
    for (m, b), sel in zip(packed, sels):
        inputs += [sel, m, b]

    out = pl.pallas_call(
        _autoencoder_kernel,
        out_shape=jax.ShapeDtypeStruct((N * H, W * 6), jnp.float32),
        in_specs=[pl.BlockSpec(memory_space=pltpu.MemorySpace.VMEM)] * len(inputs),
        out_specs=pl.BlockSpec(memory_space=pltpu.MemorySpace.VMEM),
    )(*inputs)

    return jnp.transpose(out.reshape(N, H, W, 6), (0, 3, 1, 2))


# ---------------------------------------------------------------------------
# Parameter init (PyTorch-layout weights) and pure-JAX reference
# ---------------------------------------------------------------------------
def init_params(key):
    """Deterministic PyTorch-style uniform init (bound = 1/sqrt(fan_in))."""
    def conv_p(k, cout, cin, ksz):
        k1, k2 = jax.random.split(k)
        bound = 1.0 / (cin * ksz * ksz) ** 0.5
        w = jax.random.uniform(k1, (cout, cin, ksz, ksz), jnp.float32, -bound, bound)
        b = jax.random.uniform(k2, (cout,), jnp.float32, -bound, bound)
        return w, b

    def convt_p(k, cin, cout, ksz):
        k1, k2 = jax.random.split(k)
        bound = 1.0 / (cin * ksz * ksz) ** 0.5
        w = jax.random.uniform(k1, (cin, cout, ksz, ksz), jnp.float32, -bound, bound)
        b = jax.random.uniform(k2, (cout,), jnp.float32, -bound, bound)
        return w, b

    ks = jax.random.split(key, 6)
    return (
        conv_p(ks[0], 32, 6, 3),
        conv_p(ks[1], 64, 32, 3),
        conv_p(ks[2], 128, 64, 3),
        convt_p(ks[3], 128, 64, 3),
        convt_p(ks[4], 64, 32, 3),
        convt_p(ks[5], 32, 6, 3),
    )


def reference_forward(params, x, quantize=None):
    """XLA-conv reference; quantize=bf16 mimics the kernel's bf16 operands."""
    dn = ("NCHW", "OIHW", "NCHW")
    if quantize is None:
        q = lambda a: a
    else:
        q = lambda a: a.astype(quantize).astype(jnp.float32)

    def conv(x, w, b, stride, pad):
        y = jax.lax.conv_general_dilated(
            q(x), q(w), window_strides=(stride, stride),
            padding=((pad, pad), (pad, pad)), dimension_numbers=dn)
        return y + b.reshape(1, -1, 1, 1)

    def convt(x, wt, b, stride, pad, out_pad):
        k = wt.shape[2]
        w_eq = jnp.flip(wt, axis=(2, 3)).transpose(1, 0, 2, 3)
        y = jax.lax.conv_general_dilated(
            q(x), q(w_eq), window_strides=(1, 1),
            padding=((k - 1 - pad, k - 1 - pad + out_pad),
                     (k - 1 - pad, k - 1 - pad + out_pad)),
            lhs_dilation=(stride, stride), dimension_numbers=dn)
        return y + b.reshape(1, -1, 1, 1)

    (w1, b1), (w2, b2), (w3, b3), (t1, tb1), (t2, tb2), (t3, tb3) = params
    x = jax.nn.relu(conv(x, w1, b1, 2, 1))
    x = jax.nn.relu(conv(x, w2, b2, 2, 1))
    x = jax.nn.relu(conv(x, w3, b3, 2, 1))
    x = jax.nn.relu(convt(x, t1, tb1, 2, 1, 1))
    x = jax.nn.relu(convt(x, t2, tb2, 2, 1, 1))
    x = jax.nn.sigmoid(convt(x, t3, tb3, 2, 1, 1))
    return x


if __name__ == "__main__":
    key = jax.random.PRNGKey(0)
    kp, kx = jax.random.split(key)
    params = init_params(kp)
    packed = pack_params(params, hw=16)          # one-time weight repack
    x = jax.random.uniform(kx, (2, 6, 16, 16), jnp.float32)   # NCHW, like PyTorch

    fwd = jax.jit(autoencoder_forward)
    out = jax.block_until_ready(fwd(packed, x))
    assert out.shape == (2, 6, 16, 16), out.shape

    # Tight check vs a reference that applies the same bf16 operand quantization.
    ref_q = jax.block_until_ready(reference_forward(params, x, quantize=jnp.bfloat16))
    err_q = float(jnp.max(jnp.abs(out - ref_q)))
    assert err_q < 5e-3, f"mismatch vs bf16-quantized reference: {err_q}"

    # Loose sanity check vs the full-f32 reference (bf16 quantization noise only).
    ref_f = jax.block_until_ready(reference_forward(params, x))
    err_f = float(jnp.max(jnp.abs(out - ref_f)))
    assert err_f < 3e-2, f"mismatch vs f32 reference: {err_f}"

    print("KERNEL_OK")
</pallas_src>

<mosaic_0001>
module attributes {stable_mosaic.version = 11 : i64} {
  func.func @_autoencoder_kernel(%arg0: memref<32x96xbf16, #tpu.memory_space<vmem>>, %arg1: memref<3x16x32xbf16, #tpu.memory_space<vmem>>, %arg2: memref<3x96x256xbf16, #tpu.memory_space<vmem>>, %arg3: memref<1x256xf32, #tpu.memory_space<vmem>>, %arg4: memref<3x8x16xbf16, #tpu.memory_space<vmem>>, %arg5: memref<3x256x256xbf16, #tpu.memory_space<vmem>>, %arg6: memref<1x256xf32, #tpu.memory_space<vmem>>, %arg7: memref<3x4x8xbf16, #tpu.memory_space<vmem>>, %arg8: memref<3x256x256xbf16, #tpu.memory_space<vmem>>, %arg9: memref<1x256xf32, #tpu.memory_space<vmem>>, %arg10: memref<3x8x4xbf16, #tpu.memory_space<vmem>>, %arg11: memref<3x256x256xbf16, #tpu.memory_space<vmem>>, %arg12: memref<1x256xf32, #tpu.memory_space<vmem>>, %arg13: memref<3x16x8xbf16, #tpu.memory_space<vmem>>, %arg14: memref<3x256x256xbf16, #tpu.memory_space<vmem>>, %arg15: memref<1x256xf32, #tpu.memory_space<vmem>>, %arg16: memref<3x32x16xbf16, #tpu.memory_space<vmem>>, %arg17: memref<3x256x96xbf16, #tpu.memory_space<vmem>>, %arg18: memref<1x96xf32, #tpu.memory_space<vmem>>, %arg19: memref<32x96xf32, #tpu.memory_space<vmem>>) attributes {dimension_semantics = [], scalar_prefetch = 0 : i64, scratch_operands = 0 : i64, tpu.core_type = #tpu.core_type<tc>} {
    %c0 = arith.constant 0 : index
    %c0_0 = arith.constant 0 : index
    %0 = vector.load %arg0[%c0, %c0_0] : memref<32x96xbf16, #tpu.memory_space<vmem>>, vector<32x96xbf16>
    %c0_1 = arith.constant 0 : index
    %c0_2 = arith.constant 0 : index
    %c0_3 = arith.constant 0 : index
    %1 = vector.load %arg1[%c0_1, %c0_2, %c0_3] : memref<3x16x32xbf16, #tpu.memory_space<vmem>>, vector<1x16x32xbf16>
    %2 = vector.shape_cast %1 : vector<1x16x32xbf16> to vector<16x32xbf16>
    %cst = arith.constant dense<0.000000e+00> : vector<16x96xf32>
    %3 = tpu.matmul %2, %0, %cst {dimension_numbers = #tpu.dot_dimension_numbers<[1], [0], [0], [1], [0, 0, 1, 1], [], []>} : vector<16x32xbf16>, vector<32x96xbf16>, vector<16x96xf32> -> vector<16x96xf32>
    %4 = arith.truncf %3 : vector<16x96xf32> to vector<16x96xbf16>
    %c0_4 = arith.constant 0 : index
    %c0_5 = arith.constant 0 : index
    %c0_6 = arith.constant 0 : index
    %5 = vector.load %arg2[%c0_4, %c0_5, %c0_6] : memref<3x96x256xbf16, #tpu.memory_space<vmem>>, vector<1x96x256xbf16>
    %6 = vector.shape_cast %5 : vector<1x96x256xbf16> to vector<96x256xbf16>
    %cst_7 = arith.constant dense<0.000000e+00> : vector<16x256xf32>
    %7 = tpu.matmul %4, %6, %cst_7 {dimension_numbers = #tpu.dot_dimension_numbers<[1], [0], [0], [1], [0, 0, 1, 1], [], []>} : vector<16x96xbf16>, vector<96x256xbf16>, vector<16x256xf32> -> vector<16x256xf32>
    %c1 = arith.constant 1 : index
    %c0_8 = arith.constant 0 : index
    %c0_9 = arith.constant 0 : index
    %8 = vector.load %arg1[%c1, %c0_8, %c0_9] : memref<3x16x32xbf16, #tpu.memory_space<vmem>>, vector<1x16x32xbf16>
    %9 = vector.shape_cast %8 : vector<1x16x32xbf16> to vector<16x32xbf16>
    %cst_10 = arith.constant dense<0.000000e+00> : vector<16x96xf32>
    %10 = tpu.matmul %9, %0, %cst_10 {dimension_numbers = #tpu.dot_dimension_numbers<[1], [0], [0], [1], [0, 0, 1, 1], [], []>} : vector<16x32xbf16>, vector<32x96xbf16>, vector<16x96xf32> -> vector<16x96xf32>
    %11 = arith.truncf %10 : vector<16x96xf32> to vector<16x96xbf16>
    %c1_11 = arith.constant 1 : index
    %c0_12 = arith.constant 0 : index
    %c0_13 = arith.constant 0 : index
    %12 = vector.load %arg2[%c1_11, %c0_12, %c0_13] : memref<3x96x256xbf16, #tpu.memory_space<vmem>>, vector<1x96x256xbf16>
    %13 = vector.shape_cast %12 : vector<1x96x256xbf16> to vector<96x256xbf16>
    %cst_14 = arith.constant dense<0.000000e+00> : vector<16x256xf32>
    %14 = tpu.matmul %11, %13, %cst_14 {dimension_numbers = #tpu.dot_dimension_numbers<[1], [0], [0], [1], [0, 0, 1, 1], [], []>} : vector<16x96xbf16>, vector<96x256xbf16>, vector<16x256xf32> -> vector<16x256xf32>
    %15 = arith.addf %7, %14 : vector<16x256xf32>
    %c2 = arith.constant 2 : index
    %c0_15 = arith.constant 0 : index
    %c0_16 = arith.constant 0 : index
    %16 = vector.load %arg1[%c2, %c0_15, %c0_16] : memref<3x16x32xbf16, #tpu.memory_space<vmem>>, vector<1x16x32xbf16>
    %17 = vector.shape_cast %16 : vector<1x16x32xbf16> to vector<16x32xbf16>
    %cst_17 = arith.constant dense<0.000000e+00> : vector<16x96xf32>
    %18 = tpu.matmul %17, %0, %cst_17 {dimension_numbers = #tpu.dot_dimension_numbers<[1], [0], [0], [1], [0, 0, 1, 1], [], []>} : vector<16x32xbf16>, vector<32x96xbf16>, vector<16x96xf32> -> vector<16x96xf32>
    %19 = arith.truncf %18 : vector<16x96xf32> to vector<16x96xbf16>
    %c2_18 = arith.constant 2 : index
    %c0_19 = arith.constant 0 : index
    %c0_20 = arith.constant 0 : index
    %20 = vector.load %arg2[%c2_18, %c0_19, %c0_20] : memref<3x96x256xbf16, #tpu.memory_space<vmem>>, vector<1x96x256xbf16>
    %21 = vector.shape_cast %20 : vector<1x96x256xbf16> to vector<96x256xbf16>
    %cst_21 = arith.constant dense<0.000000e+00> : vector<16x256xf32>
    %22 = tpu.matmul %19, %21, %cst_21 {dimension_numbers = #tpu.dot_dimension_numbers<[1], [0], [0], [1], [0, 0, 1, 1], [], []>} : vector<16x96xbf16>, vector<96x256xbf16>, vector<16x256xf32> -> vector<16x256xf32>
    %23 = arith.addf %15, %22 : vector<16x256xf32>
    %c0_22 = arith.constant 0 : index
    %c0_23 = arith.constant 0 : index
    %24 = vector.load %arg3[%c0_22, %c0_23] : memref<1x256xf32, #tpu.memory_space<vmem>>, vector<1x256xf32>
    %25 = vector.broadcast %24 : vector<1x256xf32> to vector<16x256xf32>
    %26 = arith.addf %23, %25 : vector<16x256xf32>
    %cst_24 = arith.constant 0.000000e+00 : f32
    %27 = vector.broadcast %cst_24 : f32 to vector<16x256xf32>
    %28 = arith.maximumf %26, %27 : vector<16x256xf32>
    %29 = arith.truncf %28 : vector<16x256xf32> to vector<16x256xbf16>
    %c0_25 = arith.constant 0 : index
    %c0_26 = arith.constant 0 : index
    %c0_27 = arith.constant 0 : index
    %30 = vector.load %arg4[%c0_25, %c0_26, %c0_27] : memref<3x8x16xbf16, #tpu.memory_space<vmem>>, vector<1x8x16xbf16>
    %31 = vector.shape_cast %30 : vector<1x8x16xbf16> to vector<8x16xbf16>
    %cst_28 = arith.constant dense<0.000000e+00> : vector<8x256xf32>
    %32 = tpu.matmul %31, %29, %cst_28 {dimension_numbers = #tpu.dot_dimension_numbers<[1], [0], [0], [1], [0, 0, 1, 1], [], []>} : vector<8x16xbf16>, vector<16x256xbf16>, vector<8x256xf32> -> vector<8x256xf32>
    %33 = arith.truncf %32 : vector<8x256xf32> to vector<8x256xbf16>
    %c0_29 = arith.constant 0 : index
    %c0_30 = arith.constant 0 : index
    %c0_31 = arith.constant 0 : index
    %34 = vector.load %arg5[%c0_29, %c0_30, %c0_31] : memref<3x256x256xbf16, #tpu.memory_space<vmem>>, vector<1x256x256xbf16>
    %35 = vector.shape_cast %34 : vector<1x256x256xbf16> to vector<256x256xbf16>
    %cst_32 = arith.constant dense<0.000000e+00> : vector<8x256xf32>
    %36 = tpu.matmul %33, %35, %cst_32 {dimension_numbers = #tpu.dot_dimension_numbers<[1], [0], [0], [1], [0, 0, 1, 1], [], []>} : vector<8x256xbf16>, vector<256x256xbf16>, vector<8x256xf32> -> vector<8x256xf32>
    %c1_33 = arith.constant 1 : index
    %c0_34 = arith.constant 0 : index
    %c0_35 = arith.constant 0 : index
    %37 = vector.load %arg4[%c1_33, %c0_34, %c0_35] : memref<3x8x16xbf16, #tpu.memory_space<vmem>>, vector<1x8x16xbf16>
    %38 = vector.shape_cast %37 : vector<1x8x16xbf16> to vector<8x16xbf16>
    %cst_36 = arith.constant dense<0.000000e+00> : vector<8x256xf32>
    %39 = tpu.matmul %38, %29, %cst_36 {dimension_numbers = #tpu.dot_dimension_numbers<[1], [0], [0], [1], [0, 0, 1, 1], [], []>} : vector<8x16xbf16>, vector<16x256xbf16>, vector<8x256xf32> -> vector<8x256xf32>
    %40 = arith.truncf %39 : vector<8x256xf32> to vector<8x256xbf16>
    %c1_37 = arith.constant 1 : index
    %c0_38 = arith.constant 0 : index
    %c0_39 = arith.constant 0 : index
    %41 = vector.load %arg5[%c1_37, %c0_38, %c0_39] : memref<3x256x256xbf16, #tpu.memory_space<vmem>>, vector<1x256x256xbf16>
    %42 = vector.shape_cast %41 : vector<1x256x256xbf16> to vector<256x256xbf16>
    %cst_40 = arith.constant dense<0.000000e+00> : vector<8x256xf32>
    %43 = tpu.matmul %40, %42, %cst_40 {dimension_numbers = #tpu.dot_dimension_numbers<[1], [0], [0], [1], [0, 0, 1, 1], [], []>} : vector<8x256xbf16>, vector<256x256xbf16>, vector<8x256xf32> -> vector<8x256xf32>
    %44 = arith.addf %36, %43 : vector<8x256xf32>
    %c2_41 = arith.constant 2 : index
    %c0_42 = arith.constant 0 : index
    %c0_43 = arith.constant 0 : index
    %45 = vector.load %arg4[%c2_41, %c0_42, %c0_43] : memref<3x8x16xbf16, #tpu.memory_space<vmem>>, vector<1x8x16xbf16>
    %46 = vector.shape_cast %45 : vector<1x8x16xbf16> to vector<8x16xbf16>
    %cst_44 = arith.constant dense<0.000000e+00> : vector<8x256xf32>
    %47 = tpu.matmul %46, %29, %cst_44 {dimension_numbers = #tpu.dot_dimension_numbers<[1], [0], [0], [1], [0, 0, 1, 1], [], []>} : vector<8x16xbf16>, vector<16x256xbf16>, vector<8x256xf32> -> vector<8x256xf32>
    %48 = arith.truncf %47 : vector<8x256xf32> to vector<8x256xbf16>
    %c2_45 = arith.constant 2 : index
    %c0_46 = arith.constant 0 : index
    %c0_47 = arith.constant 0 : index
    %49 = vector.load %arg5[%c2_45, %c0_46, %c0_47] : memref<3x256x256xbf16, #tpu.memory_space<vmem>>, vector<1x256x256xbf16>
    %50 = vector.shape_cast %49 : vector<1x256x256xbf16> to vector<256x256xbf16>
    %cst_48 = arith.constant dense<0.000000e+00> : vector<8x256xf32>
    %51 = tpu.matmul %48, %50, %cst_48 {dimension_numbers = #tpu.dot_dimension_numbers<[1], [0], [0], [1], [0, 0, 1, 1], [], []>} : vector<8x256xbf16>, vector<256x256xbf16>, vector<8x256xf32> -> vector<8x256xf32>
    %52 = arith.addf %44, %51 : vector<8x256xf32>
    %c0_49 = arith.constant 0 : index
    %c0_50 = arith.constant 0 : index
    %53 = vector.load %arg6[%c0_49, %c0_50] : memref<1x256xf32, #tpu.memory_space<vmem>>, vector<1x256xf32>
    %54 = vector.broadcast %53 : vector<1x256xf32> to vector<8x256xf32>
    %55 = arith.addf %52, %54 : vector<8x256xf32>
    %cst_51 = arith.constant 0.000000e+00 : f32
    %56 = vector.broadcast %cst_51 : f32 to vector<8x256xf32>
    %57 = arith.maximumf %55, %56 : vector<8x256xf32>
    %58 = arith.truncf %57 : vector<8x256xf32> to vector<8x256xbf16>
    %c0_52 = arith.constant 0 : index
    %c0_53 = arith.constant 0 : index
    %c0_54 = arith.constant 0 : index
    %59 = vector.load %arg7[%c0_52, %c0_53, %c0_54] : memref<3x4x8xbf16, #tpu.memory_space<vmem>>, vector<1x4x8xbf16>
    %60 = vector.shape_cast %59 : vector<1x4x8xbf16> to vector<4x8xbf16>
    %cst_55 = arith.constant dense<0.000000e+00> : vector<4x256xf32>
    %61 = tpu.matmul %60, %58, %cst_55 {dimension_numbers = #tpu.dot_dimension_numbers<[1], [0], [0], [1], [0, 0, 1, 1], [], []>} : vector<4x8xbf16>, vector<8x256xbf16>, vector<4x256xf32> -> vector<4x256xf32>
    %62 = arith.truncf %61 : vector<4x256xf32> to vector<4x256xbf16>
    %c0_56 = arith.constant 0 : index
    %c0_57 = arith.constant 0 : index
    %c0_58 = arith.constant 0 : index
    %63 = vector.load %arg8[%c0_56, %c0_57, %c0_58] : memref<3x256x256xbf16, #tpu.memory_space<vmem>>, vector<1x256x256xbf16>
    %64 = vector.shape_cast %63 : vector<1x256x256xbf16> to vector<256x256xbf16>
    %cst_59 = arith.constant dense<0.000000e+00> : vector<4x256xf32>
    %65 = tpu.matmul %62, %64, %cst_59 {dimension_numbers = #tpu.dot_dimension_numbers<[1], [0], [0], [1], [0, 0, 1, 1], [], []>} : vector<4x256xbf16>, vector<256x256xbf16>, vector<4x256xf32> -> vector<4x256xf32>
    %c1_60 = arith.constant 1 : index
    %c0_61 = arith.constant 0 : index
    %c0_62 = arith.constant 0 : index
    %66 = vector.load %arg7[%c1_60, %c0_61, %c0_62] : memref<3x4x8xbf16, #tpu.memory_space<vmem>>, vector<1x4x8xbf16>
    %67 = vector.shape_cast %66 : vector<1x4x8xbf16> to vector<4x8xbf16>
    %cst_63 = arith.constant dense<0.000000e+00> : vector<4x256xf32>
    %68 = tpu.matmul %67, %58, %cst_63 {dimension_numbers = #tpu.dot_dimension_numbers<[1], [0], [0], [1], [0, 0, 1, 1], [], []>} : vector<4x8xbf16>, vector<8x256xbf16>, vector<4x256xf32> -> vector<4x256xf32>
    %69 = arith.truncf %68 : vector<4x256xf32> to vector<4x256xbf16>
    %c1_64 = arith.constant 1 : index
    %c0_65 = arith.constant 0 : index
    %c0_66 = arith.constant 0 : index
    %70 = vector.load %arg8[%c1_64, %c0_65, %c0_66] : memref<3x256x256xbf16, #tpu.memory_space<vmem>>, vector<1x256x256xbf16>
    %71 = vector.shape_cast %70 : vector<1x256x256xbf16> to vector<256x256xbf16>
    %cst_67 = arith.constant dense<0.000000e+00> : vector<4x256xf32>
    %72 = tpu.matmul %69, %71, %cst_67 {dimension_numbers = #tpu.dot_dimension_numbers<[1], [0], [0], [1], [0, 0, 1, 1], [], []>} : vector<4x256xbf16>, vector<256x256xbf16>, vector<4x256xf32> -> vector<4x256xf32>
    %73 = arith.addf %65, %72 : vector<4x256xf32>
    %c2_68 = arith.constant 2 : index
    %c0_69 = arith.constant 0 : index
    %c0_70 = arith.constant 0 : index
    %74 = vector.load %arg7[%c2_68, %c0_69, %c0_70] : memref<3x4x8xbf16, #tpu.memory_space<vmem>>, vector<1x4x8xbf16>
    %75 = vector.shape_cast %74 : vector<1x4x8xbf16> to vector<4x8xbf16>
    %cst_71 = arith.constant dense<0.000000e+00> : vector<4x256xf32>
    %76 = tpu.matmul %75, %58, %cst_71 {dimension_numbers = #tpu.dot_dimension_numbers<[1], [0], [0], [1], [0, 0, 1, 1], [], []>} : vector<4x8xbf16>, vector<8x256xbf16>, vector<4x256xf32> -> vector<4x256xf32>
    %77 = arith.truncf %76 : vector<4x256xf32> to vector<4x256xbf16>
    %c2_72 = arith.constant 2 : index
    %c0_73 = arith.constant 0 : index
    %c0_74 = arith.constant 0 : index
    %78 = vector.load %arg8[%c2_72, %c0_73, %c0_74] : memref<3x256x256xbf16, #tpu.memory_space<vmem>>, vector<1x256x256xbf16>
    %79 = vector.shape_cast %78 : vector<1x256x256xbf16> to vector<256x256xbf16>
    %cst_75 = arith.constant dense<0.000000e+00> : vector<4x256xf32>
    %80 = tpu.matmul %77, %79, %cst_75 {dimension_numbers = #tpu.dot_dimension_numbers<[1], [0], [0], [1], [0, 0, 1, 1], [], []>} : vector<4x256xbf16>, vector<256x256xbf16>, vector<4x256xf32> -> vector<4x256xf32>
    %81 = arith.addf %73, %80 : vector<4x256xf32>
    %c0_76 = arith.constant 0 : index
    %c0_77 = arith.constant 0 : index
    %82 = vector.load %arg9[%c0_76, %c0_77] : memref<1x256xf32, #tpu.memory_space<vmem>>, vector<1x256xf32>
    %83 = vector.broadcast %82 : vector<1x256xf32> to vector<4x256xf32>
    %84 = arith.addf %81, %83 : vector<4x256xf32>
    %cst_78 = arith.constant 0.000000e+00 : f32
    %85 = vector.broadcast %cst_78 : f32 to vector<4x256xf32>
    %86 = arith.maximumf %84, %85 : vector<4x256xf32>
    %87 = arith.truncf %86 : vector<4x256xf32> to vector<4x256xbf16>
    %c0_79 = arith.constant 0 : index
    %c0_80 = arith.constant 0 : index
    %c0_81 = arith.constant 0 : index
    %88 = vector.load %arg10[%c0_79, %c0_80, %c0_81] : memref<3x8x4xbf16, #tpu.memory_space<vmem>>, vector<1x8x4xbf16>
    %89 = vector.shape_cast %88 : vector<1x8x4xbf16> to vector<8x4xbf16>
    %cst_82 = arith.constant dense<0.000000e+00> : vector<8x256xf32>
    %90 = tpu.matmul %89, %87, %cst_82 {dimension_numbers = #tpu.dot_dimension_numbers<[1], [0], [0], [1], [0, 0, 1, 1], [], []>} : vector<8x4xbf16>, vector<4x256xbf16>, vector<8x256xf32> -> vector<8x256xf32>
    %91 = arith.truncf %90 : vector<8x256xf32> to vector<8x256xbf16>
    %c0_83 = arith.constant 0 : index
    %c0_84 = arith.constant 0 : index
    %c0_85 = arith.constant 0 : index
    %92 = vector.load %arg11[%c0_83, %c0_84, %c0_85] : memref<3x256x256xbf16, #tpu.memory_space<vmem>>, vector<1x256x256xbf16>
    %93 = vector.shape_cast %92 : vector<1x256x256xbf16> to vector<256x256xbf16>
    %cst_86 = arith.constant dense<0.000000e+00> : vector<8x256xf32>
    %94 = tpu.matmul %91, %93, %cst_86 {dimension_numbers = #tpu.dot_dimension_numbers<[1], [0], [0], [1], [0, 0, 1, 1], [], []>} : vector<8x256xbf16>, vector<256x256xbf16>, vector<8x256xf32> -> vector<8x256xf32>
    %c1_87 = arith.constant 1 : index
    %c0_88 = arith.constant 0 : index
    %c0_89 = arith.constant 0 : index
    %95 = vector.load %arg10[%c1_87, %c0_88, %c0_89] : memref<3x8x4xbf16, #tpu.memory_space<vmem>>, vector<1x8x4xbf16>
    %96 = vector.shape_cast %95 : vector<1x8x4xbf16> to vector<8x4xbf16>
    %cst_90 = arith.constant dense<0.000000e+00> : vector<8x256xf32>
    %97 = tpu.matmul %96, %87, %cst_90 {dimension_numbers = #tpu.dot_dimension_numbers<[1], [0], [0], [1], [0, 0, 1, 1], [], []>} : vector<8x4xbf16>, vector<4x256xbf16>, vector<8x256xf32> -> vector<8x256xf32>
    %98 = arith.truncf %97 : vector<8x256xf32> to vector<8x256xbf16>
    %c1_91 = arith.constant 1 : index
    %c0_92 = arith.constant 0 : index
    %c0_93 = arith.constant 0 : index
    %99 = vector.load %arg11[%c1_91, %c0_92, %c0_93] : memref<3x256x256xbf16, #tpu.memory_space<vmem>>, vector<1x256x256xbf16>
    %100 = vector.shape_cast %99 : vector<1x256x256xbf16> to vector<256x256xbf16>
    %cst_94 = arith.constant dense<0.000000e+00> : vector<8x256xf32>
    %101 = tpu.matmul %98, %100, %cst_94 {dimension_numbers = #tpu.dot_dimension_numbers<[1], [0], [0], [1], [0, 0, 1, 1], [], []>} : vector<8x256xbf16>, vector<256x256xbf16>, vector<8x256xf32> -> vector<8x256xf32>
    %102 = arith.addf %94, %101 : vector<8x256xf32>
    %c2_95 = arith.constant 2 : index
    %c0_96 = arith.constant 0 : index
    %c0_97 = arith.constant 0 : index
    %103 = vector.load %arg10[%c2_95, %c0_96, %c0_97] : memref<3x8x4xbf16, #tpu.memory_space<vmem>>, vector<1x8x4xbf16>
    %104 = vector.shape_cast %103 : vector<1x8x4xbf16> to vector<8x4xbf16>
    %cst_98 = arith.constant dense<0.000000e+00> : vector<8x256xf32>
    %105 = tpu.matmul %104, %87, %cst_98 {dimension_numbers = #tpu.dot_dimension_numbers<[1], [0], [0], [1], [0, 0, 1, 1], [], []>} : vector<8x4xbf16>, vector<4x256xbf16>, vector<8x256xf32> -> vector<8x256xf32>
    %106 = arith.truncf %105 : vector<8x256xf32> to vector<8x256xbf16>
    %c2_99 = arith.constant 2 : index
    %c0_100 = arith.constant 0 : index
    %c0_101 = arith.constant 0 : index
    %107 = vector.load %arg11[%c2_99, %c0_100, %c0_101] : memref<3x256x256xbf16, #tpu.memory_space<vmem>>, vector<1x256x256xbf16>
    %108 = vector.shape_cast %107 : vector<1x256x256xbf16> to vector<256x256xbf16>
    %cst_102 = arith.constant dense<0.000000e+00> : vector<8x256xf32>
    %109 = tpu.matmul %106, %108, %cst_102 {dimension_numbers = #tpu.dot_dimension_numbers<[1], [0], [0], [1], [0, 0, 1, 1], [], []>} : vector<8x256xbf16>, vector<256x256xbf16>, vector<8x256xf32> -> vector<8x256xf32>
    %110 = arith.addf %102, %109 : vector<8x256xf32>
    %c0_103 = arith.constant 0 : index
    %c0_104 = arith.constant 0 : index
    %111 = vector.load %arg12[%c0_103, %c0_104] : memref<1x256xf32, #tpu.memory_space<vmem>>, vector<1x256xf32>
    %112 = vector.broadcast %111 : vector<1x256xf32> to vector<8x256xf32>
    %113 = arith.addf %110, %112 : vector<8x256xf32>
    %cst_105 = arith.constant 0.000000e+00 : f32
    %114 = vector.broadcast %cst_105 : f32 to vector<8x256xf32>
    %115 = arith.maximumf %113, %114 : vector<8x256xf32>
    %116 = arith.truncf %115 : vector<8x256xf32> to vector<8x256xbf16>
    %c0_106 = arith.constant 0 : index
    %c0_107 = arith.constant 0 : index
    %c0_108 = arith.constant 0 : index
    %117 = vector.load %arg13[%c0_106, %c0_107, %c0_108] : memref<3x16x8xbf16, #tpu.memory_space<vmem>>, vector<1x16x8xbf16>
    %118 = vector.shape_cast %117 : vector<1x16x8xbf16> to vector<16x8xbf16>
    %cst_109 = arith.constant dense<0.000000e+00> : vector<16x256xf32>
    %119 = tpu.matmul %118, %116, %cst_109 {dimension_numbers = #tpu.dot_dimension_numbers<[1], [0], [0], [1], [0, 0, 1, 1], [], []>} : vector<16x8xbf16>, vector<8x256xbf16>, vector<16x256xf32> -> vector<16x256xf32>
    %120 = arith.truncf %119 : vector<16x256xf32> to vector<16x256xbf16>
    %c0_110 = arith.constant 0 : index
    %c0_111 = arith.constant 0 : index
    %c0_112 = arith.constant 0 : index
    %121 = vector.load %arg14[%c0_110, %c0_111, %c0_112] : memref<3x256x256xbf16, #tpu.memory_space<vmem>>, vector<1x256x256xbf16>
    %122 = vector.shape_cast %121 : vector<1x256x256xbf16> to vector<256x256xbf16>
    %cst_113 = arith.constant dense<0.000000e+00> : vector<16x256xf32>
    %123 = tpu.matmul %120, %122, %cst_113 {dimension_numbers = #tpu.dot_dimension_numbers<[1], [0], [0], [1], [0, 0, 1, 1], [], []>} : vector<16x256xbf16>, vector<256x256xbf16>, vector<16x256xf32> -> vector<16x256xf32>
    %c1_114 = arith.constant 1 : index
    %c0_115 = arith.constant 0 : index
    %c0_116 = arith.constant 0 : index
    %124 = vector.load %arg13[%c1_114, %c0_115, %c0_116] : memref<3x16x8xbf16, #tpu.memory_space<vmem>>, vector<1x16x8xbf16>
    %125 = vector.shape_cast %124 : vector<1x16x8xbf16> to vector<16x8xbf16>
    %cst_117 = arith.constant dense<0.000000e+00> : vector<16x256xf32>
    %126 = tpu.matmul %125, %116, %cst_117 {dimension_numbers = #tpu.dot_dimension_numbers<[1], [0], [0], [1], [0, 0, 1, 1], [], []>} : vector<16x8xbf16>, vector<8x256xbf16>, vector<16x256xf32> -> vector<16x256xf32>
    %127 = arith.truncf %126 : vector<16x256xf32> to vector<16x256xbf16>
    %c1_118 = arith.constant 1 : index
    %c0_119 = arith.constant 0 : index
    %c0_120 = arith.constant 0 : index
    %128 = vector.load %arg14[%c1_118, %c0_119, %c0_120] : memref<3x256x256xbf16, #tpu.memory_space<vmem>>, vector<1x256x256xbf16>
    %129 = vector.shape_cast %128 : vector<1x256x256xbf16> to vector<256x256xbf16>
    %cst_121 = arith.constant dense<0.000000e+00> : vector<16x256xf32>
    %130 = tpu.matmul %127, %129, %cst_121 {dimension_numbers = #tpu.dot_dimension_numbers<[1], [0], [0], [1], [0, 0, 1, 1], [], []>} : vector<16x256xbf16>, vector<256x256xbf16>, vector<16x256xf32> -> vector<16x256xf32>
    %131 = arith.addf %123, %130 : vector<16x256xf32>
    %c2_122 = arith.constant 2 : index
    %c0_123 = arith.constant 0 : index
    %c0_124 = arith.constant 0 : index
    %132 = vector.load %arg13[%c2_122, %c0_123, %c0_124] : memref<3x16x8xbf16, #tpu.memory_space<vmem>>, vector<1x16x8xbf16>
    %133 = vector.shape_cast %132 : vector<1x16x8xbf16> to vector<16x8xbf16>
    %cst_125 = arith.constant dense<0.000000e+00> : vector<16x256xf32>
    %134 = tpu.matmul %133, %116, %cst_125 {dimension_numbers = #tpu.dot_dimension_numbers<[1], [0], [0], [1], [0, 0, 1, 1], [], []>} : vector<16x8xbf16>, vector<8x256xbf16>, vector<16x256xf32> -> vector<16x256xf32>
    %135 = arith.truncf %134 : vector<16x256xf32> to vector<16x256xbf16>
    %c2_126 = arith.constant 2 : index
    %c0_127 = arith.constant 0 : index
    %c0_128 = arith.constant 0 : index
    %136 = vector.load %arg14[%c2_126, %c0_127, %c0_128] : memref<3x256x256xbf16, #tpu.memory_space<vmem>>, vector<1x256x256xbf16>
    %137 = vector.shape_cast %136 : vector<1x256x256xbf16> to vector<256x256xbf16>
    %cst_129 = arith.constant dense<0.000000e+00> : vector<16x256xf32>
    %138 = tpu.matmul %135, %137, %cst_129 {dimension_numbers = #tpu.dot_dimension_numbers<[1], [0], [0], [1], [0, 0, 1, 1], [], []>} : vector<16x256xbf16>, vector<256x256xbf16>, vector<16x256xf32> -> vector<16x256xf32>
    %139 = arith.addf %131, %138 : vector<16x256xf32>
    %c0_130 = arith.constant 0 : index
    %c0_131 = arith.constant 0 : index
    %140 = vector.load %arg15[%c0_130, %c0_131] : memref<1x256xf32, #tpu.memory_space<vmem>>, vector<1x256xf32>
    %141 = vector.broadcast %140 : vector<1x256xf32> to vector<16x256xf32>
    %142 = arith.addf %139, %141 : vector<16x256xf32>
    %cst_132 = arith.constant 0.000000e+00 : f32
    %143 = vector.broadcast %cst_132 : f32 to vector<16x256xf32>
    %144 = arith.maximumf %142, %143 : vector<16x256xf32>
    %145 = arith.truncf %144 : vector<16x256xf32> to vector<16x256xbf16>
    %c0_133 = arith.constant 0 : index
    %c0_134 = arith.constant 0 : index
    %c0_135 = arith.constant 0 : index
    %146 = vector.load %arg16[%c0_133, %c0_134, %c0_135] : memref<3x32x16xbf16, #tpu.memory_space<vmem>>, vector<1x32x16xbf16>
    %147 = vector.shape_cast %146 : vector<1x32x16xbf16> to vector<32x16xbf16>
    %cst_136 = arith.constant dense<0.000000e+00> : vector<32x256xf32>
    %148 = tpu.matmul %147, %145, %cst_136 {dimension_numbers = #tpu.dot_dimension_numbers<[1], [0], [0], [1], [0, 0, 1, 1], [], []>} : vector<32x16xbf16>, vector<16x256xbf16>, vector<32x256xf32> -> vector<32x256xf32>
    %149 = arith.truncf %148 : vector<32x256xf32> to vector<32x256xbf16>
    %c0_137 = arith.constant 0 : index
    %c0_138 = arith.constant 0 : index
    %c0_139 = arith.constant 0 : index
    %150 = vector.load %arg17[%c0_137, %c0_138, %c0_139] : memref<3x256x96xbf16, #tpu.memory_space<vmem>>, vector<1x256x96xbf16>
    %151 = vector.shape_cast %150 : vector<1x256x96xbf16> to vector<256x96xbf16>
    %cst_140 = arith.constant dense<0.000000e+00> : vector<32x96xf32>
    %152 = tpu.matmul %149, %151, %cst_140 {dimension_numbers = #tpu.dot_dimension_numbers<[1], [0], [0], [1], [0, 0, 1, 1], [], []>} : vector<32x256xbf16>, vector<256x96xbf16>, vector<32x96xf32> -> vector<32x96xf32>
    %c1_141 = arith.constant 1 : index
    %c0_142 = arith.constant 0 : index
    %c0_143 = arith.constant 0 : index
    %153 = vector.load %arg16[%c1_141, %c0_142, %c0_143] : memref<3x32x16xbf16, #tpu.memory_space<vmem>>, vector<1x32x16xbf16>
    %154 = vector.shape_cast %153 : vector<1x32x16xbf16> to vector<32x16xbf16>
    %cst_144 = arith.constant dense<0.000000e+00> : vector<32x256xf32>
    %155 = tpu.matmul %154, %145, %cst_144 {dimension_numbers = #tpu.dot_dimension_numbers<[1], [0], [0], [1], [0, 0, 1, 1], [], []>} : vector<32x16xbf16>, vector<16x256xbf16>, vector<32x256xf32> -> vector<32x256xf32>
    %156 = arith.truncf %155 : vector<32x256xf32> to vector<32x256xbf16>
    %c1_145 = arith.constant 1 : index
    %c0_146 = arith.constant 0 : index
    %c0_147 = arith.constant 0 : index
    %157 = vector.load %arg17[%c1_145, %c0_146, %c0_147] : memref<3x256x96xbf16, #tpu.memory_space<vmem>>, vector<1x256x96xbf16>
    %158 = vector.shape_cast %157 : vector<1x256x96xbf16> to vector<256x96xbf16>
    %cst_148 = arith.constant dense<0.000000e+00> : vector<32x96xf32>
    %159 = tpu.matmul %156, %158, %cst_148 {dimension_numbers = #tpu.dot_dimension_numbers<[1], [0], [0], [1], [0, 0, 1, 1], [], []>} : vector<32x256xbf16>, vector<256x96xbf16>, vector<32x96xf32> -> vector<32x96xf32>
    %160 = arith.addf %152, %159 : vector<32x96xf32>
    %c2_149 = arith.constant 2 : index
    %c0_150 = arith.constant 0 : index
    %c0_151 = arith.constant 0 : index
    %161 = vector.load %arg16[%c2_149, %c0_150, %c0_151] : memref<3x32x16xbf16, #tpu.memory_space<vmem>>, vector<1x32x16xbf16>
    %162 = vector.shape_cast %161 : vector<1x32x16xbf16> to vector<32x16xbf16>
    %cst_152 = arith.constant dense<0.000000e+00> : vector<32x256xf32>
    %163 = tpu.matmul %162, %145, %cst_152 {dimension_numbers = #tpu.dot_dimension_numbers<[1], [0], [0], [1], [0, 0, 1, 1], [], []>} : vector<32x16xbf16>, vector<16x256xbf16>, vector<32x256xf32> -> vector<32x256xf32>
    %164 = arith.truncf %163 : vector<32x256xf32> to vector<32x256xbf16>
    %c2_153 = arith.constant 2 : index
    %c0_154 = arith.constant 0 : index
    %c0_155 = arith.constant 0 : index
    %165 = vector.load %arg17[%c2_153, %c0_154, %c0_155] : memref<3x256x96xbf16, #tpu.memory_space<vmem>>, vector<1x256x96xbf16>
    %166 = vector.shape_cast %165 : vector<1x256x96xbf16> to vector<256x96xbf16>
    %cst_156 = arith.constant dense<0.000000e+00> : vector<32x96xf32>
    %167 = tpu.matmul %164, %166, %cst_156 {dimension_numbers = #tpu.dot_dimension_numbers<[1], [0], [0], [1], [0, 0, 1, 1], [], []>} : vector<32x256xbf16>, vector<256x96xbf16>, vector<32x96xf32> -> vector<32x96xf32>
    %168 = arith.addf %160, %167 : vector<32x96xf32>
    %c0_157 = arith.constant 0 : index
    %c0_158 = arith.constant 0 : index
    %169 = vector.load %arg18[%c0_157, %c0_158] : memref<1x96xf32, #tpu.memory_space<vmem>>, vector<1x96xf32>
    %170 = vector.broadcast %169 : vector<1x96xf32> to vector<32x96xf32>
    %171 = arith.addf %168, %170 : vector<32x96xf32>
    %cst_159 = arith.constant 0.000000e+00 : f32
    %172 = vector.broadcast %cst_159 : f32 to vector<32x96xf32>
    %173 = arith.subf %172, %171 : vector<32x96xf32>
    %174 = math.exp %173 : vector<32x96xf32>
    %cst_160 = arith.constant 1.000000e+00 : f32
    %175 = vector.broadcast %cst_160 : f32 to vector<32x96xf32>
    %176 = arith.addf %175, %174 : vector<32x96xf32>
    %177 = tpu.reciprocal %176 {approx = true} : vector<32x96xf32> -> vector<32x96xf32>
    %c0_161 = arith.constant 0 : index
    %c0_162 = arith.constant 0 : index
    %178 = vector.load %arg19[%c0_161, %c0_162] : memref<32x96xf32, #tpu.memory_space<vmem>>, vector<32x96xf32>
    tpu.vector_store %arg19[%c0_161, %c0_162], %177 {strides = array<i32>} : memref<32x96xf32, #tpu.memory_space<vmem>>, vector<32x96xf32>,
    return
  }
}

</mosaic_0001>

<bundles_post_ra>
// kernel: autoencoder_forward.1
= control target key start
LH: loop header
LB: loop body
LE: loop exit
PB: predicated region body
PF: predicated region fallthrough
CT: control target
= control target key end

     0   :  { %s9090_s0 = inlined_call_operand.vmem [shape: bf16[32,96], index: 0, kind: input, shape index: {}]   ;;  %s9091_s1 = inlined_call_operand.hbm [shape: bf16[3,16,32], index: 1, kind: input, shape index: {}]   ;;  %s9092_s2 = inlined_call_operand.vmem [shape: bf16[3,96,256], index: 2, kind: input, shape index: {}]   ;;  %s9093_s3 = inlined_call_operand.hbm [shape: f32[1,256], index: 3, kind: input, shape index: {}]   ;;  %s9094_s4 = inlined_call_operand.hbm [shape: bf16[3,8,16], index: 4, kind: input, shape index: {}]   ;;  %s9095_s5 = inlined_call_operand.vmem [shape: bf16[3,256,256], index: 5, kind: input, shape index: {}]   ;;  %s9096_s6 = inlined_call_operand.hbm [shape: f32[1,256], index: 6, kind: input, shape index: {}]   ;;  %s9097_s7 = inlined_call_operand.vmem [shape: bf16[3,4,8], index: 7, kind: input, shape index: {}]   ;;  %s9098_s8 = inlined_call_operand.hbm [shape: bf16[3,256,256], index: 8, kind: input, shape index: {}]   ;;  %s9099_s9 = inlined_call_operand.hbm [shape: f32[1,256], index: 9, kind: input, shape index: {}]   ;;  %s9100_s10 = inlined_call_operand.hbm [shape: bf16[3,8,4], index: 10, kind: input, shape index: {}]   ;;  %s9101_s11 = inlined_call_operand.hbm [shape: bf16[3,256,256], index: 11, kind: input, shape index: {}]   ;;  %s9102_s12 = inlined_call_operand.hbm [shape: f32[1,256], index: 12, kind: input, shape index: {}]   ;;  %s9103_s13 = inlined_call_operand.vmem [shape: bf16[3,16,8], index: 13, kind: input, shape index: {}]   ;;  %s9104_s14 = inlined_call_operand.hbm [shape: bf16[3,256,256], index: 14, kind: input, shape index: {}]   ;;  %s9105_s15 = inlined_call_operand.hbm [shape: f32[1,256], index: 15, kind: input, shape index: {}]   ;;  %s9106_s16 = inlined_call_operand.hbm [shape: bf16[3,32,16], index: 16, kind: input, shape index: {}]   ;;  %s9107_s17 = inlined_call_operand.vmem [shape: bf16[3,256,96], index: 17, kind: input, shape index: {}]   ;;  %s9108_s18 = inlined_call_operand.hbm [shape: f32[1,96], index: 18, kind: input, shape index: {}]   ;;  %s9109_s19 = inlined_call_operand.vmem [shape: f32[32,96], index: 19, kind: output, shape index: {}]  }
   0x1   :  { %9112 = sst [smem:[#allocation29_spill]] %s9090_s0 }
   0x2   :  { %9113 = sst [smem:[#allocation30_spill]] %s9091_s1 }
   0x3   :  { %9114 = sst [smem:[#allocation31_spill]] %s9092_s2 }
   0x4   :  { %9115 = sst [smem:[#allocation32_spill]] %s9093_s3 }
   0x5   :  { %24 = vsyncpa [#allocation3], 0 }
   0x6   :  { %25 = vsyncpa [#allocation5], 0 }
   0x7   :  { %26 = vsyncpa [#allocation8], 0 }
   0x8   :  { %27 = vsyncpa [#allocation11], 0 }
   0x9   :  { %28 = vsyncpa [#allocation14], 0 }
   0xa   :  { %29 = vsyncpa [#allocation17], 0  ;;  %s9116_s20 = sld [smem:[#allocation32_spill]] }
  0x10   :  { %s53_s21 = sshll.u32 %s9116_s20, 4  ;;  %s54_s21 = int_to_ptr.hbm [resolvable:$true] %s53_s21 }
  0x11   :  { %30 = vsyncpa [#allocation20], 0  ;;  %s7836_s1 = smov [#allocation4]   ;;  %s79_s24 = sshll.u32 %s9096_s6, 4  ;;  %s80_s24 = int_to_ptr.hbm [resolvable:$true] %s79_s24 }
  0x12   :  { %s55_s22 = sshll.u32 %s7836_s1, 4  ;;  %s7837_s25 = smov [#allocation7]   ;;  %s56_s22 = int_to_ptr.vmem [resolvable:$true] %s55_s22 }
  0x13   :  { %58 = dma.hbm_to_vmem [thread:$0]  %s54_s21, 32, %s56_s22, [#allocation5]  }
  0x14   :  { %s81_s3 = sshll.u32 %s7837_s25, 4  ;;  %s105_s28 = sshll.u32 %s9099_s9, 4  ;;  %s82_s3 = int_to_ptr.vmem [resolvable:$true] %s81_s3  ;;  %s106_s28 = int_to_ptr.hbm [resolvable:$true] %s105_s28 }
  0x15   :  { %84 = dma.hbm_to_vmem [thread:$0]  %s80_s24, 32, %s82_s3, [#allocation8]  }
  0x16   :  { %s7838_s29 = smov [#allocation10]   ;;  %s128_s1 = sshll.u32 %s9101_s11, 4  ;;  %s129_s1 = int_to_ptr.hbm [resolvable:$true] %s128_s1 }
  0x17   :  { %s107_s0 = sshll.u32 %s7838_s29, 4  ;;  %s7839_s6 = smov [#allocation13]   ;;  %s108_s0 = int_to_ptr.vmem [resolvable:$true] %s107_s0 }
  0x18   :  { %110 = dma.hbm_to_vmem [thread:$0]  %s106_s28, 32, %s108_s0, [#allocation11]  }
  0x19   :  { %s130_s21 = sshll.u32 %s7839_s6, 4  ;;  %s154_s23 = sshll.u32 %s9104_s14, 4  ;;  %s131_s21 = int_to_ptr.vmem [resolvable:$true] %s130_s21  ;;  %s155_s23 = int_to_ptr.hbm [resolvable:$true] %s154_s23 }
  0x1a   :  { %s7840_s9 = smov 128   ;;  %s7841_s25 = smov 8  }
  0x1b   :  { %136 = dma.hbm_to_vmem [thread:$0]  %s129_s1, 12288, %s131_s21, [#allocation14], %s7840_s9, %s7840_s9, %s7841_s25  }
  0x1c   :  { %s7842_s24 = smov [#allocation16]   ;;  %s178_s27 = sshll.u32 %s9106_s16, 4  ;;  %s179_s27 = int_to_ptr.hbm [resolvable:$true] %s178_s27 }
  0x1d   :  { %s156_s3 = sshll.u32 %s7842_s24, 4  ;;  %s7843_s14 = smov [#allocation19]   ;;  %s157_s3 = int_to_ptr.vmem [resolvable:$true] %s156_s3 }
  0x1e   :  { %162 = dma.hbm_to_vmem [thread:$0]  %s155_s23, 12288, %s157_s3, [#allocation17], %s7840_s9, %s7840_s9, %s7841_s25  }
  0x1f   :  { %s180_s28 = sshll.u32 %s7843_s14, 4  ;;  %s9117_s30 = sld [smem:[#allocation30_spill]]  ;;  %s181_s28 = int_to_ptr.vmem [resolvable:$true] %s180_s28 }
  0x20   :  { %s7844_s1 = smov 64   ;;  %s7845_s6 = smov 4  }
  0x21   :  { %186 = dma.hbm_to_vmem [thread:$0]  %s179_s27, 768, %s181_s28, [#allocation20], %s7844_s1, %s7844_s1, %s7845_s6  }
  0x22   :  { %s63_s16 = sshll.u32 %s9094_s4, 4  ;;  %s7846_s2 = smov [#allocation2]   ;;  %s64_s16 = int_to_ptr.hbm [resolvable:$true] %s63_s16 }
  0x23   :  { %s39_s24 = sshll.u32 %s7846_s2, 4  ;;  %s7847_s23 = smov [#allocation6]   ;;  %s40_s24 = int_to_ptr.vmem [resolvable:$true] %s39_s24 }
  0x24   :  { %s65_s3 = sshll.u32 %s7847_s23, 4  ;;  %s91_s14 = sshll.u32 %s9098_s8, 4  ;;  %s66_s3 = int_to_ptr.vmem [resolvable:$true] %s65_s3  ;;  %s92_s14 = int_to_ptr.hbm [resolvable:$true] %s91_s14 }
  0x25   :  { %s37_s20 = sshll.u32 %s9117_s30, 4  ;;  %s115_s28 = sshll.u32 %s9100_s10, 4  ;;  %s38_s20 = int_to_ptr.hbm [resolvable:$true] %s37_s20  ;;  %s116_s28 = int_to_ptr.hbm [resolvable:$true] %s115_s28 }
  0x26   :  { %45 = dma.hbm_to_vmem [thread:$0]  %s38_s20, 384, %s40_s24, [#allocation3], %s7844_s1, %s7844_s1, %s7845_s6  }
  0x27   :  { %71 = dma.hbm_to_vmem [thread:$0]  %s64_s16, 192, %s66_s3, [#allocation5], %s7844_s1, %s7844_s1, %s7845_s6  }
  0x28   :  { %s7848_s0 = smov [#allocation9]   ;;  %s7849_s30 = smov [#allocation12]  }
  0x29   :  { %s93_s4 = sshll.u32 %s7848_s0, 4  ;;  %s117_s20 = sshll.u32 %s7849_s30, 4  ;;  %s94_s4 = int_to_ptr.vmem [resolvable:$true] %s93_s4  ;;  %s118_s20 = int_to_ptr.vmem [resolvable:$true] %s117_s20 }
  0x2a   :  { %99 = dma.hbm_to_vmem [thread:$0]  %s92_s14, 12288, %s94_s4, [#allocation8], %s7840_s9, %s7840_s9, %s7841_s25  }
  0x2b   :  { %s142_s8 = sshll.u32 %s9102_s12, 4  ;;  %s168_s10 = sshll.u32 %s9105_s15, 4  ;;  %s143_s8 = int_to_ptr.hbm [resolvable:$true] %s142_s8  ;;  %s169_s10 = int_to_ptr.hbm [resolvable:$true] %s168_s10 }
  0x2c   :  { %123 = dma.hbm_to_vmem [thread:$0]  %s116_s28, 192, %s118_s20, [#allocation11], %s7844_s1, %s7844_s1, %s7845_s6  }
  0x2d   :  { %s7850_s24 = smov [#allocation15]   ;;  %s7851_s3 = smov [#allocation18]  }
  0x2e   :  { %s144_s23 = sshll.u32 %s7850_s24, 4  ;;  %s170_s9 = sshll.u32 %s7851_s3, 4  ;;  %s145_s23 = int_to_ptr.vmem [resolvable:$true] %s144_s23  ;;  %s171_s9 = int_to_ptr.vmem [resolvable:$true] %s170_s9 }
  0x2f   :  { %147 = dma.hbm_to_vmem [thread:$0]  %s143_s8, 32, %s145_s23, [#allocation14]  }
  0x30   :  { %s194_s26 = sshll.u32 %s9108_s18, 4  ;;  %s7852_s12 = smov [#allocation21]   ;;  %s195_s26 = int_to_ptr.hbm [resolvable:$true] %s194_s26 }
  0x31   :  { %173 = dma.hbm_to_vmem [thread:$0]  %s169_s10, 32, %s171_s9, [#allocation17]  }
  0x32   :  { %s196_s1 = sshll.u32 %s7852_s12, 4  ;;  %s197_s1 = int_to_ptr.vmem [resolvable:$true] %s196_s1 }
  0x33   :  { %199 = dma.hbm_to_vmem [thread:$0]  %s195_s26, 16, %s197_s1, [#allocation20]  }
  0x34   :  { %7822 = dma.done.wait [#allocation3], 384  }
  0x35   :  { %7823 = vsyncadd [#allocation3], 4294966912 }
  0x36   :  { %7824 = dma.done.wait [#allocation5], 224  }
  0x37   :  { %7825 = vsyncadd [#allocation5], 4294967072 }
  0x38   :  { %7826 = dma.done.wait [#allocation8], 12320  }
  0x39   :  { %7827 = vsyncadd [#allocation8], 4294954976 }
  0x3a   :  { %7828 = dma.done.wait [#allocation11], 224  }
  0x3b   :  { %7829 = vsyncadd [#allocation11], 4294967072 }
  0x3c   :  { %7830 = dma.done.wait [#allocation14], 12320  }
  0x3d   :  { %7831 = vsyncadd [#allocation14], 4294954976 }
  0x3e   :  { %7832 = dma.done.wait [#allocation17], 12320  }
  0x3f   :  { %7833 = vsyncadd [#allocation17], 4294954976 }
  0x40   :  { %7834 = dma.done.wait [#allocation20], 784  }
  0x41   :  { %7835 = vsyncadd [#allocation20], 4294966512  ;;  %s9118_s6 = sld [smem:[#allocation29_spill]]  ;;  %vm276_vm0 = vcmask 261120   ;;  %v7009_v8 = vld [vmem:[#allocation2 + $0x8] sm:$0xff]  ;;  %v6996_v9 = vld [vmem:[#allocation2] sm:$0xff] }
  0x42   :  { %s9119_s0 = sld [smem:[#allocation31_spill]]  ;;  %vm406_vm1 = vcmask 785408   ;;  %vm680_vm2 = vcmask 130048   ;;  %vm1531_vm3 = vcmask 1043456   ;;  %vm1527_vm4 = vcmask 64512  }
  0x43   :  { %vm2385_vm5 = vcmask 1041408   ;;  %vm2381_vm6 = vcmask 31744  }
  0x47   :  { %v8004_v0 = vld [vmem:[%s9118_s6 + $0x8] sm:$0xff]  ;;  %v8009_v1 = vld [vmem:[%s9118_s6] sm:$0xff] }
  0x48   :  { %v4935_v2 = vld [vmem:[%s9119_s0 + $0xb0] sm:$0xf]  ;;  %v7021_v3 = vld [vmem:[%s9119_s0 + $0xb4] sm:$0xf0]  ;;  %324 = vmatpush.bf16.msra.mxu1 %v8004_v0  ;;  %286 = vmatpush.bf16.msra.mxu0 %v8004_v0  ;;  %v7020_v5 = vld [vmem:[%s9119_s0 + $0xb4] sm:$0xf] }
  0x49   :  { %v4936_v4 = vor.u32 %v7021_v3, %v4935_v2  ;;  %v4937_v6 = vld [vmem:[%s9119_s0 + $0xb8] sm:$0xf0]  ;;  %v4927_v7 = vld [vmem:[%s9119_s0 + $0xa0] sm:$0xf]  ;;  %v7019_v11 = vld [vmem:[%s9119_s0 + $0xa4] sm:$0xf0] }
  0x4a   :  { %v4940_v10 = vor.u32 %v7020_v5, %v4937_v6  ;;  %v7018_v12 = vld [vmem:[%s9119_s0 + $0xa4] sm:$0xf]  ;;  %v4929_v13 = vld [vmem:[%s9119_s0 + $0xa8] sm:$0xf0]  ;;  %v4928_v14 = vor.u32 %v7019_v11, %v4927_v7  ;;  %v4985_v15 = vld [vmem:[%s9119_s0 + $0x50] sm:$0xf] }
  0x4b   :  { %412 = vmatpush.bf16.msra.mxu2 %v4936_v4  ;;  %v7008_v16 = vld [vmem:[%s9119_s0 + $0x54] sm:$0xf0]  ;;  %v7007_v17 = vld [vmem:[%s9119_s0 + $0x54] sm:$0xf]  ;;  %v4987_v19 = vld [vmem:[%s9119_s0 + $0x58] sm:$0xf0]  ;;  %v4932_v22 = vor.u32 %v7018_v12, %v4929_v13 }
  0x4c   :  { %426 = vmatpush.bf16.msra.mxu3 %v4940_v10  ;;  %v4986_v18 = vor.u32 %v7008_v16, %v4985_v15  ;;  %v4919_v20 = vld [vmem:[%s9119_s0 + $0x90] sm:$0xf]  ;;  %v7017_v21 = vld [vmem:[%s9119_s0 + $0x94] sm:$0xf0]  ;;  %325 = vmatpush.bf16.msra.mxu1 %v8009_v1  ;;  %v4990_v23 = vor.u32 %v7007_v17, %v4987_v19  ;;  %v7016_v24 = vld [vmem:[%s9119_s0 + $0x94] sm:$0xf] }
  0x4d   :  { %287 = vmatpush.bf16.msra.mxu0 %v8009_v1  ;;  %v4921_v25 = vld [vmem:[%s9119_s0 + $0x98] sm:$0xf0]  ;;  %v4977_v26 = vld [vmem:[%s9119_s0 + $0x40] sm:$0xf]  ;;  %v7006_v27 = vld [vmem:[%s9119_s0 + $0x44] sm:$0xf0]  ;;  %v4920_v30 = vor.u32 %v7017_v21, %v4919_v20 }
  0x4e   :  { %v7005_v28 = vld [vmem:[%s9119_s0 + $0x44] sm:$0xf]  ;;  %v4979_v29 = vld [vmem:[%s9119_s0 + $0x48] sm:$0xf0]  ;;  %v4978_v31 = vor.u32 %v7006_v27, %v4977_v26  ;;  %v4924_v33 = vor.u32 %v7016_v24, %v4921_v25  ;;  %v4911_v34 = vld [vmem:[%s9119_s0 + $0x80] sm:$0xf] }
  0x4f   :  { %413 = vmatpush.bf16.msra.mxu2 %v4928_v14  ;;  %v4982_v32 = vor.u32 %v7005_v28, %v4979_v29  ;;  %4880 = vmatmul.msk.bf16.vlgmr.msra.gmra.mxu1 %vm276_vm0, %v7009_v8  ;;  %v7015_v35 = vld [vmem:[%s9119_s0 + $0x84] sm:$0xf0]  ;;  %v7014_v36 = vld [vmem:[%s9119_s0 + $0x84] sm:$0xf]  ;;  %v4913_v38 = vld [vmem:[%s9119_s0 + $0x88] sm:$0xf0] }
  0x50   :  { %517 = vmatpush.bf16.msrb.mxu1 %v4990_v23  ;;  %4875 = vmatmul.msk.bf16.vlgmr.msra.gmra.mxu0 %vm276_vm0, %v6996_v9  ;;  %v4912_v37 = vor.u32 %v7015_v35, %v4911_v34  ;;  %v4916_v39 = vor.u32 %v7014_v36, %v4913_v38  ;;  %v4969_v40 = vld [vmem:[%s9119_s0 + $0x30] sm:$0xf]  ;;  %v7004_v41 = vld [vmem:[%s9119_s0 + $0x34] sm:$0xf0]  ;;  %v7003_v42 = vld [vmem:[%s9119_s0 + $0x34] sm:$0xf] }
  0x51   :  { %503 = vmatpush.bf16.msrb.mxu0 %v4986_v18  ;;  %427 = vmatpush.bf16.msra.mxu3 %v4932_v22  ;;  %v4970_v43 = vor.u32 %v7004_v41, %v4969_v40  ;;  %v4971_v44 = vld [vmem:[%s9119_s0 + $0x38] sm:$0xf0]  ;;  %v4903_v45 = vld [vmem:[%s9119_s0 + $0x70] sm:$0xf]  ;;  %v7013_v46 = vld [vmem:[%s9119_s0 + $0x74] sm:$0xf0] }
  0x52   :  { %v4974_v47 = vor.u32 %v7003_v42, %v4971_v44  ;;  %v4904_v48 = vor.u32 %v7013_v46, %v4903_v45  ;;  %v7012_v49 = vld [vmem:[%s9119_s0 + $0x74] sm:$0xf]  ;;  %v4905_v50 = vld [vmem:[%s9119_s0 + $0x78] sm:$0xf0]  ;;  %v4961_v51 = vld [vmem:[%s9119_s0 + $0x20] sm:$0xf] }
  0x53   :  { %414 = vmatpush.bf16.msra.mxu2 %v4920_v30  ;;  %v4908_v52 = vor.u32 %v7012_v49, %v4905_v50  ;;  %v7002_v53 = vld [vmem:[%s9119_s0 + $0x24] sm:$0xf0]  ;;  %v7001_v54 = vld [vmem:[%s9119_s0 + $0x24] sm:$0xf]  ;;  %v4963_v55 = vld [vmem:[%s9119_s0 + $0x28] sm:$0xf0] }
  0x54   :  { %518 = vmatpush.bf16.msrb.mxu1 %v4982_v32  ;;  %v4962_v56 = vor.u32 %v7002_v53, %v4961_v51  ;;  %v4966_v57 = vor.u32 %v7001_v54, %v4963_v55  ;;  %v4895_v58 = vld [vmem:[%s9119_s0 + $0x60] sm:$0xf]  ;;  %v7011_v59 = vld [vmem:[%s9119_s0 + $0x64] sm:$0xf0]  ;;  %v7010_v60 = vld [vmem:[%s9119_s0 + $0x64] sm:$0xf] }
  0x55   :  { %504 = vmatpush.bf16.msrb.mxu0 %v4978_v31  ;;  %428 = vmatpush.bf16.msra.mxu3 %v4924_v33  ;;  %v4896_v61 = vor.u32 %v7011_v59, %v4895_v58  ;;  %v4897_v62 = vld [vmem:[%s9119_s0 + $0x68] sm:$0xf0]  ;;  %v4953_v2 = vld [vmem:[%s9119_s0 + $0x10] sm:$0xf]  ;;  %v7000_v3 = vld [vmem:[%s9119_s0 + $0x14] sm:$0xf0] }
  0x56   :  { %v4900_v63 = vor.u32 %v7010_v60, %v4897_v62  ;;  %v6999_v4 = vld [vmem:[%s9119_s0 + $0x14] sm:$0xf]  ;;  %v4954_v5 = vor.u32 %v7000_v3, %v4953_v2  ;;  %v4955_v6 = vld [vmem:[%s9119_s0 + $0x18] sm:$0xf0]  ;;  %v4945_v8 = vld [vmem:[%s9119_s0] sm:$0xf] }
  0x57   :  { %415 = vmatpush.bf16.msra.mxu2 %v4912_v37  ;;  %v4958_v7 = vor.u32 %v6999_v4, %v4955_v6  ;;  %v6998_v9 = vld [vmem:[%s9119_s0 + $0x4] sm:$0xf0]  ;;  %v6997_v10 = vld [vmem:[%s9119_s0 + $0x4] sm:$0xf]  ;;  %v4947_v12 = vld [vmem:[%s9119_s0 + $0x8] sm:$0xf0] }
  0x58   :  { %519 = vmatpush.bf16.msrb.mxu1 %v4974_v47  ;;  %v4946_v11 = vor.u32 %v6998_v9, %v4945_v8  ;;  %v7022_v19 = vld [vmem:[#allocation2 + $0x10] sm:$0xff]  ;;  %v7034_v20 = vld [vmem:[%s9119_s0 + $0x114] sm:$0xf0]  ;;  %v5054_v23 = vld [vmem:[%s9119_s0 + $0x118] sm:$0xf0] }
  0x59   :  { %429 = vmatpush.bf16.msra.mxu3 %v4916_v39  ;;  %505 = vmatpush.bf16.msrb.mxu0 %v4970_v43  ;;  %v7033_v21 = vld [vmem:[%s9119_s0 + $0x114] sm:$0xf]  ;;  %v5044_v25 = vld [vmem:[%s9119_s0 + $0x100] sm:$0xf]  ;;  %v7032_v26 = vld [vmem:[%s9119_s0 + $0x104] sm:$0xf0] }
  0x5a   :  { %v5057_v24 = vor.u32 %v7033_v21, %v5054_v23  ;;  %v7031_v27 = vld [vmem:[%s9119_s0 + $0x104] sm:$0xf]  ;;  %v5045_v28 = vor.u32 %v7032_v26, %v5044_v25  ;;  %v5046_v29 = vld [vmem:[%s9119_s0 + $0x108] sm:$0xf0]  ;;  %v5036_v31 = vld [vmem:[%s9119_s0 + $0xf0] sm:$0xf] }
  0x5b   :  { %416 = vmatpush.bf16.msra.mxu2 %v4904_v48  ;;  %v5049_v30 = vor.u32 %v7031_v27, %v5046_v29  ;;  %v7030_v32 = vld [vmem:[%s9119_s0 + $0xf4] sm:$0xf0]  ;;  %v7029_v33 = vld [vmem:[%s9119_s0 + $0xf4] sm:$0xf]  ;;  %v5038_v35 = vld [vmem:[%s9119_s0 + $0xf8] sm:$0xf0] }
  0x5c   :  { %520 = vmatpush.bf16.msrb.mxu1 %v4966_v57  ;;  %v5037_v34 = vor.u32 %v7030_v32, %v5036_v31  ;;  %v5041_v36 = vor.u32 %v7029_v33, %v5038_v35  ;;  %v5028_v37 = vld [vmem:[%s9119_s0 + $0xe0] sm:$0xf]  ;;  %v7028_v38 = vld [vmem:[%s9119_s0 + $0xe4] sm:$0xf0]  ;;  %v7027_v39 = vld [vmem:[%s9119_s0 + $0xe4] sm:$0xf] }
  0x5d   :  { %430 = vmatpush.bf16.msra.mxu3 %v4908_v52  ;;  %506 = vmatpush.bf16.msrb.mxu0 %v4962_v56  ;;  %v5029_v40 = vor.u32 %v7028_v38, %v5028_v37  ;;  %v5030_v41 = vld [vmem:[%s9119_s0 + $0xe8] sm:$0xf0]  ;;  %v5020_v43 = vld [vmem:[%s9119_s0 + $0xd0] sm:$0xf]  ;;  %v7026_v44 = vld [vmem:[%s9119_s0 + $0xd4] sm:$0xf0] }
  0x5e   :  { %v5033_v42 = vor.u32 %v7027_v39, %v5030_v41  ;;  %v7025_v45 = vld [vmem:[%s9119_s0 + $0xd4] sm:$0xf]  ;;  %v5021_v46 = vor.u32 %v7026_v44, %v5020_v43  ;;  %v5022_v47 = vld [vmem:[%s9119_s0 + $0xd8] sm:$0xf0]  ;;  %v5012_v49 = vld [vmem:[%s9119_s0 + $0xc0] sm:$0xf] }
  0x5f   :  { %417 = vmatpush.bf16.msra.mxu2 %v4896_v61  ;;  %v5025_v48 = vor.u32 %v7025_v45, %v5022_v47  ;;  %v7024_v50 = vld [vmem:[%s9119_s0 + $0xc4] sm:$0xf0]  ;;  %v7023_v51 = vld [vmem:[%s9119_s0 + $0xc4] sm:$0xf]  ;;  %v5014_v53 = vld [vmem:[%s9119_s0 + $0xc8] sm:$0xf0] }
  0x60   :  { %521 = vmatpush.bf16.msrb.mxu1 %v4958_v7  ;;  %v5013_v52 = vor.u32 %v7024_v50, %v5012_v49  ;;  %v5017_v54 = vor.u32 %v7023_v51, %v5014_v53  ;;  %v663_v4 = vld [vmem:[#allocation4] sm:$0x3]  ;;  %v7097_v21 = vld [vmem:[%s9095_s5 + $0x1f4] sm:$0xf]  ;;  %v5210_v25 = vld [vmem:[%s9095_s5 + $0x1e0] sm:$0xf] }
  0x61   :  { %431 = vmatpush.bf16.msra.mxu3 %v4900_v63  ;;  %507 = vmatpush.bf16.msrb.mxu0 %v4954_v5  ;;  %v666_v8 = vperm.slane %v663_v4, 1  ;;  %v5154_v27 = vld [vmem:[%s9095_s5 + $0x170] sm:$0xf]  ;;  %v7096_v32 = vld [vmem:[%s9095_s5 + $0x1e4] sm:$0xf0] }
  0x62   :  { %v5212_v35 = vld [vmem:[%s9095_s5 + $0x1e8] sm:$0xf0]  ;;  %v7080_v37 = vld [vmem:[%s9095_s5 + $0x164] sm:$0xf0]  ;;  %v8282_v39 = vld [vmem:[#allocation6 + $0x4] sm:$0xf]  ;;  %v5211_v41 = vor.u32 %v7096_v32, %v5210_v25 }
  0x63   :  { %546 = vmatpush.bf16.msrb.mxu2 %v8004_v0  ;;  %v4950_v0 = vor.u32 %v6997_v10, %v4947_v12  ;;  %v5204_v49 = vld [vmem:[%s9095_s5 + $0x1d8] sm:$0xf0]  ;;  %v5138_v50 = vld [vmem:[%s9095_s5 + $0x150] sm:$0xf]  ;;  %v7078_v51 = vld [vmem:[%s9095_s5 + $0x154] sm:$0xf0] }
  0x64   :  { %v7075_v25 = vld [vmem:[%s9095_s5 + $0x144] sm:$0xf] }
  0x65   :  { %508 = vmatpush.bf16.msrb.mxu0 %v4946_v11  ;;  %522 = vmatpush.bf16.msrb.mxu1 %v4950_v0 }
  0x67   :  { %547 = vmatpush.bf16.msrb.mxu2 %v8009_v1  ;;  %v5052_v1 = vld [vmem:[%s9119_s0 + $0x110] sm:$0xf] }
  0x68   :  { %v5053_v22 = vor.u32 %v7034_v20, %v5052_v1 }
  0x69   :  { %647 = vmatpush.bf16.msra.mxu0 %v5057_v24 }
  0x6a   :  { %633 = vmatpush.bf16.msrb.mxu3 %v5053_v22  ;;  %v5220_v22 = vld [vmem:[%s9095_s5 + $0x1f8] sm:$0xf0] }
  0x6b   :  { %v5223_v26 = vor.u32 %v7097_v21, %v5220_v22  ;;  %v5180_v21 = vld [vmem:[%s9095_s5 + $0x1a8] sm:$0xf0]  ;;  %v5114_v22 = vld [vmem:[%s9095_s5 + $0x120] sm:$0xf] }
  0x6d   :  { %648 = vmatpush.bf16.msra.mxu0 %v5049_v30 }
  0x6e   :  { %634 = vmatpush.bf16.msrb.mxu3 %v5045_v28  ;;  %v7082_v28 = vld [vmem:[%s9095_s5 + $0x174] sm:$0xf0] }
  0x6f   :  { %v5155_v33 = vor.u32 %v7082_v28, %v5154_v27  ;;  %v5170_v28 = vld [vmem:[%s9095_s5 + $0x190] sm:$0xf] }
  0x71   :  { %649 = vmatpush.bf16.msra.mxu0 %v5041_v36  ;;  %v5146_v36 = vld [vmem:[%s9095_s5 + $0x160] sm:$0xf] }
  0x72   :  { %635 = vmatpush.bf16.msrb.mxu3 %v5037_v34  ;;  %v7095_v34 = vld [vmem:[%s9095_s5 + $0x1e4] sm:$0xf]  ;;  %v5147_v47 = vor.u32 %v7080_v37, %v5146_v36  ;;  %v7070_v36 = vld [vmem:[%s9095_s5 + $0x114] sm:$0xf0] }
  0x73   :  { %v5215_v43 = vor.u32 %v7095_v34, %v5212_v35  ;;  %v5172_v34 = vld [vmem:[%s9095_s5 + $0x198] sm:$0xf0]  ;;  %v5106_v35 = vld [vmem:[%s9095_s5 + $0x110] sm:$0xf] }
  0x75   :  { %650 = vmatpush.bf16.msra.mxu0 %v5033_v42  ;;  %v5202_v42 = vld [vmem:[%s9095_s5 + $0x1d0] sm:$0xf] }
  0x76   :  { %636 = vmatpush.bf16.msrb.mxu3 %v5029_v40  ;;  %v679_v40 = vld [vmem:[#allocation6] sm:$0xf] }
  0x79   :  { %651 = vmatpush.bf16.msra.mxu0 %v5025_v48  ;;  %v7093_v48 = vld [vmem:[%s9095_s5 + $0x1d4] sm:$0xf] }
  0x7a   :  { %637 = vmatpush.bf16.msrb.mxu3 %v5021_v46  ;;  %v7094_v46 = vld [vmem:[%s9095_s5 + $0x1d4] sm:$0xf0] }
  0x7b   :  { %v5203_v53 = vor.u32 %v7094_v46, %v5202_v42  ;;  %v5162_v42 = vld [vmem:[%s9095_s5 + $0x180] sm:$0xf] }
  0x7d   :  { %652 = vmatpush.bf16.msra.mxu0 %v5017_v54  ;;  %v7081_v54 = vld [vmem:[%s9095_s5 + $0x174] sm:$0xf] }
  0x7e   :  { %638 = vmatpush.bf16.msrb.mxu3 %v5013_v52 }
  0xcc   :  { %v327_v13 = vpop.f32.mrf.mxu1 }
  0xcd   :  { %v289_v14 = vpop.f32.mrf.mxu0 }
  0xd4   :  { %v329_v15 = vpop.f32.mrf.mxu1 }
  0xd5   :  { %v291_v16 = vpop.f32.mrf.mxu0  ;;  %v332_v17 = vpack.c.bf16 %v329_v15, %v327_v13  ;;  %v665_v15 = vperm.slane %v663_v4, 0  ;;  %v5148_v4 = vld [vmem:[%s9095_s5 + $0x168] sm:$0xf0] }
  0xd6   :  { %v294_v18 = vpack.c.bf16 %v291_v16, %v289_v14 }
  0xd7   :  { %4941 = vmatmul.msk.bf16.vlgmr.msra.gmra.mxu2 %vm406_vm1, %v332_v17  ;;  %4942 = vmatmul.msk.bf16.vlgmr.msra.gmra.mxu3 %vm406_vm1, %v332_v17  ;;  %v5218_v17 = vld [vmem:[%s9095_s5 + $0x1f0] sm:$0xf] }
  0xd8   :  { %4991 = vmatmul.msk.bf16.vlgmr.msrb.gmra.mxu0 %vm406_vm1, %v294_v18  ;;  %4992 = vmatmul.msk.bf16.vlgmr.msrb.gmra.mxu1 %vm406_vm1, %v294_v18  ;;  %v7098_v18 = vld [vmem:[%s9095_s5 + $0x1f4] sm:$0xf0] }
  0xd9   :  { %v5219_v24 = vor.u32 %v7098_v18, %v5218_v17  ;;  %970 = vmatpush.bf16.msrb.mxu0 %v5155_v33  ;;  %v5178_v17 = vld [vmem:[%s9095_s5 + $0x1a0] sm:$0xf]  ;;  %v7088_v18 = vld [vmem:[%s9095_s5 + $0x1a4] sm:$0xf0]  ;;  %v7085_v33 = vld [vmem:[%s9095_s5 + $0x194] sm:$0xf] }
  0xda   :  { %v5179_v27 = vor.u32 %v7088_v18, %v5178_v17  ;;  %v5175_v46 = vor.u32 %v7085_v33, %v5172_v34  ;;  %v5332_v17 = vld [vmem:[%s9095_s5 + $0xd8] sm:$0xf0]  ;;  %v5298_v33 = vld [vmem:[%s9095_s5 + $0x90] sm:$0xf]  ;;  %v7054_v34 = vld [vmem:[%s9095_s5 + $0x94] sm:$0xf0] }
  0xdd   :  { %971 = vmatpush.bf16.msrb.mxu0 %v5147_v47  ;;  %v5107_v47 = vor.u32 %v7070_v36, %v5106_v35  ;;  %v5299_v35 = vor.u32 %v7054_v34, %v5298_v33  ;;  %v7059_v36 = vld [vmem:[%s9095_s5 + $0xc4] sm:$0xf] }
  0xe7   :  { %4997 = vmatmul.msk.bf16.vlgmr.msrb.gmra.mxu2 %vm276_vm0, %v7022_v19 }
 0x155   :  { %v510_v60 = vpop.f32.mrf.mxu0  ;;  %v524_v63 = vpop.f32.mrf.mxu1 }
 0x15a   :  { %v419_v55 = vpop.f32.mrf.mxu2  ;;  %v433_v61 = vpop.f32.mrf.mxu3 }
 0x15b   :  { %v525_v5 = vadd.f32 %v524_v63, %v433_v61  ;;  %v511_v12 = vadd.f32 %v510_v60, %v419_v55  ;;  %v5156_v55 = vld [vmem:[%s9095_s5 + $0x178] sm:$0xf0]  ;;  %v7091_v60 = vld [vmem:[%s9095_s5 + $0x1c4] sm:$0xf]  ;;  %v5196_v61 = vld [vmem:[%s9095_s5 + $0x1c8] sm:$0xf0] }
 0x15c   :  { %v7076_v63 = vld [vmem:[%s9095_s5 + $0x144] sm:$0xf0] }
 0x15d   :  { %v512_v62 = vpop.f32.mrf.mxu0  ;;  %v526_v6 = vpop.f32.mrf.mxu1 }
 0x162   :  { %v421_v56 = vpop.f32.mrf.mxu2  ;;  %v435_v2 = vpop.f32.mrf.mxu3 }
 0x163   :  { %v527_v10 = vadd.f32 %v526_v6, %v435_v2  ;;  %v513_v19 = vadd.f32 %v512_v62, %v421_v56  ;;  %v5194_v56 = vld [vmem:[%s9095_s5 + $0x1c0] sm:$0xf]  ;;  %v5159_v2 = vor.u32 %v7081_v54, %v5156_v55  ;;  %v5186_v6 = vld [vmem:[%s9095_s5 + $0x1b0] sm:$0xf]  ;;  %v7068_v55 = vld [vmem:[%s9095_s5 + $0x104] sm:$0xf0] }
 0x164   :  { %v5130_v62 = vld [vmem:[%s9095_s5 + $0x140] sm:$0xf] }
 0x165   :  { %v5098_v54 = vld [vmem:[%s9095_s5 + $0x100] sm:$0xf] }
 0x16a   :  { %v549_v57 = vpop.f32.mrf.mxu2 }
 0x172   :  { %v551_v58 = vpop.f32.mrf.mxu2 }
 0x173   :  { %v554_v59 = vpack.c.bf16 %v551_v58, %v549_v57  ;;  %v7092_v57 = vld [vmem:[%s9095_s5 + $0x1c4] sm:$0xf0]  ;;  %v5207_v58 = vor.u32 %v7093_v48, %v5204_v49  ;;  %v7083_v48 = vld [vmem:[%s9095_s5 + $0x184] sm:$0xf]  ;;  %v5164_v49 = vld [vmem:[%s9095_s5 + $0x188] sm:$0xf0] }
 0x175   :  { %5058 = vmatmul.msk.bf16.vlgmr.msrb.gmra.mxu3 %vm406_vm1, %v554_v59  ;;  %5059 = vmatmul.msk.bf16.vlgmr.msra.gmra.mxu0 %vm406_vm1, %v554_v59  ;;  %v5139_v59 = vor.u32 %v7078_v51, %v5138_v50  ;;  %v7065_v50 = vld [vmem:[%s9095_s5 + $0xf4] sm:$0xf]  ;;  %v5348_v51 = vld [vmem:[%s9095_s5 + $0xf8] sm:$0xf0] }
 0x177   :  { %972 = vmatpush.bf16.msrb.mxu0 %v5139_v59  ;;  %v7071_v59 = vld [vmem:[%s9095_s5 + $0x124] sm:$0xf] }
 0x1f2   :  { %v654_v3 = vpop.f32.mrf.mxu0 }
 0x1f3   :  { %v660_v7 = vadd.f32 %v654_v3, %v525_v5  ;;  %v7079_v3 = vld [vmem:[%s9095_s5 + $0x164] sm:$0xf]  ;;  %v5195_v5 = vor.u32 %v7092_v57, %v5194_v56  ;;  %v5282_v56 = vld [vmem:[%s9095_s5 + $0x70] sm:$0xf] }
 0x1f5   :  { %v670_v0 = vadd.f32 %v666_v8, %v660_v7  ;;  %v7090_v7 = vld [vmem:[%s9095_s5 + $0x1b4] sm:$0xf0] }
 0x1f7   :  { %v674_v1 = vmax.f32 %v670_v0, 0.0  ;;  %v7074_v0 = vld [vmem:[%s9095_s5 + $0x134] sm:$0xf0] }
 0x1f8   :  { %v640_v9 = vpop.f32.mrf.mxu3 }
 0x1f9   :  { %v659_v14 = vadd.f32 %v640_v9, %v511_v12  ;;  %v5131_v9 = vor.u32 %v7076_v63, %v5130_v62  ;;  %v5122_v12 = vld [vmem:[%s9095_s5 + $0x130] sm:$0xf]  ;;  %v5167_v62 = vor.u32 %v7083_v48, %v5164_v49  ;;  %v7064_v63 = vld [vmem:[%s9095_s5 + $0xe4] sm:$0xf0]  ;;  %v7049_v49 = vld [vmem:[%s9095_s5 + $0x74] sm:$0xf] }
 0x1fa   :  { %v656_v11 = vpop.f32.mrf.mxu0 }
 0x1fb   :  { %v662_v13 = vadd.f32 %v656_v11, %v527_v10  ;;  %v669_v29 = vadd.f32 %v665_v15, %v659_v14  ;;  %v7089_v10 = vld [vmem:[%s9095_s5 + $0x1b4] sm:$0xf]  ;;  %v5188_v11 = vld [vmem:[%s9095_s5 + $0x1b8] sm:$0xf0]  ;;  %973 = vmatpush.bf16.msrb.mxu0 %v5131_v9  ;;  %v7048_v9 = vld [vmem:[%s9095_s5 + $0x64] sm:$0xf0] }
 0x1fc   :  { %v7077_v14 = vld [vmem:[%s9095_s5 + $0x154] sm:$0xf] }
 0x1fd   :  { %v672_v16 = vadd.f32 %v666_v8, %v662_v13  ;;  %v673_v44 = vmax.f32 %v669_v29, 0.0  ;;  %v5199_v8 = vor.u32 %v7091_v60, %v5196_v61  ;;  %v5151_v13 = vor.u32 %v7079_v3, %v5148_v4  ;;  %v7086_v29 = vld [vmem:[%s9095_s5 + $0x194] sm:$0xf0]  ;;  %v5116_v60 = vld [vmem:[%s9095_s5 + $0x128] sm:$0xf0] }
 0x1fe   :  { %v5099_v3 = vor.u32 %v7068_v55, %v5098_v54  ;;  %v5316_v54 = vld [vmem:[%s9095_s5 + $0xb8] sm:$0xf0] }
 0x1ff   :  { %v676_v20 = vmax.f32 %v672_v16, 0.0  ;;  %v5187_v16 = vor.u32 %v7090_v7, %v5186_v6  ;;  %v5340_v6 = vld [vmem:[%s9095_s5 + $0xe8] sm:$0xf0]  ;;  %v5274_v7 = vld [vmem:[%s9095_s5 + $0x60] sm:$0xf] }
 0x200   :  { %v642_v23 = vpop.f32.mrf.mxu3 }
 0x201   :  { %v8263_v30 = vpack.c.bf16 %v676_v20, %v674_v1  ;;  %v661_v31 = vadd.f32 %v642_v23, %v513_v19  ;;  %v5191_v19 = vor.u32 %v7089_v10, %v5188_v11  ;;  %v5123_v1 = vor.u32 %v7074_v0, %v5122_v12  ;;  %v7087_v20 = vld [vmem:[%s9095_s5 + $0x1a4] sm:$0xf]  ;;  %v7072_v23 = vld [vmem:[%s9095_s5 + $0x124] sm:$0xf0]  ;;  %v7069_v10 = vld [vmem:[%s9095_s5 + $0x114] sm:$0xf] }
 0x202   :  { %v5115_v32 = vor.u32 %v7072_v23, %v5114_v22  ;;  %v5108_v11 = vld [vmem:[%s9095_s5 + $0x118] sm:$0xf0]  ;;  %v5330_v0 = vld [vmem:[%s9095_s5 + $0xd0] sm:$0xf]  ;;  %v7060_v22 = vld [vmem:[%s9095_s5 + $0xc4] sm:$0xf0] }
 0x203   :  { %v671_v38 = vadd.f32 %v665_v15, %v661_v31  ;;  %704 = vmatpush.bf16.msra.mxu2 %v8263_v30  ;;  %769 = vmatpush.bf16.msra.mxu3 %v8263_v30  ;;  %v5140_v15 = vld [vmem:[%s9095_s5 + $0x158] sm:$0xf0]  ;;  %v5183_v31 = vor.u32 %v7087_v20, %v5180_v21  ;;  %v5111_v18 = vor.u32 %v7069_v10, %v5108_v11  ;;  %v5322_v21 = vld [vmem:[%s9095_s5 + $0xc0] sm:$0xf]  ;;  %v5234_v11 = vld [vmem:[%s9095_s5 + $0x10] sm:$0xf] }
 0x204   :  { %974 = vmatpush.bf16.msrb.mxu0 %v5123_v1  ;;  %v7046_v1 = vld [vmem:[%s9095_s5 + $0x54] sm:$0xf0] }
 0x205   :  { %v675_v45 = vmax.f32 %v671_v38, 0.0  ;;  %v7073_v38 = vld [vmem:[%s9095_s5 + $0x134] sm:$0xf] }
 0x206   :  { %5063 = vmatmul.msk.bf16.vlgmr.msra.gmra.mxu3 %vm680_vm2, %v8282_v39  ;;  %5061 = vmatmul.msk.bf16.vlgmr.msra.gmra.mxu2 %vm680_vm2, %v679_v40 }
 0x207   :  { %983 = vmatpush.bf16.msrb.mxu2 %v5219_v24  ;;  %1009 = vmatpush.bf16.msrb.mxu3 %v5223_v26  ;;  %v8305_v52 = vpack.c.bf16 %v675_v45, %v673_v44  ;;  %v5143_v24 = vor.u32 %v7077_v14, %v5140_v15  ;;  %v5132_v26 = vld [vmem:[%s9095_s5 + $0x148] sm:$0xf0]  ;;  %v5346_v44 = vld [vmem:[%s9095_s5 + $0xf0] sm:$0xf]  ;;  %v7066_v45 = vld [vmem:[%s9095_s5 + $0xf4] sm:$0xf0]  ;;  %v5275_v15 = vor.u32 %v7048_v9, %v5274_v7 }
 0x208   :  { %v5135_v37 = vor.u32 %v7075_v25, %v5132_v26  ;;  %975 = vmatpush.bf16.msrb.mxu0 %v5115_v32  ;;  %v5347_v61 = vor.u32 %v7066_v45, %v5346_v44  ;;  %v5323_v25 = vor.u32 %v7060_v22, %v5322_v21  ;;  %v5314_v26 = vld [vmem:[%s9095_s5 + $0xb0] sm:$0xf]  ;;  %v7052_v44 = vld [vmem:[%s9095_s5 + $0x84] sm:$0xf0]  ;;  %v7067_v45 = vld [vmem:[%s9095_s5 + $0x104] sm:$0xf] }
 0x209   :  { %691 = vmatpush.bf16.msra.mxu1 %v8305_v52  ;;  %v7053_v7 = vld [vmem:[%s9095_s5 + $0x94] sm:$0xf]  ;;  %v5252_v22 = vld [vmem:[%s9095_s5 + $0x38] sm:$0xf0] }
 0x20a   :  { %v7041_v21 = vld [vmem:[%s9095_s5 + $0x34] sm:$0xf] }
 0x20b   :  { %984 = vmatpush.bf16.msrb.mxu2 %v5211_v41  ;;  %1010 = vmatpush.bf16.msrb.mxu3 %v5215_v43  ;;  %v5171_v41 = vor.u32 %v7086_v29, %v5170_v28  ;;  %v7084_v43 = vld [vmem:[%s9095_s5 + $0x184] sm:$0xf0]  ;;  %v5306_v29 = vld [vmem:[%s9095_s5 + $0xa0] sm:$0xf] }
 0x20c   :  { %5060 = vmatmul.msk.bf16.vlgmr.msra.gmra.mxu1 %vm680_vm2, %v679_v40  ;;  %v5124_v40 = vld [vmem:[%s9095_s5 + $0x138] sm:$0xf0]  ;;  %v5163_v57 = vor.u32 %v7084_v43, %v5162_v42  ;;  %976 = vmatpush.bf16.msrb.mxu0 %v5107_v47  ;;  %v5290_v42 = vld [vmem:[%s9095_s5 + $0x80] sm:$0xf] }
 0x20d   :  { %756 = vmatpush.bf16.msrb.mxu1 %v8305_v52  ;;  %v5291_v47 = vor.u32 %v7052_v44, %v5290_v42 }
 0x20f   :  { %985 = vmatpush.bf16.msrb.mxu2 %v5203_v53  ;;  %1011 = vmatpush.bf16.msrb.mxu3 %v5207_v58  ;;  %v5127_v53 = vor.u32 %v7073_v38, %v5124_v40  ;;  %v7050_v58 = vld [vmem:[%s9095_s5 + $0x74] sm:$0xf0]  ;;  %v5258_v40 = vld [vmem:[%s9095_s5 + $0x40] sm:$0xf] }
 0x210   :  { %v5283_v4 = vor.u32 %v7050_v58, %v5282_v56  ;;  %977 = vmatpush.bf16.msrb.mxu0 %v5099_v3  ;;  %v5250_v56 = vld [vmem:[%s9095_s5 + $0x30] sm:$0xf]  ;;  %v7040_v3 = vld [vmem:[%s9095_s5 + $0x24] sm:$0xf0] }
 0x211   :  { %996 = vmatpush.bf16.msra.mxu1 %v5159_v2  ;;  %v5351_v2 = vor.u32 %v7065_v50, %v5348_v51  ;;  %v5284_v50 = vld [vmem:[%s9095_s5 + $0x78] sm:$0xf0]  ;;  %v7057_v51 = vld [vmem:[%s9095_s5 + $0xb4] sm:$0xf] }
 0x212   :  { %v5319_v55 = vor.u32 %v7057_v51, %v5316_v54  ;;  %v7128_v54 = vld [vmem:[%s9095_s5 + $0x2e4] sm:$0xf0] }
 0x213   :  { %986 = vmatpush.bf16.msrb.mxu2 %v5195_v5  ;;  %1012 = vmatpush.bf16.msrb.mxu3 %v5199_v8  ;;  %v7063_v5 = vld [vmem:[%s9095_s5 + $0xe4] sm:$0xf]  ;;  %v5119_v8 = vor.u32 %v7071_v59, %v5116_v60  ;;  %v5276_v60 = vld [vmem:[%s9095_s5 + $0x68] sm:$0xf0] }
 0x214   :  { %v5343_v14 = vor.u32 %v7063_v5, %v5340_v6  ;;  %1182 = vmatpush.bf16.msra.mxu0 %v5283_v4  ;;  %v7047_v59 = vld [vmem:[%s9095_s5 + $0x64] sm:$0xf]  ;;  %v7045_v4 = vld [vmem:[%s9095_s5 + $0x54] sm:$0xf]  ;;  %v5268_v6 = vld [vmem:[%s9095_s5 + $0x58] sm:$0xf0] }
 0x215   :  { %997 = vmatpush.bf16.msra.mxu1 %v5151_v13  ;;  %v7062_v13 = vld [vmem:[%s9095_s5 + $0xd4] sm:$0xf0]  ;;  %v5271_v9 = vor.u32 %v7045_v4, %v5268_v6  ;;  %v5446_v6 = vld [vmem:[%s9095_s5 + $0x278] sm:$0xf0] }
 0x216   :  { %v5331_v20 = vor.u32 %v7062_v13, %v5330_v0  ;;  %v7043_v13 = vld [vmem:[%s9095_s5 + $0x44] sm:$0xf] }
 0x217   :  { %987 = vmatpush.bf16.msrb.mxu2 %v5187_v16  ;;  %1013 = vmatpush.bf16.msrb.mxu3 %v5191_v19  ;;  %v7061_v16 = vld [vmem:[%s9095_s5 + $0xd4] sm:$0xf]  ;;  %v5266_v19 = vld [vmem:[%s9095_s5 + $0x50] sm:$0xf] }
 0x218   :  { %v5335_v23 = vor.u32 %v7061_v16, %v5332_v17  ;;  %1183 = vmatpush.bf16.msra.mxu0 %v5275_v15  ;;  %v7051_v15 = vld [vmem:[%s9095_s5 + $0x84] sm:$0xf]  ;;  %v5292_v17 = vld [vmem:[%s9095_s5 + $0x88] sm:$0xf0] }
 0x219   :  { %998 = vmatpush.bf16.msra.mxu1 %v5143_v24  ;;  %v5267_v24 = vor.u32 %v7046_v1, %v5266_v19  ;;  %v5226_v19 = vld [vmem:[%s9095_s5] sm:$0xf]  ;;  %v7036_v1 = vld [vmem:[%s9095_s5 + $0x4] sm:$0xf0] }
 0x21b   :  { %988 = vmatpush.bf16.msrb.mxu2 %v5179_v27  ;;  %1014 = vmatpush.bf16.msrb.mxu3 %v5183_v31  ;;  %v7058_v27 = vld [vmem:[%s9095_s5 + $0xb4] sm:$0xf0]  ;;  %v7056_v31 = vld [vmem:[%s9095_s5 + $0xa4] sm:$0xf0] }
 0x21c   :  { %5062 = vmatmul.msk.bf16.vlgmr.msrb.gmra.mxu1 %vm680_vm2, %v8282_v39  ;;  %v5338_v39 = vld [vmem:[%s9095_s5 + $0xe0] sm:$0xf]  ;;  %1184 = vmatpush.bf16.msra.mxu0 %v5267_v24  ;;  %v5315_v28 = vor.u32 %v7058_v27, %v5314_v26  ;;  %v5307_v32 = vor.u32 %v7056_v31, %v5306_v29  ;;  %v7039_v24 = vld [vmem:[%s9095_s5 + $0x24] sm:$0xf]  ;;  %v7037_v27 = vld [vmem:[%s9095_s5 + $0x14] sm:$0xf] }
 0x21d   :  { %999 = vmatpush.bf16.msra.mxu1 %v5135_v37  ;;  %v5339_v12 = vor.u32 %v7064_v63, %v5338_v39  ;;  %v5324_v37 = vld [vmem:[%s9095_s5 + $0xc8] sm:$0xf0]  ;;  %v7035_v31 = vld [vmem:[%s9095_s5 + $0x4] sm:$0xf] }
 0x21e   :  { %v5327_v38 = vor.u32 %v7059_v36, %v5324_v37  ;;  %v5308_v39 = vld [vmem:[%s9095_s5 + $0xa8] sm:$0xf0] }
 0x21f   :  { %989 = vmatpush.bf16.msrb.mxu2 %v5171_v41  ;;  %1015 = vmatpush.bf16.msrb.mxu3 %v5175_v46  ;;  %v7044_v41 = vld [vmem:[%s9095_s5 + $0x44] sm:$0xf0]  ;;  %v5100_v46 = vld [vmem:[%s9095_s5 + $0x108] sm:$0xf0] }
 0x220   :  { %v5259_v43 = vor.u32 %v7044_v41, %v5258_v40  ;;  %v5103_v48 = vor.u32 %v7067_v45, %v5100_v46 }
 0x221   :  { %1000 = vmatpush.bf16.msra.mxu1 %v5127_v53  ;;  %v5287_v53 = vor.u32 %v7049_v49, %v5284_v50  ;;  %v5510_v50 = vld [vmem:[%s9095_s5 + $0x2f8] sm:$0xf0] }
 0x222   :  { %1185 = vmatpush.bf16.msra.mxu0 %v5259_v43 }
 0x223   :  { %990 = vmatpush.bf16.msrb.mxu2 %v5163_v57  ;;  %1016 = vmatpush.bf16.msrb.mxu3 %v5167_v62  ;;  %v7042_v57 = vld [vmem:[%s9095_s5 + $0x34] sm:$0xf0]  ;;  %v5279_v62 = vor.u32 %v7047_v59, %v5276_v60  ;;  %v5492_v59 = vld [vmem:[%s9095_s5 + $0x2d0] sm:$0xf] }
 0x224   :  { %v5251_v58 = vor.u32 %v7042_v57, %v5250_v56  ;;  %v5502_v57 = vld [vmem:[%s9095_s5 + $0x2e8] sm:$0xf0]  ;;  %v7126_v60 = vld [vmem:[%s9095_s5 + $0x2d4] sm:$0xf0] }
 0x225   :  { %1001 = vmatpush.bf16.msra.mxu1 %v5119_v8  ;;  %v5300_v8 = vld [vmem:[%s9095_s5 + $0x98] sm:$0xf0] }
 0x226   :  { %1186 = vmatpush.bf16.msra.mxu0 %v5251_v58  ;;  %v5303_v10 = vor.u32 %v7053_v7, %v5300_v8  ;;  %v5484_v8 = vld [vmem:[%s9095_s5 + $0x2c0] sm:$0xf] }
 0x227   :  { %1195 = vmatpush.bf16.msra.mxu2 %v5347_v61  ;;  %1221 = vmatpush.bf16.msra.mxu3 %v5351_v2  ;;  %v7055_v61 = vld [vmem:[%s9095_s5 + $0xa4] sm:$0xf]  ;;  %v5242_v2 = vld [vmem:[%s9095_s5 + $0x20] sm:$0xf] }
 0x228   :  { %v5311_v63 = vor.u32 %v7055_v61, %v5308_v39  ;;  %v5243_v5 = vor.u32 %v7040_v3, %v5242_v2  ;;  %v7125_v61 = vld [vmem:[%s9095_s5 + $0x2d4] sm:$0xf]  ;;  %v5494_v39 = vld [vmem:[%s9095_s5 + $0x2d8] sm:$0xf0]  ;;  %v7114_v2 = vld [vmem:[%s9095_s5 + $0x274] sm:$0xf0] }
 0x229   :  { %1002 = vmatpush.bf16.msra.mxu1 %v5111_v18  ;;  %v5295_v18 = vor.u32 %v7051_v15, %v5292_v17  ;;  %v5497_v3 = vor.u32 %v7125_v61, %v5494_v39  ;;  %v7111_v15 = vld [vmem:[%s9095_s5 + $0x264] sm:$0xf]  ;;  %v5438_v17 = vld [vmem:[%s9095_s5 + $0x268] sm:$0xf0]  ;;  %v5404_v39 = vld [vmem:[%s9095_s5 + $0x220] sm:$0xf] }
 0x22a   :  { %1187 = vmatpush.bf16.msra.mxu0 %v5243_v5  ;;  %v7113_v5 = vld [vmem:[%s9095_s5 + $0x274] sm:$0xf]  ;;  %v5454_v61 = vld [vmem:[%s9095_s5 + $0x288] sm:$0xf0] }
 0x22b   :  { %1196 = vmatpush.bf16.msra.mxu2 %v5339_v12  ;;  %1222 = vmatpush.bf16.msra.mxu3 %v5343_v14  ;;  %v7038_v12 = vld [vmem:[%s9095_s5 + $0x14] sm:$0xf0]  ;;  %v5260_v14 = vld [vmem:[%s9095_s5 + $0x48] sm:$0xf0]  ;;  %v5449_v7 = vor.u32 %v7113_v5, %v5446_v6  ;;  %v5396_v6 = vld [vmem:[%s9095_s5 + $0x210] sm:$0xf] }
 0x22c   :  { %v5235_v0 = vor.u32 %v7038_v12, %v5234_v11  ;;  %v5263_v16 = vor.u32 %v7043_v13, %v5260_v14  ;;  %v5486_v12 = vld [vmem:[%s9095_s5 + $0x2c8] sm:$0xf0]  ;;  %v5436_v13 = vld [vmem:[%s9095_s5 + $0x260] sm:$0xf]  ;;  %v7112_v14 = vld [vmem:[%s9095_s5 + $0x264] sm:$0xf0] }
 0x22d   :  { %1003 = vmatpush.bf16.msra.mxu1 %v5103_v48  ;;  %v7130_v48 = vld [vmem:[%s9095_s5 + $0x2f4] sm:$0xf0] }
 0x22e   :  { %1188 = vmatpush.bf16.msra.mxu0 %v5235_v0 }
 0x22f   :  { %1197 = vmatpush.bf16.msra.mxu2 %v5331_v20  ;;  %1223 = vmatpush.bf16.msra.mxu3 %v5335_v23  ;;  %v5227_v20 = vor.u32 %v7036_v1, %v5226_v19  ;;  %v5255_v23 = vor.u32 %v7041_v21, %v5252_v22  ;;  %v7122_v19 = vld [vmem:[%s9095_s5 + $0x2b4] sm:$0xf0]  ;;  %v5441_v1 = vor.u32 %v7111_v15, %v5438_v17  ;;  %v7121_v21 = vld [vmem:[%s9095_s5 + $0x2b4] sm:$0xf]  ;;  %v5478_v22 = vld [vmem:[%s9095_s5 + $0x2b8] sm:$0xf0] }
 0x230   :  { %v7099_v15 = vld [vmem:[%s9095_s5 + $0x204] sm:$0xf] }
 0x231   :  { %1208 = vmatpush.bf16.msrb.mxu1 %v5287_v53  ;;  %v5500_v53 = vld [vmem:[%s9095_s5 + $0x2e0] sm:$0xf] }
 0x232   :  { %1189 = vmatpush.bf16.msra.mxu0 %v5227_v20  ;;  %v5501_v56 = vor.u32 %v7128_v54, %v5500_v53  ;;  %v5414_v53 = vld [vmem:[%s9095_s5 + $0x238] sm:$0xf0] }
 0x233   :  { %1198 = vmatpush.bf16.msra.mxu2 %v5323_v25  ;;  %1224 = vmatpush.bf16.msra.mxu3 %v5327_v38  ;;  %v5244_v25 = vld [vmem:[%s9095_s5 + $0x28] sm:$0xf0] }
 0x234   :  { %v5247_v26 = vor.u32 %v7039_v24, %v5244_v25  ;;  %v5481_v24 = vor.u32 %v7121_v21, %v5478_v22  ;;  %v7110_v25 = vld [vmem:[%s9095_s5 + $0x254] sm:$0xf0] }
 0x235   :  { %1209 = vmatpush.bf16.msrb.mxu1 %v5279_v62  ;;  %v5493_v62 = vor.u32 %v7126_v60, %v5492_v59 }
 0x237   :  { %1199 = vmatpush.bf16.msra.mxu2 %v5315_v28  ;;  %1225 = vmatpush.bf16.msra.mxu3 %v5319_v55  ;;  %v5236_v28 = vld [vmem:[%s9095_s5 + $0x18] sm:$0xf0]  ;;  %v7127_v55 = vld [vmem:[%s9095_s5 + $0x2e4] sm:$0xf] }
 0x238   :  { %v5239_v29 = vor.u32 %v7037_v27, %v5236_v28  ;;  %v5505_v58 = vor.u32 %v7127_v55, %v5502_v57  ;;  %v5430_v27 = vld [vmem:[%s9095_s5 + $0x258] sm:$0xf0]  ;;  %v5452_v55 = vld [vmem:[%s9095_s5 + $0x280] sm:$0xf]  ;;  %v7115_v57 = vld [vmem:[%s9095_s5 + $0x284] sm:$0xf] }
 0x239   :  { %1210 = vmatpush.bf16.msrb.mxu1 %v5271_v9  ;;  %v7124_v9 = vld [vmem:[%s9095_s5 + $0x2c4] sm:$0xf0] }
 0x23a   :  { %v5485_v11 = vor.u32 %v7124_v9, %v5484_v8  ;;  %v7101_v8 = vld [vmem:[%s9095_s5 + $0x214] sm:$0xf] }
 0x23b   :  { %1200 = vmatpush.bf16.msra.mxu2 %v5307_v32  ;;  %1226 = vmatpush.bf16.msra.mxu3 %v5311_v63  ;;  %v5228_v32 = vld [vmem:[%s9095_s5 + $0x8] sm:$0xf0]  ;;  %v5444_v63 = vld [vmem:[%s9095_s5 + $0x270] sm:$0xf] }
 0x23c   :  { %v5231_v33 = vor.u32 %v7035_v31, %v5228_v32  ;;  %v5445_v4 = vor.u32 %v7114_v2, %v5444_v63  ;;  %v5468_v31 = vld [vmem:[%s9095_s5 + $0x2a0] sm:$0xf]  ;;  %v7120_v32 = vld [vmem:[%s9095_s5 + $0x2a4] sm:$0xf0]  ;;  %v7103_v2 = vld [vmem:[%s9095_s5 + $0x224] sm:$0xf] }
 0x23d   :  { %1211 = vmatpush.bf16.msrb.mxu1 %v5263_v16  ;;  %v5437_v16 = vor.u32 %v7112_v14, %v5436_v13  ;;  %v7104_v63 = vld [vmem:[%s9095_s5 + $0x224] sm:$0xf0]  ;;  %v5388_v13 = vld [vmem:[%s9095_s5 + $0x200] sm:$0xf] }
 0x23e   :  { %v7100_v14 = vld [vmem:[%s9095_s5 + $0x204] sm:$0xf0] }
 0x23f   :  { %1201 = vmatpush.bf16.msra.mxu2 %v5299_v35  ;;  %1227 = vmatpush.bf16.msra.mxu3 %v5303_v10  ;;  %v7123_v10 = vld [vmem:[%s9095_s5 + $0x2c4] sm:$0xf] }
 0x240   :  { %v5489_v0 = vor.u32 %v7123_v10, %v5486_v12  ;;  %v5398_v10 = vld [vmem:[%s9095_s5 + $0x218] sm:$0xf0] }
 0x241   :  { %1212 = vmatpush.bf16.msrb.mxu1 %v5255_v23  ;;  %v5428_v23 = vld [vmem:[%s9095_s5 + $0x250] sm:$0xf] }
 0x242   :  { %v5429_v28 = vor.u32 %v7110_v25, %v5428_v23 }
 0x243   :  { %1202 = vmatpush.bf16.msra.mxu2 %v5291_v47  ;;  %1228 = vmatpush.bf16.msra.mxu3 %v5295_v18  ;;  %v1235_v47 = vld [vmem:[#allocation6 + $0x8] sm:$0xf]  ;;  %v5476_v18 = vld [vmem:[%s9095_s5 + $0x2b0] sm:$0xf] }
 0x244   :  { %v5477_v20 = vor.u32 %v7122_v19, %v5476_v18  ;;  %v5389_v18 = vor.u32 %v7100_v14, %v5388_v13  ;;  %v5390_v19 = vld [vmem:[%s9095_s5 + $0x208] sm:$0xf0]  ;;  %v5633_v14 = vld [vmem:[#allocation9 + $0x1e0] sm:$0xf] }
 0x245   :  { %1213 = vmatpush.bf16.msrb.mxu1 %v5247_v26  ;;  %v7109_v26 = vld [vmem:[%s9095_s5 + $0x254] sm:$0xf]  ;;  %v5393_v21 = vor.u32 %v7099_v15, %v5390_v19  ;;  %v7192_v15 = vld [vmem:[#allocation9 + $0x1e4] sm:$0xf0] }
 0x249   :  { %1214 = vmatpush.bf16.msrb.mxu1 %v5239_v29  ;;  %v5433_v29 = vor.u32 %v7109_v26, %v5430_v27 }
 0x24d   :  { %1215 = vmatpush.bf16.msrb.mxu1 %v5231_v33  ;;  %v7119_v33 = vld [vmem:[%s9095_s5 + $0x2a4] sm:$0xf] }
 0x289   :  { %v693_v34 = vpop.f32.mrf.mxu1  ;;  %v771_v35 = vpop.f32.mrf.mxu3 }
 0x28a   :  { %v776_v36 = vpack.c.bf16 %v771_v35, %v771_v35  ;;  %v706_v37 = vpop.f32.mrf.mxu2  ;;  %v710_v46 = vpack.c.bf16 %v693_v34, %v693_v34  ;;  %v5469_v34 = vor.u32 %v7120_v32, %v5468_v31  ;;  %v5470_v35 = vld [vmem:[%s9095_s5 + $0x2a8] sm:$0xf0] }
 0x28b   :  { %v711_v42 = vpack.c.bf16 %v706_v37, %v706_v37  ;;  %v5420_v37 = vld [vmem:[%s9095_s5 + $0x240] sm:$0xf] }
 0x28c   :  { %991 = vmatmul.bf16.vlgmr.msrb.gmra.mxu2 %v776_v36  ;;  %1017 = vmatmul.bf16.vlgmr.msrb.gmra.mxu3 %v776_v36  ;;  %v5473_v36 = vor.u32 %v7119_v33, %v5470_v35 }
 0x28d   :  { %1259 = vmatpush.bf16.msrb.mxu2 %v8263_v30  ;;  %v5508_v30 = vld [vmem:[%s9095_s5 + $0x2f0] sm:$0xf] }
 0x28e   :  { %v5509_v49 = vor.u32 %v7130_v48, %v5508_v30  ;;  %v5462_v30 = vld [vmem:[%s9095_s5 + $0x298] sm:$0xf0] }
 0x290   :  { %1473 = vmatpush.bf16.msrb.mxu3 %v5509_v49  ;;  %v7106_v49 = vld [vmem:[%s9095_s5 + $0x234] sm:$0xf0] }
 0x291   :  { %v695_v38 = vpop.f32.mrf.mxu1  ;;  %v773_v40 = vpop.f32.mrf.mxu3 }
 0x292   :  { %v708_v41 = vpop.f32.mrf.mxu2  ;;  %v7108_v38 = vld [vmem:[%s9095_s5 + $0x244] sm:$0xf0]  ;;  %v7107_v40 = vld [vmem:[%s9095_s5 + $0x244] sm:$0xf] }
 0x293   :  { %v5421_v41 = vor.u32 %v7108_v38, %v5420_v37 }
 0x294   :  { %1474 = vmatpush.bf16.msrb.mxu3 %v5501_v56  ;;  %v7116_v56 = vld [vmem:[%s9095_s5 + $0x284] sm:$0xf0] }
 0x295   :  { %v5453_v60 = vor.u32 %v7116_v56, %v5452_v55 }
 0x298   :  { %1475 = vmatpush.bf16.msrb.mxu3 %v5493_v62  ;;  %v5457_v62 = vor.u32 %v7115_v57, %v5454_v61 }
 0x299   :  { %v758_v43 = vpop.f32.mrf.mxu1 }
 0x29a   :  { %v775_v44 = vpack.c.bf16 %v758_v43, %v758_v43 }
 0x29c   :  { %978 = vmatmul.bf16.vlgmr.msrb.gmra.mxu0 %v775_v44  ;;  %1004 = vmatmul.bf16.vlgmr.msra.gmra.mxu1 %v775_v44  ;;  %v5460_v44 = vld [vmem:[%s9095_s5 + $0x290] sm:$0xf] }
 0x29d   :  { %1203 = vmatmul.bf16.vlgmr.msra.gmra.mxu2 %v711_v42  ;;  %1229 = vmatmul.bf16.vlgmr.msra.gmra.mxu3 %v711_v42  ;;  %v5422_v42 = vld [vmem:[%s9095_s5 + $0x248] sm:$0xf0] }
 0x29e   :  { %1246 = vmatpush.bf16.msrb.mxu0 %v8305_v52  ;;  %v7129_v52 = vld [vmem:[%s9095_s5 + $0x2f4] sm:$0xf]  ;;  %1460 = vmatpush.bf16.msra.mxu1 %v5445_v4  ;;  %v5425_v43 = vor.u32 %v7107_v40, %v5422_v42  ;;  %v5406_v4 = vld [vmem:[%s9095_s5 + $0x228] sm:$0xf0] }
 0x29f   :  { %v5513_v51 = vor.u32 %v7129_v52, %v5510_v50  ;;  %1476 = vmatpush.bf16.msrb.mxu3 %v5485_v11  ;;  %v5412_v52 = vld [vmem:[%s9095_s5 + $0x230] sm:$0xf]  ;;  %v7105_v50 = vld [vmem:[%s9095_s5 + $0x234] sm:$0xf]  ;;  %v5409_v5 = vor.u32 %v7103_v2, %v5406_v4  ;;  %v5401_v11 = vor.u32 %v7101_v8, %v5398_v10  ;;  %v5579_v10 = vld [vmem:[#allocation9 + $0x178] sm:$0xf0] }
 0x2a0   :  { %v5417_v54 = vor.u32 %v7105_v50, %v5414_v53 }
 0x2a1   :  { %v760_v45 = vpop.f32.mrf.mxu1  ;;  %1499 = vmatpush.bf16.msra.mxu2 %v5513_v51  ;;  %v5413_v51 = vor.u32 %v7106_v49, %v5412_v52 }
 0x2a2   :  { %1461 = vmatpush.bf16.msra.mxu1 %v5437_v16  ;;  %v7118_v45 = vld [vmem:[%s9095_s5 + $0x294] sm:$0xf0] }
 0x2a3   :  { %1477 = vmatpush.bf16.msrb.mxu3 %v5477_v20 }
 0x2a5   :  { %1500 = vmatpush.bf16.msra.mxu2 %v5505_v58 }
 0x2a6   :  { %1462 = vmatpush.bf16.msra.mxu1 %v5429_v28 }
 0x2a7   :  { %1478 = vmatpush.bf16.msrb.mxu3 %v5469_v34 }
 0x2a9   :  { %1501 = vmatpush.bf16.msra.mxu2 %v5497_v3  ;;  %v5405_v3 = vor.u32 %v7104_v63, %v5404_v39  ;;  %v7194_v39 = vld [vmem:[#allocation9 + $0x1f4] sm:$0xf0] }
 0x2aa   :  { %1463 = vmatpush.bf16.msra.mxu1 %v5421_v41 }
 0x2ac   :  { %1190 = vmatmul.bf16.vlgmr.msra.gmra.mxu0 %v710_v46  ;;  %1216 = vmatmul.bf16.vlgmr.msrb.gmra.mxu1 %v710_v46  ;;  %v7117_v46 = vld [vmem:[%s9095_s5 + $0x294] sm:$0xf] }
 0x2ad   :  { %5353 = vmatmul.msk.bf16.vlgmr.msrb.gmra.mxu2 %vm680_vm2, %v1235_v47  ;;  %1486 = vmatpush.bf16.msra.mxu0 %v5449_v7  ;;  %v5465_v48 = vor.u32 %v7117_v46, %v5462_v30  ;;  %v7102_v7 = vld [vmem:[%s9095_s5 + $0x214] sm:$0xf0]  ;;  %v1514_v46 = vld [vmem:[#allocation7] sm:$0x3] }
 0x2ae   :  { %1502 = vmatpush.bf16.msra.mxu2 %v5489_v0  ;;  %1464 = vmatpush.bf16.msra.mxu1 %v5413_v51  ;;  %v5397_v9 = vor.u32 %v7102_v7, %v5396_v6  ;;  %v1516_v52 = vperm.slane %v1514_v46, 0  ;;  %v1517_v50 = vperm.slane %v1514_v46, 1  ;;  %v7176_v6 = vld [vmem:[#allocation9 + $0x164] sm:$0xf0]  ;;  %v7177_v7 = vld [vmem:[#allocation9 + $0x174] sm:$0xf] }
 0x2af   :  { %v5582_v19 = vor.u32 %v7177_v7, %v5579_v10  ;;  %v7183_v10 = vld [vmem:[#allocation9 + $0x1a4] sm:$0xf] }
 0x2b1   :  { %1487 = vmatpush.bf16.msra.mxu0 %v5441_v1 }
 0x2b2   :  { %1503 = vmatpush.bf16.msra.mxu2 %v5481_v24  ;;  %1465 = vmatpush.bf16.msra.mxu1 %v5405_v3 }
 0x2b5   :  { %1488 = vmatpush.bf16.msra.mxu0 %v5433_v29 }
 0x2b6   :  { %1504 = vmatpush.bf16.msra.mxu2 %v5473_v36  ;;  %1466 = vmatpush.bf16.msra.mxu1 %v5397_v9 }
 0x2b9   :  { %1489 = vmatpush.bf16.msra.mxu0 %v5425_v43 }
 0x2ba   :  { %1505 = vmatpush.bf16.msra.mxu2 %v5465_v48  ;;  %1467 = vmatpush.bf16.msra.mxu1 %v5389_v18  ;;  %v5561_v18 = vld [vmem:[#allocation9 + $0x150] sm:$0xf] }
 0x2bc   :  { %5352 = vmatmul.msk.bf16.vlgmr.msrb.gmra.mxu0 %vm680_vm2, %v1235_v47  ;;  %v5461_v47 = vor.u32 %v7118_v45, %v5460_v44 }
 0x2bd   :  { %1490 = vmatpush.bf16.msra.mxu0 %v5417_v54 }
 0x2be   :  { %1479 = vmatpush.bf16.msrb.mxu3 %v5461_v47  ;;  %1506 = vmatpush.bf16.msra.mxu2 %v5457_v62  ;;  %v5641_v62 = vld [vmem:[#allocation9 + $0x1f0] sm:$0xf] }
 0x2bf   :  { %v5642_v9 = vor.u32 %v7194_v39, %v5641_v62  ;;  %v5611_v62 = vld [vmem:[#allocation9 + $0x1b8] sm:$0xf0]  ;;  %v7168_v39 = vld [vmem:[#allocation9 + $0x124] sm:$0xf0] }
 0x2c1   :  { %1491 = vmatpush.bf16.msra.mxu0 %v5409_v5  ;;  %v5569_v5 = vld [vmem:[#allocation9 + $0x160] sm:$0xf] }
 0x2c2   :  { %1480 = vmatpush.bf16.msrb.mxu3 %v5453_v60 }
 0x2c5   :  { %1492 = vmatpush.bf16.msra.mxu0 %v5401_v11  ;;  %v7193_v11 = vld [vmem:[#allocation9 + $0x1f4] sm:$0xf] }
 0x2c9   :  { %1493 = vmatpush.bf16.msra.mxu0 %v5393_v21  ;;  %v5570_v21 = vor.u32 %v7176_v6, %v5569_v5  ;;  %v7167_v5 = vld [vmem:[#allocation9 + $0x124] sm:$0xf] }
 0x30f   :  { %v992_v58 = vpop.f32.mrf.mxu2  ;;  %v1018_v59 = vpop.f32.mrf.mxu3 }
 0x317   :  { %v994_v12 = vpop.f32.mrf.mxu2  ;;  %v1020_v0 = vpop.f32.mrf.mxu3 }
 0x318   :  { %v5643_v12 = vld [vmem:[#allocation9 + $0x1f8] sm:$0xf0] }
 0x319   :  { %v979_v16 = vpop.f32.mrf.mxu0  ;;  %v1005_v17 = vpop.f32.mrf.mxu1 }
 0x31a   :  { %v993_v1 = vadd.f32 %v992_v58, %v979_v16  ;;  %v1019_v20 = vadd.f32 %v1018_v59, %v1005_v17  ;;  %v5577_v58 = vld [vmem:[#allocation9 + $0x170] sm:$0xf]  ;;  %v7178_v59 = vld [vmem:[#allocation9 + $0x174] sm:$0xf0] }
 0x31b   :  { %v5578_v8 = vor.u32 %v7178_v59, %v5577_v58  ;;  %v1526_v16 = vld [vmem:[%s9097_s7] sm:$0x3]  ;;  %v5516_v17 = vld [vmem:[%s9097_s7 + $0x2] sm:$0x3] }
 0x320   :  { %v1204_v22 = vpop.f32.mrf.mxu2  ;;  %v1230_v23 = vpop.f32.mrf.mxu3 }
 0x321   :  { %v981_v24 = vpop.f32.mrf.mxu0  ;;  %v1007_v25 = vpop.f32.mrf.mxu1 }
 0x322   :  { %v7191_v24 = vld [vmem:[#allocation9 + $0x1e4] sm:$0xf]  ;;  %v5635_v25 = vld [vmem:[#allocation9 + $0x1e8] sm:$0xf0] }
 0x328   :  { %v1206_v26 = vpop.f32.mrf.mxu2  ;;  %v1232_v27 = vpop.f32.mrf.mxu3 }
 0x329   :  { %v1191_v28 = vpop.f32.mrf.mxu0  ;;  %v1217_v29 = vpop.f32.mrf.mxu1  ;;  %v7174_v26 = vld [vmem:[#allocation9 + $0x154] sm:$0xf0]  ;;  %v5625_v27 = vld [vmem:[#allocation9 + $0x1d0] sm:$0xf] }
 0x32a   :  { %v1192_v31 = vadd.f32 %v1191_v28, %v993_v1  ;;  %v1218_v32 = vadd.f32 %v1217_v29, %v1019_v20  ;;  %v7175_v1 = vld [vmem:[#allocation9 + $0x164] sm:$0xf]  ;;  %v5646_v20 = vor.u32 %v7193_v11, %v5643_v12  ;;  %v7190_v28 = vld [vmem:[#allocation9 + $0x1d4] sm:$0xf0]  ;;  %v5553_v29 = vld [vmem:[#allocation9 + $0x140] sm:$0xf] }
 0x32b   :  { %v5603_v11 = vld [vmem:[#allocation9 + $0x1a8] sm:$0xf0]  ;;  %v7166_v12 = vld [vmem:[#allocation9 + $0x114] sm:$0xf0] }
 0x32c   :  { %v1205_v33 = vadd.f32 %v1204_v22, %v1192_v31  ;;  %v1231_v34 = vadd.f32 %v1230_v23, %v1218_v32  ;;  %v5634_v22 = vor.u32 %v7192_v15, %v5633_v14  ;;  %v5571_v23 = vld [vmem:[#allocation9 + $0x168] sm:$0xf0]  ;;  %v7173_v32 = vld [vmem:[#allocation9 + $0x154] sm:$0xf]  ;;  %v5593_v14 = vld [vmem:[#allocation9 + $0x190] sm:$0xf] }
 0x32d   :  { %v5574_v31 = vor.u32 %v7175_v1, %v5571_v23  ;;  %v7182_v15 = vld [vmem:[#allocation9 + $0x194] sm:$0xf0]  ;;  %v5606_v1 = vor.u32 %v7183_v10, %v5603_v11  ;;  %v7181_v23 = vld [vmem:[#allocation9 + $0x194] sm:$0xf]  ;;  %v7156_v10 = vld [vmem:[#allocation9 + $0xc4] sm:$0xf0] }
 0x330   :  { %v1261_v35 = vpop.f32.mrf.mxu2 }
 0x331   :  { %v1266_v36 = vpack.c.bf16 %v1261_v35, %v1261_v35  ;;  %v1193_v37 = vpop.f32.mrf.mxu0  ;;  %v1219_v38 = vpop.f32.mrf.mxu1  ;;  %v5626_v35 = vor.u32 %v7190_v28, %v5625_v27  ;;  %v7180_v27 = vld [vmem:[#allocation9 + $0x184] sm:$0xf0]  ;;  %v7146_v28 = vld [vmem:[#allocation9 + $0x74] sm:$0xf0] }
 0x332   :  { %v7189_v37 = vld [vmem:[#allocation9 + $0x1d4] sm:$0xf]  ;;  %v5627_v38 = vld [vmem:[#allocation9 + $0x1d8] sm:$0xf0] }
 0x333   :  { %1481 = vmatmul.bf16.vlgmr.msrb.gmra.mxu3 %v1266_v36  ;;  %1507 = vmatmul.bf16.vlgmr.msra.gmra.mxu2 %v1266_v36  ;;  %v5563_v36 = vld [vmem:[#allocation9 + $0x158] sm:$0xf0]  ;;  %v5630_v46 = vor.u32 %v7189_v37, %v5627_v38  ;;  %v5697_v37 = vld [vmem:[#allocation9 + $0x60] sm:$0xf] }
 0x338   :  { %v1263_v40 = vpop.f32.mrf.mxu2 }
 0x339   :  { %v1248_v41 = vpop.f32.mrf.mxu0  ;;  %v7172_v40 = vld [vmem:[#allocation9 + $0x144] sm:$0xf0] }
 0x33a   :  { %v1265_v42 = vpack.c.bf16 %v1248_v41, %v1248_v41  ;;  %v5617_v41 = vld [vmem:[#allocation9 + $0x1c0] sm:$0xf] }
 0x33c   :  { %1468 = vmatmul.bf16.vlgmr.msra.gmra.mxu1 %v1265_v42  ;;  %1494 = vmatmul.bf16.vlgmr.msra.gmra.mxu0 %v1265_v42  ;;  %v7188_v42 = vld [vmem:[#allocation9 + $0x1c4] sm:$0xf0] }
 0x341   :  { %v1250_v43 = vpop.f32.mrf.mxu0 }
 0x342   :  { %v5545_v43 = vld [vmem:[#allocation9 + $0x130] sm:$0xf] }
 0x3b6   :  { %v1482_v44 = vpop.f32.mrf.mxu3  ;;  %v1508_v45 = vpop.f32.mrf.mxu2 }
 0x3b9   :  { %v1469_v47 = vpop.f32.mrf.mxu1  ;;  %v1495_v30 = vpop.f32.mrf.mxu0 }
 0x3ba   :  { %v1483_v48 = vadd.f32 %v1482_v44, %v1469_v47  ;;  %v1509_v49 = vadd.f32 %v1508_v45, %v1495_v30  ;;  %v5566_v44 = vor.u32 %v7173_v32, %v5563_v36  ;;  %v7171_v45 = vld [vmem:[#allocation9 + $0x144] sm:$0xf]  ;;  %v5554_v47 = vor.u32 %v7172_v40, %v5553_v29  ;;  %v5769_v29 = vld [vmem:[#allocation9 + $0xf0] sm:$0xf]  ;;  %v7145_v40 = vld [vmem:[#allocation9 + $0x74] sm:$0xf] }
 0x3bb   :  { %v5618_v30 = vor.u32 %v7188_v42, %v5617_v41  ;;  %v7179_v41 = vld [vmem:[#allocation9 + $0x184] sm:$0xf]  ;;  %v5587_v42 = vld [vmem:[#allocation9 + $0x188] sm:$0xf0] }
 0x3bc   :  { %v1512_v51 = vadd.f32 %v1483_v48, %v1205_v33  ;;  %v1513_v53 = vadd.f32 %v1509_v49, %v1231_v34  ;;  %v5638_v33 = vor.u32 %v7191_v24, %v5635_v25  ;;  %v5562_v34 = vor.u32 %v7174_v26, %v5561_v18  ;;  %v5555_v48 = vld [vmem:[#allocation9 + $0x148] sm:$0xf0]  ;;  %v5595_v24 = vld [vmem:[#allocation9 + $0x198] sm:$0xf0]  ;;  %v5705_v25 = vld [vmem:[#allocation9 + $0x70] sm:$0xf] }
 0x3bd   :  { %v5619_v49 = vld [vmem:[#allocation9 + $0x1c8] sm:$0xf0]  ;;  %v5585_v26 = vld [vmem:[#allocation9 + $0x180] sm:$0xf] }
 0x3be   :  { %v1520_v54 = vadd.f32 %v1516_v52, %v1512_v51  ;;  %v1521_v55 = vadd.f32 %v1517_v50, %v1513_v53  ;;  %v1484_v56 = vpop.f32.mrf.mxu3  ;;  %v1510_v57 = vpop.f32.mrf.mxu2  ;;  %v7187_v52 = vld [vmem:[#allocation9 + $0x1c4] sm:$0xf]  ;;  %v7170_v50 = vld [vmem:[#allocation9 + $0x134] sm:$0xf0]  ;;  %v5609_v51 = vld [vmem:[#allocation9 + $0x1b0] sm:$0xf]  ;;  %v5586_v38 = vor.u32 %v7180_v27, %v5585_v26 }
 0x3bf   :  { %v7186_v53 = vld [vmem:[#allocation9 + $0x1b4] sm:$0xf0]  ;;  %v7169_v56 = vld [vmem:[#allocation9 + $0x134] sm:$0xf]  ;;  %v5622_v57 = vor.u32 %v7187_v52, %v5619_v49  ;;  %v5546_v58 = vor.u32 %v7170_v50, %v5545_v43  ;;  %v5706_v43 = vor.u32 %v7146_v28, %v5705_v25  ;;  %v7160_v52 = vld [vmem:[#allocation9 + $0xe4] sm:$0xf0]  ;;  %v5590_v50 = vor.u32 %v7179_v41, %v5587_v42 }
 0x3c0   :  { %v1522_v60 = vmax.f32 %v1520_v54, 0.0  ;;  %v1523_v61 = vmax.f32 %v1521_v55, 0.0  ;;  %v5537_v54 = vld [vmem:[#allocation9 + $0x120] sm:$0xf]  ;;  %v5558_v55 = vor.u32 %v7171_v45, %v5555_v48  ;;  %v5610_v59 = vor.u32 %v7186_v53, %v5609_v51  ;;  %v5707_v45 = vld [vmem:[#allocation9 + $0x78] sm:$0xf0] }
 0x3c1   :  { %v1471_v63 = vpop.f32.mrf.mxu1  ;;  %v1497_v2 = vpop.f32.mrf.mxu0  ;;  %v5538_v7 = vor.u32 %v7168_v39, %v5537_v54  ;;  %v5761_v48 = vld [vmem:[#allocation9 + $0xe0] sm:$0xf]  ;;  %v5689_v51 = vld [vmem:[#allocation9 + $0x50] sm:$0xf]  ;;  %v5710_v53 = vor.u32 %v7145_v40, %v5707_v45  ;;  %v7143_v54 = vld [vmem:[#allocation9 + $0x64] sm:$0xf] }
 0x3c2   :  { %v1524_v3 = vpack.c.bf16 %v1522_v60, %v1522_v60  ;;  %v1525_v4 = vpack.c.bf16 %v1523_v61, %v1523_v61  ;;  %v5547_v60 = vld [vmem:[#allocation9 + $0x138] sm:$0xf0]  ;;  %v7185_v61 = vld [vmem:[#allocation9 + $0x1b4] sm:$0xf]  ;;  %v5601_v63 = vld [vmem:[#allocation9 + $0x1a0] sm:$0xf] }
 0x3c3   :  { %v7184_v2 = vld [vmem:[#allocation9 + $0x1a4] sm:$0xf0]  ;;  %v5614_v6 = vor.u32 %v7185_v61, %v5611_v62  ;;  %v7142_v61 = vld [vmem:[#allocation9 + $0x54] sm:$0xf0]  ;;  %v5753_v62 = vld [vmem:[#allocation9 + $0xd0] sm:$0xf] }
 0x3c4   :  { %v8839_v0 = vsel %vm1531_vm3, %v1524_v3, 0  ;;  %v8842_v13 = vsel %vm1531_vm3, %v1525_v4, 0  ;;  %v5529_v3 = vld [vmem:[#allocation9 + $0x110] sm:$0xf]  ;;  %v5550_v4 = vor.u32 %v7169_v56, %v5547_v60  ;;  %v5763_v60 = vld [vmem:[#allocation9 + $0xe8] sm:$0xf0] }
 0x3c5   :  { %1545 = vmatpush.bf16.msrb.mxu1 %v8839_v0  ;;  %1558 = vmatpush.bf16.msra.mxu3 %v8842_v13  ;;  %v7158_v39 = vld [vmem:[#allocation9 + $0xd4] sm:$0xf0]  ;;  %v5729_v26 = vld [vmem:[#allocation9 + $0xa0] sm:$0xf]  ;;  %v7152_v27 = vld [vmem:[#allocation9 + $0xa4] sm:$0xf0] }
 0x3c6   :  { %1610 = vmatpush.bf16.msrb.mxu0 %v8839_v0  ;;  %1623 = vmatpush.bf16.msrb.mxu2 %v8842_v13  ;;  %v7139_v28 = vld [vmem:[#allocation9 + $0x44] sm:$0xf]  ;;  %v5721_v40 = vld [vmem:[#allocation9 + $0x90] sm:$0xf]  ;;  %v7150_v41 = vld [vmem:[#allocation9 + $0x94] sm:$0xf0] }
 0x3c7   :  { %v7137_v42 = vld [vmem:[#allocation9 + $0x34] sm:$0xf] }
 0x3c8   :  { %5515 = vmatmul.msk.bf16.vlgmr.msra.gmra.mxu3 %vm1527_vm4, %v1526_v16  ;;  %5514 = vmatmul.msk.bf16.vlgmr.msrb.gmra.mxu1 %vm1527_vm4, %v1526_v16  ;;  %v5521_v16 = vld [vmem:[#allocation9 + $0x100] sm:$0xf] }
 0x3c9   :  { %1824 = vmatpush.bf16.msra.mxu1 %v5578_v8  ;;  %1837 = vmatpush.bf16.msrb.mxu3 %v5642_v9  ;;  %v5602_v8 = vor.u32 %v7184_v2, %v5601_v63  ;;  %v5539_v9 = vld [vmem:[#allocation9 + $0x128] sm:$0xf0] }
 0x3ca   :  { %5517 = vmatmul.msk.bf16.vlgmr.msrb.gmra.mxu0 %vm1527_vm4, %v5516_v17  ;;  %5518 = vmatmul.msk.bf16.vlgmr.msrb.gmra.mxu2 %vm1527_vm4, %v5516_v17  ;;  %v7164_v17 = vld [vmem:[#allocation9 + $0x104] sm:$0xf0]  ;;  %v5542_v18 = vor.u32 %v7167_v5, %v5539_v9  ;;  %v5754_v5 = vor.u32 %v7158_v39, %v5753_v62  ;;  %v5745_v9 = vld [vmem:[#allocation9 + $0xc0] sm:$0xf]  ;;  %v7131_v39 = vld [vmem:[#allocation9 + $0x4] sm:$0xf] }
 0x3cb   :  { %1850 = vmatpush.bf16.msra.mxu0 %v5582_v19  ;;  %1863 = vmatpush.bf16.msra.mxu2 %v5646_v20  ;;  %v7165_v19 = vld [vmem:[#allocation9 + $0x114] sm:$0xf]  ;;  %v5530_v20 = vor.u32 %v7166_v12, %v5529_v3  ;;  %v5522_v36 = vor.u32 %v7164_v17, %v5521_v16  ;;  %v5690_v3 = vor.u32 %v7142_v61, %v5689_v51  ;;  %v7138_v16 = vld [vmem:[#allocation9 + $0x34] sm:$0xf0]  ;;  %v5737_v17 = vld [vmem:[#allocation9 + $0xb0] sm:$0xf] }
 0x3cc   :  { %v5667_v51 = vld [vmem:[#allocation9 + $0x28] sm:$0xf0] }
 0x3cd   :  { %1825 = vmatpush.bf16.msra.mxu1 %v5570_v21  ;;  %1838 = vmatpush.bf16.msrb.mxu3 %v5634_v22  ;;  %v5594_v21 = vor.u32 %v7182_v15, %v5593_v14  ;;  %v5531_v22 = vld [vmem:[#allocation9 + $0x118] sm:$0xf0]  ;;  %v5673_v14 = vld [vmem:[#allocation9 + $0x30] sm:$0xf]  ;;  %v5746_v15 = vor.u32 %v7156_v10, %v5745_v9  ;;  %v5731_v61 = vld [vmem:[#allocation9 + $0xa8] sm:$0xf0] }
 0x3ce   :  { %v5534_v32 = vor.u32 %v7165_v19, %v5531_v22  ;;  %v5674_v19 = vor.u32 %v7138_v16, %v5673_v14 }
 0x3cf   :  { %1851 = vmatpush.bf16.msra.mxu0 %v5574_v31  ;;  %1864 = vmatpush.bf16.msra.mxu2 %v5638_v33  ;;  %v7162_v31 = vld [vmem:[#allocation9 + $0xf4] sm:$0xf0]  ;;  %v7163_v33 = vld [vmem:[#allocation9 + $0x104] sm:$0xf] }
 0x3d1   :  { %1826 = vmatpush.bf16.msra.mxu1 %v5562_v34  ;;  %1839 = vmatpush.bf16.msrb.mxu3 %v5626_v35  ;;  %v5523_v34 = vld [vmem:[#allocation9 + $0x108] sm:$0xf0]  ;;  %v5598_v35 = vor.u32 %v7181_v23, %v5595_v24  ;;  %v5657_v23 = vld [vmem:[#allocation9 + $0x10] sm:$0xf]  ;;  %v7134_v24 = vld [vmem:[#allocation9 + $0x14] sm:$0xf0] }
 0x3d2   :  { %v5526_v49 = vor.u32 %v7163_v33, %v5523_v34  ;;  %v5658_v25 = vor.u32 %v7134_v24, %v5657_v23  ;;  %v5649_v33 = vld [vmem:[#allocation9] sm:$0xf]  ;;  %v7132_v34 = vld [vmem:[#allocation9 + $0x4] sm:$0xf0]  ;;  %v7209_v23 = vld [vmem:[#allocation9 + $0x274] sm:$0xf] }
 0x3d3   :  { %1852 = vmatpush.bf16.msra.mxu0 %v5566_v44  ;;  %1865 = vmatpush.bf16.msra.mxu2 %v5630_v46  ;;  %v5770_v44 = vor.u32 %v7162_v31, %v5769_v29  ;;  %v7161_v46 = vld [vmem:[#allocation9 + $0xf4] sm:$0xf]  ;;  %v5730_v29 = vor.u32 %v7152_v27, %v5729_v26  ;;  %v5683_v31 = vld [vmem:[#allocation9 + $0x48] sm:$0xf0]  ;;  %v5838_v24 = vld [vmem:[#allocation9 + $0x278] sm:$0xf0] }
 0x3d4   :  { %v5900_v26 = vld [vmem:[#allocation9 + $0x2f0] sm:$0xf]  ;;  %v7226_v27 = vld [vmem:[#allocation9 + $0x2f4] sm:$0xf0] }
 0x3d5   :  { %1827 = vmatpush.bf16.msra.mxu1 %v5554_v47  ;;  %1840 = vmatpush.bf16.msrb.mxu3 %v5618_v30  ;;  %v5771_v47 = vld [vmem:[#allocation9 + $0xf8] sm:$0xf0]  ;;  %v7144_v30 = vld [vmem:[#allocation9 + $0x64] sm:$0xf0] }
 0x3d6   :  { %v5698_v56 = vor.u32 %v7144_v30, %v5697_v37  ;;  %v5755_v37 = vld [vmem:[#allocation9 + $0xd8] sm:$0xf0] }
 0x3d7   :  { %1853 = vmatpush.bf16.msra.mxu0 %v5558_v55  ;;  %1866 = vmatpush.bf16.msra.mxu2 %v5622_v57  ;;  %v5774_v55 = vor.u32 %v7161_v46, %v5771_v47  ;;  %v5762_v57 = vor.u32 %v7160_v52, %v5761_v48  ;;  %v7155_v46 = vld [vmem:[#allocation9 + $0xc4] sm:$0xf]  ;;  %v5747_v47 = vld [vmem:[#allocation9 + $0xc8] sm:$0xf0]  ;;  %v5713_v48 = vld [vmem:[#allocation9 + $0x80] sm:$0xf] }
 0x3d8   :  { %v5750_v30 = vor.u32 %v7155_v46, %v5747_v47  ;;  %v7148_v52 = vld [vmem:[#allocation9 + $0x84] sm:$0xf0]  ;;  %v5820_v46 = vld [vmem:[#allocation9 + $0x250] sm:$0xf]  ;;  %v7206_v47 = vld [vmem:[#allocation9 + $0x254] sm:$0xf0] }
 0x3d9   :  { %1828 = vmatpush.bf16.msra.mxu1 %v5546_v58  ;;  %1841 = vmatpush.bf16.msrb.mxu3 %v5610_v59  ;;  %v5699_v58 = vld [vmem:[#allocation9 + $0x68] sm:$0xf0]  ;;  %v7159_v59 = vld [vmem:[#allocation9 + $0xe4] sm:$0xf] }
 0x3da   :  { %v5702_v63 = vor.u32 %v7143_v54, %v5699_v58  ;;  %v5766_v2 = vor.u32 %v7159_v59, %v5763_v60  ;;  %v7153_v54 = vld [vmem:[#allocation9 + $0xb4] sm:$0xf]  ;;  %v5659_v58 = vld [vmem:[#allocation9 + $0x18] sm:$0xf0]  ;;  %v7151_v60 = vld [vmem:[#allocation9 + $0xa4] sm:$0xf] }
 0x3db   :  { %1854 = vmatpush.bf16.msra.mxu0 %v5550_v4  ;;  %1867 = vmatpush.bf16.msra.mxu2 %v5614_v6  ;;  %v5681_v4 = vld [vmem:[#allocation9 + $0x40] sm:$0xf]  ;;  %v7141_v6 = vld [vmem:[#allocation9 + $0x54] sm:$0xf]  ;;  %v5734_v62 = vor.u32 %v7151_v60, %v5731_v61  ;;  %v5814_v60 = vld [vmem:[#allocation9 + $0x248] sm:$0xf0] }
 0x3dd   :  { %1829 = vmatpush.bf16.msra.mxu1 %v5538_v7  ;;  %1842 = vmatpush.bf16.msrb.mxu3 %v5602_v8  ;;  %v5691_v7 = vld [vmem:[#allocation9 + $0x58] sm:$0xf0]  ;;  %v7140_v8 = vld [vmem:[#allocation9 + $0x44] sm:$0xf0] }
 0x3de   :  { %v5694_v11 = vor.u32 %v7141_v6, %v5691_v7  ;;  %v5682_v12 = vor.u32 %v7140_v8, %v5681_v4  ;;  %v5723_v4 = vld [vmem:[#allocation9 + $0x98] sm:$0xf0]  ;;  %v7147_v6 = vld [vmem:[#allocation9 + $0x84] sm:$0xf]  ;;  %v5715_v7 = vld [vmem:[#allocation9 + $0x88] sm:$0xf0] }
 0x3df   :  { %1855 = vmatpush.bf16.msra.mxu0 %v5542_v18  ;;  %1868 = vmatpush.bf16.msra.mxu2 %v5606_v1  ;;  %v7154_v18 = vld [vmem:[#allocation9 + $0xb4] sm:$0xf0]  ;;  %v5718_v8 = vor.u32 %v7147_v6, %v5715_v7  ;;  %v5804_v6 = vld [vmem:[#allocation9 + $0x230] sm:$0xf] }
 0x3e0   :  { %v5738_v1 = vor.u32 %v7154_v18, %v5737_v17  ;;  %v7202_v7 = vld [vmem:[#allocation9 + $0x234] sm:$0xf0] }
 0x3e1   :  { %1830 = vmatpush.bf16.msra.mxu1 %v5530_v20  ;;  %1843 = vmatpush.bf16.msrb.mxu3 %v5594_v21  ;;  %v5665_v20 = vld [vmem:[#allocation9 + $0x20] sm:$0xf]  ;;  %v7136_v21 = vld [vmem:[#allocation9 + $0x24] sm:$0xf0] }
 0x3e2   :  { %v5666_v22 = vor.u32 %v7136_v21, %v5665_v20  ;;  %v5836_v21 = vld [vmem:[#allocation9 + $0x270] sm:$0xf] }
 0x3e3   :  { %1856 = vmatpush.bf16.msra.mxu0 %v5534_v32  ;;  %1869 = vmatpush.bf16.msra.mxu2 %v5598_v35  ;;  %v5686_v32 = vor.u32 %v7139_v28, %v5683_v31  ;;  %v7157_v35 = vld [vmem:[#allocation9 + $0xd4] sm:$0xf]  ;;  %v5902_v31 = vld [vmem:[#allocation9 + $0x2f8] sm:$0xf0] }
 0x3e4   :  { %v7225_v28 = vld [vmem:[#allocation9 + $0x2f4] sm:$0xf] }
 0x3e5   :  { %1831 = vmatpush.bf16.msra.mxu1 %v5522_v36  ;;  %1844 = vmatpush.bf16.msrb.mxu3 %v5586_v38  ;;  %v5650_v36 = vor.u32 %v7132_v34, %v5649_v33  ;;  %v5758_v38 = vor.u32 %v7157_v35, %v5755_v37  ;;  %v5828_v33 = vld [vmem:[#allocation9 + $0x260] sm:$0xf]  ;;  %v7208_v34 = vld [vmem:[#allocation9 + $0x264] sm:$0xf0]  ;;  %v7207_v35 = vld [vmem:[#allocation9 + $0x264] sm:$0xf] }
 0x3e6   :  { %v5830_v37 = vld [vmem:[#allocation9 + $0x268] sm:$0xf0] }
 0x3e7   :  { %1857 = vmatpush.bf16.msra.mxu0 %v5526_v49  ;;  %1870 = vmatpush.bf16.msra.mxu2 %v5590_v50  ;;  %v7135_v49 = vld [vmem:[#allocation9 + $0x24] sm:$0xf]  ;;  %v5714_v50 = vor.u32 %v7148_v52, %v5713_v48  ;;  %v5821_v48 = vor.u32 %v7206_v47, %v5820_v46  ;;  %v5822_v52 = vld [vmem:[#allocation9 + $0x258] sm:$0xf0]  ;;  %v5782_v47 = vld [vmem:[#allocation9 + $0x208] sm:$0xf0] }
 0x3e8   :  { %v7195_v46 = vld [vmem:[#allocation9 + $0x204] sm:$0xf] }
 0x3e9   :  { %2036 = vmatpush.bf16.msrb.mxu1 %v5706_v43  ;;  %2049 = vmatpush.bf16.msra.mxu3 %v5770_v44  ;;  %v5722_v43 = vor.u32 %v7150_v41, %v5721_v40  ;;  %v5675_v44 = vld [vmem:[#allocation9 + $0x38] sm:$0xf0]  ;;  %v5892_v40 = vld [vmem:[#allocation9 + $0x2e0] sm:$0xf]  ;;  %v7224_v41 = vld [vmem:[#allocation9 + $0x2e4] sm:$0xf0] }
 0x3ea   :  { %v5678_v45 = vor.u32 %v7137_v42, %v5675_v44  ;;  %v7223_v42 = vld [vmem:[#allocation9 + $0x2e4] sm:$0xf]  ;;  %v5894_v44 = vld [vmem:[#allocation9 + $0x2e8] sm:$0xf0] }
 0x3eb   :  { %2062 = vmatpush.bf16.msrb.mxu0 %v5710_v53  ;;  %2075 = vmatpush.bf16.msrb.mxu2 %v5774_v55  ;;  %v5670_v53 = vor.u32 %v7135_v49, %v5667_v51  ;;  %v5739_v55 = vld [vmem:[#allocation9 + $0xb8] sm:$0xf0]  ;;  %v5884_v49 = vld [vmem:[#allocation9 + $0x2d0] sm:$0xf] }
 0x3ed   :  { %2037 = vmatpush.bf16.msrb.mxu1 %v5698_v56  ;;  %2050 = vmatpush.bf16.msra.mxu3 %v5762_v57  ;;  %v5742_v56 = vor.u32 %v7153_v54, %v5739_v55  ;;  %v7133_v57 = vld [vmem:[#allocation9 + $0x14] sm:$0xf]  ;;  %v5886_v55 = vld [vmem:[#allocation9 + $0x2d8] sm:$0xf0] }
 0x3ee   :  { %v5662_v59 = vor.u32 %v7133_v57, %v5659_v58  ;;  %v7221_v54 = vld [vmem:[#allocation9 + $0x2d4] sm:$0xf]  ;;  %v7204_v58 = vld [vmem:[#allocation9 + $0x244] sm:$0xf0] }
 0x3ef   :  { %2063 = vmatpush.bf16.msrb.mxu0 %v5702_v63  ;;  %2076 = vmatpush.bf16.msrb.mxu2 %v5766_v2  ;;  %v5651_v63 = vld [vmem:[#allocation9 + $0x8] sm:$0xf0]  ;;  %v7149_v2 = vld [vmem:[#allocation9 + $0x94] sm:$0xf]  ;;  %v5889_v57 = vor.u32 %v7221_v54, %v5886_v55 }
 0x3f0   :  { %v5846_v55 = vld [vmem:[#allocation9 + $0x288] sm:$0xf0] }
 0x3f1   :  { %2038 = vmatpush.bf16.msrb.mxu1 %v5690_v3  ;;  %2051 = vmatpush.bf16.msra.mxu3 %v5754_v5  ;;  %v5654_v3 = vor.u32 %v7131_v39, %v5651_v63  ;;  %v5726_v5 = vor.u32 %v7149_v2, %v5723_v4  ;;  %v5876_v39 = vld [vmem:[#allocation9 + $0x2c0] sm:$0xf]  ;;  %v7220_v63 = vld [vmem:[#allocation9 + $0x2c4] sm:$0xf0]  ;;  %v7219_v2 = vld [vmem:[#allocation9 + $0x2c4] sm:$0xf] }
 0x3f2   :  { %v5878_v4 = vld [vmem:[#allocation9 + $0x2c8] sm:$0xf0] }
 0x3f3   :  { %2064 = vmatpush.bf16.msrb.mxu0 %v5694_v11  ;;  %2077 = vmatpush.bf16.msrb.mxu2 %v5758_v38  ;;  %v5833_v38 = vor.u32 %v7207_v35, %v5830_v37  ;;  %v5790_v35 = vld [vmem:[#allocation9 + $0x218] sm:$0xf0]  ;;  %v7214_v37 = vld [vmem:[#allocation9 + $0x294] sm:$0xf0] }
 0x3f5   :  { %2039 = vmatpush.bf16.msrb.mxu1 %v5682_v12  ;;  %2052 = vmatpush.bf16.msra.mxu3 %v5746_v15 }
 0x3f7   :  { %2065 = vmatpush.bf16.msrb.mxu0 %v5686_v32  ;;  %2078 = vmatpush.bf16.msrb.mxu2 %v5750_v30  ;;  %v5905_v32 = vor.u32 %v7225_v28, %v5902_v31  ;;  %v7205_v30 = vld [vmem:[#allocation9 + $0x254] sm:$0xf]  ;;  %v5862_v28 = vld [vmem:[#allocation9 + $0x2a8] sm:$0xf0]  ;;  %v5788_v31 = vld [vmem:[#allocation9 + $0x210] sm:$0xf] }
 0x3f8   :  { %v5825_v51 = vor.u32 %v7205_v30, %v5822_v52 }
 0x3f9   :  { %2040 = vmatpush.bf16.msrb.mxu1 %v5674_v19  ;;  %2053 = vmatpush.bf16.msra.mxu3 %v5738_v1 }
 0x3fb   :  { %2066 = vmatpush.bf16.msrb.mxu0 %v5678_v45  ;;  %2079 = vmatpush.bf16.msrb.mxu2 %v5742_v56  ;;  %v5897_v45 = vor.u32 %v7223_v42, %v5894_v44  ;;  %v5812_v56 = vld [vmem:[#allocation9 + $0x240] sm:$0xf]  ;;  %v5854_v42 = vld [vmem:[#allocation9 + $0x298] sm:$0xf0] }
 0x3fc   :  { %v5813_v61 = vor.u32 %v7204_v58, %v5812_v56 }
 0x3fd   :  { %2041 = vmatpush.bf16.msrb.mxu1 %v5666_v22  ;;  %2054 = vmatpush.bf16.msra.mxu3 %v5730_v29  ;;  %v7210_v22 = vld [vmem:[#allocation9 + $0x274] sm:$0xf0]  ;;  %v5901_v29 = vor.u32 %v7226_v27, %v5900_v26  ;;  %v7215_v26 = vld [vmem:[#allocation9 + $0x2a4] sm:$0xf] }
 0x3ff   :  { %2067 = vmatpush.bf16.msrb.mxu0 %v5670_v53  ;;  %2080 = vmatpush.bf16.msrb.mxu2 %v5734_v62 }
 0x401   :  { %2042 = vmatpush.bf16.msrb.mxu1 %v5658_v25  ;;  %2055 = vmatpush.bf16.msra.mxu3 %v5722_v43  ;;  %v5841_v25 = vor.u32 %v7209_v23, %v5838_v24  ;;  %v5893_v43 = vor.u32 %v7224_v41, %v5892_v40  ;;  %v5860_v24 = vld [vmem:[#allocation9 + $0x2a0] sm:$0xf]  ;;  %v7213_v41 = vld [vmem:[#allocation9 + $0x294] sm:$0xf] }
 0x402   :  { %v5857_v44 = vor.u32 %v7213_v41, %v5854_v42 }
 0x403   :  { %2068 = vmatpush.bf16.msrb.mxu0 %v5662_v59  ;;  %2081 = vmatpush.bf16.msrb.mxu2 %v5726_v5  ;;  %v7203_v59 = vld [vmem:[#allocation9 + $0x244] sm:$0xf]  ;;  %v5881_v5 = vor.u32 %v7219_v2, %v5878_v4 }
 0x404   :  { %v5817_v62 = vor.u32 %v7203_v59, %v5814_v60 }
 0x405   :  { %2043 = vmatpush.bf16.msrb.mxu1 %v5650_v36  ;;  %2056 = vmatpush.bf16.msra.mxu3 %v5714_v50  ;;  %v5829_v36 = vor.u32 %v7208_v34, %v5828_v33  ;;  %v7222_v50 = vld [vmem:[#allocation9 + $0x2d4] sm:$0xf0]  ;;  %v7197_v33 = vld [vmem:[#allocation9 + $0x214] sm:$0xf] }
 0x406   :  { %v5885_v53 = vor.u32 %v7222_v50, %v5884_v49  ;;  %v5785_v49 = vor.u32 %v7195_v46, %v5782_v47  ;;  %v5844_v50 = vld [vmem:[#allocation9 + $0x280] sm:$0xf] }
 0x407   :  { %2069 = vmatpush.bf16.msrb.mxu0 %v5654_v3  ;;  %2082 = vmatpush.bf16.msrb.mxu2 %v5718_v8  ;;  %v5877_v3 = vor.u32 %v7220_v63, %v5876_v39  ;;  %v7201_v8 = vld [vmem:[#allocation9 + $0x234] sm:$0xf] }
 0x445   :  { %v1547_v9 = vpop.f32.mrf.mxu1 }
 0x446   :  { %v1564_v1 = vpack.c.bf16 %v1547_v9, %v1547_v9  ;;  %v5805_v9 = vor.u32 %v7202_v7, %v5804_v6 }
 0x447   :  { %v1612_v10 = vpop.f32.mrf.mxu0 }
 0x448   :  { %v1629_v11 = vpack.c.bf16 %v1612_v10, %v1612_v10  ;;  %v5806_v10 = vld [vmem:[#allocation9 + $0x238] sm:$0xf0] }
 0x44a   :  { %1832 = vmatmul.bf16.vlgmr.msra.gmra.mxu1 %v1629_v11  ;;  %1858 = vmatmul.bf16.vlgmr.msra.gmra.mxu0 %v1629_v11  ;;  %v5868_v11 = vld [vmem:[#allocation9 + $0x2b0] sm:$0xf] }
 0x44b   :  { %2100 = vmatpush.bf16.msra.mxu1 %v8839_v0  ;;  %v1560_v12 = vpop.f32.mrf.mxu3  ;;  %v5775_v0 = vld [vmem:[%s9097_s7 + $0x4] sm:$0x3] }
 0x44c   :  { %v1565_v20 = vpack.c.bf16 %v1560_v12, %v1560_v12  ;;  %v7218_v12 = vld [vmem:[#allocation9 + $0x2b4] sm:$0xf0] }
 0x44d   :  { %v1625_v14 = vpop.f32.mrf.mxu2  ;;  %v1549_v16 = vpop.f32.mrf.mxu1 }
 0x44e   :  { %v1630_v15 = vpack.c.bf16 %v1625_v14, %v1625_v14  ;;  %v5809_v14 = vor.u32 %v7201_v8, %v5806_v10  ;;  %v7217_v16 = vld [vmem:[#allocation9 + $0x2b4] sm:$0xf] }
 0x44f   :  { %v1614_v17 = vpop.f32.mrf.mxu0 }
 0x450   :  { %1845 = vmatmul.bf16.vlgmr.msrb.gmra.mxu3 %v1630_v15  ;;  %1871 = vmatmul.bf16.vlgmr.msra.gmra.mxu2 %v1630_v15  ;;  %v5869_v15 = vor.u32 %v7218_v12, %v5868_v11  ;;  %v5870_v17 = vld [vmem:[#allocation9 + $0x2b8] sm:$0xf0] }
 0x451   :  { %2113 = vmatpush.bf16.msrb.mxu3 %v8842_v13  ;;  %v5837_v13 = vor.u32 %v7210_v22, %v5836_v21  ;;  %2327 = vmatpush.bf16.msra.mxu2 %v5901_v29  ;;  %v5865_v29 = vor.u32 %v7215_v26, %v5862_v28 }
 0x453   :  { %v1562_v18 = vpop.f32.mrf.mxu3  ;;  %2314 = vmatpush.bf16.msra.mxu0 %v5837_v13 }
 0x454   :  { %v5796_v18 = vld [vmem:[#allocation9 + $0x220] sm:$0xf] }
 0x455   :  { %v1627_v19 = vpop.f32.mrf.mxu2  ;;  %2328 = vmatpush.bf16.msra.mxu2 %v5893_v43  ;;  %v5780_v43 = vld [vmem:[#allocation9 + $0x200] sm:$0xf] }
 0x456   :  { %v5873_v19 = vor.u32 %v7217_v16, %v5870_v17 }
 0x457   :  { %2315 = vmatpush.bf16.msra.mxu0 %v5829_v36  ;;  %v5852_v36 = vld [vmem:[#allocation9 + $0x290] sm:$0xf] }
 0x458   :  { %v5853_v40 = vor.u32 %v7214_v37, %v5852_v36  ;;  %v6032_v36 = vld [vmem:[#allocation13 + $0x1f0] sm:$0xf]  ;;  %v7290_v37 = vld [vmem:[#allocation13 + $0x1f4] sm:$0xf0] }
 0x459   :  { %2329 = vmatpush.bf16.msra.mxu2 %v5885_v53  ;;  %v7211_v53 = vld [vmem:[#allocation9 + $0x284] sm:$0xf]  ;;  %v6033_v47 = vor.u32 %v7290_v37, %v6032_v36  ;;  %v6002_v36 = vld [vmem:[#allocation13 + $0x1b8] sm:$0xf0]  ;;  %v7264_v37 = vld [vmem:[#allocation13 + $0x124] sm:$0xf0] }
 0x45a   :  { %2044 = vmatmul.bf16.vlgmr.msrb.gmra.mxu1 %v1564_v1  ;;  %2070 = vmatmul.bf16.vlgmr.msrb.gmra.mxu0 %v1564_v1  ;;  %v7200_v1 = vld [vmem:[#allocation9 + $0x224] sm:$0xf0]  ;;  %v5849_v58 = vor.u32 %v7211_v53, %v5846_v55  ;;  %v7288_v53 = vld [vmem:[#allocation13 + $0x1e4] sm:$0xf0] }
 0x45b   :  { %2340 = vmatpush.bf16.msrb.mxu1 %v5841_v25  ;;  %2316 = vmatpush.bf16.msra.mxu0 %v5821_v48  ;;  %v5797_v23 = vor.u32 %v7200_v1, %v5796_v18  ;;  %v7216_v25 = vld [vmem:[#allocation9 + $0x2a4] sm:$0xf0] }
 0x45c   :  { %v5861_v27 = vor.u32 %v7216_v25, %v5860_v24  ;;  %v2453_v55 = vld [vmem:[#allocation12 + $0x4] sm:$0xf] }
 0x45d   :  { %2330 = vmatpush.bf16.msra.mxu2 %v5877_v3 }
 0x45f   :  { %2341 = vmatpush.bf16.msrb.mxu1 %v5833_v38  ;;  %2317 = vmatpush.bf16.msra.mxu0 %v5813_v61  ;;  %v5793_v38 = vor.u32 %v7197_v33, %v5790_v35  ;;  %v7274_v33 = vld [vmem:[#allocation13 + $0x174] sm:$0xf0] }
 0x460   :  { %2057 = vmatmul.bf16.vlgmr.msra.gmra.mxu3 %v1565_v20  ;;  %2083 = vmatmul.bf16.vlgmr.msrb.gmra.mxu2 %v1565_v20  ;;  %v7199_v20 = vld [vmem:[#allocation9 + $0x224] sm:$0xf] }
 0x461   :  { %2353 = vmatpush.bf16.msra.mxu3 %v5905_v32  ;;  %2331 = vmatpush.bf16.msra.mxu2 %v5869_v15  ;;  %v7198_v32 = vld [vmem:[#allocation9 + $0x214] sm:$0xf0] }
 0x462   :  { %v5789_v34 = vor.u32 %v7198_v32, %v5788_v31  ;;  %v5968_v32 = vld [vmem:[#allocation13 + $0x170] sm:$0xf] }
 0x463   :  { %2342 = vmatpush.bf16.msrb.mxu1 %v5825_v51  ;;  %2318 = vmatpush.bf16.msra.mxu0 %v5805_v9  ;;  %v7212_v51 = vld [vmem:[#allocation9 + $0x284] sm:$0xf0]  ;;  %v5969_v46 = vor.u32 %v7274_v33, %v5968_v32 }
 0x464   :  { %v5845_v54 = vor.u32 %v7212_v51, %v5844_v50  ;;  %v6024_v51 = vld [vmem:[#allocation13 + $0x1e0] sm:$0xf] }
 0x465   :  { %2354 = vmatpush.bf16.msra.mxu3 %v5897_v45  ;;  %2332 = vmatpush.bf16.msra.mxu2 %v5861_v27  ;;  %v7196_v45 = vld [vmem:[#allocation9 + $0x204] sm:$0xf0] }
 0x466   :  { %v5781_v52 = vor.u32 %v7196_v45, %v5780_v43  ;;  %v5960_v43 = vld [vmem:[#allocation13 + $0x160] sm:$0xf]  ;;  %v7273_v45 = vld [vmem:[#allocation13 + $0x174] sm:$0xf] }
 0x467   :  { %2343 = vmatpush.bf16.msrb.mxu1 %v5817_v62  ;;  %2319 = vmatpush.bf16.msra.mxu0 %v5797_v23 }
 0x469   :  { %2355 = vmatpush.bf16.msra.mxu3 %v5889_v57  ;;  %2333 = vmatpush.bf16.msra.mxu2 %v5853_v40 }
 0x46a   :  { %5776 = vmatmul.msk.bf16.vlgmr.msra.gmra.mxu1 %vm1527_vm4, %v5775_v0 }
 0x46b   :  { %2344 = vmatpush.bf16.msrb.mxu1 %v5809_v14  ;;  %2320 = vmatpush.bf16.msra.mxu0 %v5789_v34 }
 0x46d   :  { %2356 = vmatpush.bf16.msra.mxu3 %v5881_v5  ;;  %2334 = vmatpush.bf16.msra.mxu2 %v5845_v54  ;;  %v2380_v54 = vld [vmem:[#allocation12] sm:$0xf] }
 0x46f   :  { %2321 = vmatpush.bf16.msra.mxu0 %v5781_v52  ;;  %v6034_v52 = vld [vmem:[#allocation13 + $0x1f8] sm:$0xf0] }
 0x470   :  { %5777 = vmatmul.msk.bf16.vlgmr.msrb.gmra.mxu3 %vm1527_vm4, %v5775_v0  ;;  %v5798_v0 = vld [vmem:[#allocation9 + $0x228] sm:$0xf0] }
 0x471   :  { %v5801_v13 = vor.u32 %v7199_v20, %v5798_v0  ;;  %2357 = vmatpush.bf16.msra.mxu3 %v5873_v19 }
 0x473   :  { %2345 = vmatpush.bf16.msrb.mxu1 %v5801_v13 }
 0x475   :  { %2358 = vmatpush.bf16.msra.mxu3 %v5865_v29 }
 0x477   :  { %2346 = vmatpush.bf16.msrb.mxu1 %v5793_v38 }
 0x479   :  { %2359 = vmatpush.bf16.msra.mxu3 %v5857_v44  ;;  %v7272_v44 = vld [vmem:[#allocation13 + $0x164] sm:$0xf0] }
 0x47b   :  { %2347 = vmatpush.bf16.msrb.mxu1 %v5785_v49 }
 0x47d   :  { %2360 = vmatpush.bf16.msra.mxu3 %v5849_v58  ;;  %v7271_v58 = vld [vmem:[#allocation13 + $0x164] sm:$0xf] }
 0x4c7   :  { %v1833_v21 = vpop.f32.mrf.mxu1  ;;  %v1859_v22 = vpop.f32.mrf.mxu0 }
 0x4cf   :  { %v1835_v30 = vpop.f32.mrf.mxu1  ;;  %v1861_v48 = vpop.f32.mrf.mxu0 }
 0x4d0   :  { %v5970_v30 = vld [vmem:[#allocation13 + $0x178] sm:$0xf0]  ;;  %v7289_v48 = vld [vmem:[#allocation13 + $0x1f4] sm:$0xf] }
 0x4d3   :  { %v1846_v56 = vpop.f32.mrf.mxu3  ;;  %v1872_v57 = vpop.f32.mrf.mxu2 }
 0x4d4   :  { %v1847_v59 = vadd.f32 %v1846_v56, %v1833_v21  ;;  %v1873_v60 = vadd.f32 %v1872_v57, %v1859_v22  ;;  %v2368_v21 = vld [vmem:[#allocation10] sm:$0x3]  ;;  %v5973_v57 = vor.u32 %v7273_v45, %v5970_v30  ;;  %v7279_v30 = vld [vmem:[#allocation13 + $0x1a4] sm:$0xf] }
 0x4d5   :  { %v2370_v24 = vperm.slane %v2368_v21, 0  ;;  %v2371_v26 = vperm.slane %v2368_v21, 1  ;;  %v5952_v56 = vld [vmem:[#allocation13 + $0x150] sm:$0xf] }
 0x4d7   :  { %v2045_v61 = vpop.f32.mrf.mxu1  ;;  %v2071_v62 = vpop.f32.mrf.mxu0 }
 0x4d8   :  { %v2046_v39 = vadd.f32 %v2045_v61, %v1847_v59  ;;  %v2072_v63 = vadd.f32 %v2071_v62, %v1873_v60  ;;  %v6037_v59 = vor.u32 %v7289_v48, %v6034_v52  ;;  %v5961_v60 = vor.u32 %v7272_v44, %v5960_v43  ;;  %v5962_v62 = vld [vmem:[#allocation13 + $0x168] sm:$0xf0]  ;;  %v7263_v43 = vld [vmem:[#allocation13 + $0x124] sm:$0xf]  ;;  %v7262_v52 = vld [vmem:[#allocation13 + $0x114] sm:$0xf0] }
 0x4d9   :  { %v6025_v61 = vor.u32 %v7288_v53, %v6024_v51  ;;  %v5994_v48 = vld [vmem:[#allocation13 + $0x1a8] sm:$0xf0]  ;;  %v5984_v51 = vld [vmem:[#allocation13 + $0x190] sm:$0xf]  ;;  %v7278_v53 = vld [vmem:[#allocation13 + $0x194] sm:$0xf0] }
 0x4db   :  { %v1848_v2 = vpop.f32.mrf.mxu3  ;;  %v1874_v3 = vpop.f32.mrf.mxu2 }
 0x4dc   :  { %v7270_v2 = vld [vmem:[#allocation13 + $0x154] sm:$0xf0]  ;;  %v6016_v3 = vld [vmem:[#allocation13 + $0x1d0] sm:$0xf] }
 0x4df   :  { %v2047_v4 = vpop.f32.mrf.mxu1  ;;  %v2073_v5 = vpop.f32.mrf.mxu0 }
 0x4e0   :  { %v7286_v4 = vld [vmem:[#allocation13 + $0x1d4] sm:$0xf0]  ;;  %v5944_v5 = vld [vmem:[#allocation13 + $0x140] sm:$0xf] }
 0x4e3   :  { %v2058_v6 = vpop.f32.mrf.mxu3  ;;  %v2084_v7 = vpop.f32.mrf.mxu2 }
 0x4e4   :  { %v2059_v8 = vadd.f32 %v2058_v6, %v2046_v39  ;;  %v2085_v9 = vadd.f32 %v2084_v7, %v2072_v63  ;;  %v7287_v39 = vld [vmem:[#allocation13 + $0x1e4] sm:$0xf]  ;;  %v6026_v63 = vld [vmem:[#allocation13 + $0x1e8] sm:$0xf0]  ;;  %v5965_v6 = vor.u32 %v7271_v58, %v5962_v62  ;;  %v7269_v7 = vld [vmem:[#allocation13 + $0x154] sm:$0xf]  ;;  %v5997_v58 = vor.u32 %v7279_v30, %v5994_v48 }
 0x4e5   :  { %v7277_v62 = vld [vmem:[#allocation13 + $0x194] sm:$0xf]  ;;  %v7252_v30 = vld [vmem:[#allocation13 + $0xc4] sm:$0xf0] }
 0x4e7   :  { %v2102_v10 = vpop.f32.mrf.mxu1 }
 0x4e8   :  { %v2119_v11 = vpack.c.bf16 %v2102_v10, %v2102_v10  ;;  %v6017_v10 = vor.u32 %v7286_v4, %v6016_v3  ;;  %v7276_v3 = vld [vmem:[#allocation13 + $0x184] sm:$0xf0]  ;;  %v7242_v4 = vld [vmem:[#allocation13 + $0x74] sm:$0xf0] }
 0x4ea   :  { %2322 = vmatmul.bf16.vlgmr.msra.gmra.mxu0 %v2119_v11  ;;  %2348 = vmatmul.bf16.vlgmr.msrb.gmra.mxu1 %v2119_v11  ;;  %v5954_v11 = vld [vmem:[#allocation13 + $0x158] sm:$0xf0] }
 0x4eb   :  { %v2060_v12 = vpop.f32.mrf.mxu3  ;;  %v2086_v14 = vpop.f32.mrf.mxu2 }
 0x4ec   :  { %v7285_v12 = vld [vmem:[#allocation13 + $0x1d4] sm:$0xf]  ;;  %v6018_v14 = vld [vmem:[#allocation13 + $0x1d8] sm:$0xf0] }
 0x4ef   :  { %v2104_v15 = vpop.f32.mrf.mxu1 }
 0x4f0   :  { %v7268_v15 = vld [vmem:[#allocation13 + $0x144] sm:$0xf0] }
 0x4f3   :  { %v2115_v16 = vpop.f32.mrf.mxu3 }
 0x4f4   :  { %v2120_v17 = vpack.c.bf16 %v2115_v16, %v2115_v16  ;;  %v6008_v16 = vld [vmem:[#allocation13 + $0x1c0] sm:$0xf] }
 0x4f6   :  { %2335 = vmatmul.bf16.vlgmr.msra.gmra.mxu2 %v2120_v17  ;;  %2361 = vmatmul.bf16.vlgmr.msra.gmra.mxu3 %v2120_v17  ;;  %v7284_v17 = vld [vmem:[#allocation13 + $0x1c4] sm:$0xf0] }
 0x4f7   :  { %v6009_v21 = vor.u32 %v7284_v17, %v6008_v16  ;;  %v7275_v16 = vld [vmem:[#allocation13 + $0x184] sm:$0xf]  ;;  %v5978_v17 = vld [vmem:[#allocation13 + $0x188] sm:$0xf0] }
 0x4fb   :  { %v2117_v18 = vpop.f32.mrf.mxu3 }
 0x4fc   :  { %v5936_v18 = vld [vmem:[#allocation13 + $0x130] sm:$0xf] }
 0x567   :  { %v2323_v19 = vpop.f32.mrf.mxu0  ;;  %v2349_v1 = vpop.f32.mrf.mxu1 }
 0x56f   :  { %v2325_v20 = vpop.f32.mrf.mxu0  ;;  %v2351_v0 = vpop.f32.mrf.mxu1 }
 0x570   :  { %v6021_v20 = vor.u32 %v7285_v12, %v6018_v14  ;;  %v5945_v0 = vor.u32 %v7268_v15, %v5944_v5  ;;  %v6160_v5 = vld [vmem:[#allocation13 + $0xf0] sm:$0xf]  ;;  %v6088_v12 = vld [vmem:[#allocation13 + $0x60] sm:$0xf]  ;;  %v7241_v15 = vld [vmem:[#allocation13 + $0x74] sm:$0xf] }
 0x579   :  { %v2336_v22 = vpop.f32.mrf.mxu2  ;;  %v2362_v23 = vpop.f32.mrf.mxu3 }
 0x57a   :  { %v2337_v13 = vadd.f32 %v2336_v22, %v2323_v19  ;;  %v2363_v25 = vadd.f32 %v2362_v23, %v2349_v1  ;;  %v5957_v19 = vor.u32 %v7269_v7, %v5954_v11  ;;  %v7267_v1 = vld [vmem:[#allocation13 + $0x144] sm:$0xf]  ;;  %v5946_v22 = vld [vmem:[#allocation13 + $0x148] sm:$0xf0] }
 0x57b   :  { %v7283_v23 = vld [vmem:[#allocation13 + $0x1c4] sm:$0xf] }
 0x57c   :  { %v2366_v27 = vadd.f32 %v2337_v13, %v2059_v8  ;;  %v2367_v28 = vadd.f32 %v2363_v25, %v2085_v9  ;;  %v6029_v8 = vor.u32 %v7287_v39, %v6026_v63  ;;  %v5953_v9 = vor.u32 %v7270_v2, %v5952_v56  ;;  %v6010_v13 = vld [vmem:[#allocation13 + $0x1c8] sm:$0xf0]  ;;  %v6000_v25 = vld [vmem:[#allocation13 + $0x1b0] sm:$0xf]  ;;  %v5986_v39 = vld [vmem:[#allocation13 + $0x198] sm:$0xf0] }
 0x57d   :  { %v6096_v63 = vld [vmem:[#allocation13 + $0x70] sm:$0xf]  ;;  %v5976_v2 = vld [vmem:[#allocation13 + $0x180] sm:$0xf] }
 0x57e   :  { %v2374_v29 = vadd.f32 %v2370_v24, %v2366_v27  ;;  %v2375_v31 = vadd.f32 %v2371_v26, %v2367_v28  ;;  %v7266_v24 = vld [vmem:[#allocation13 + $0x134] sm:$0xf0]  ;;  %v5928_v27 = vld [vmem:[#allocation13 + $0x120] sm:$0xf]  ;;  %v5949_v28 = vor.u32 %v7267_v1, %v5946_v22  ;;  %v5977_v14 = vor.u32 %v7276_v3, %v5976_v2  ;;  %v6098_v1 = vld [vmem:[#allocation13 + $0x78] sm:$0xf0] }
 0x57f   :  { %v7282_v26 = vld [vmem:[#allocation13 + $0x1b4] sm:$0xf0]  ;;  %v5937_v32 = vor.u32 %v7266_v24, %v5936_v18  ;;  %v5929_v45 = vor.u32 %v7264_v37, %v5928_v27  ;;  %v6097_v18 = vor.u32 %v7242_v4, %v6096_v63  ;;  %v6152_v22 = vld [vmem:[#allocation13 + $0xe0] sm:$0xf]  ;;  %v5981_v24 = vor.u32 %v7275_v16, %v5978_v17  ;;  %v7239_v27 = vld [vmem:[#allocation13 + $0x64] sm:$0xf] }
 0x580   :  { %v2376_v34 = vmax.f32 %v2374_v29, 0.0  ;;  %v2377_v35 = vmax.f32 %v2375_v31, 0.0  ;;  %v7265_v29 = vld [vmem:[#allocation13 + $0x134] sm:$0xf]  ;;  %v6013_v31 = vor.u32 %v7283_v23, %v6010_v13  ;;  %v6001_v33 = vor.u32 %v7282_v26, %v6000_v25  ;;  %v7256_v23 = vld [vmem:[#allocation13 + $0xe4] sm:$0xf0] }
 0x581   :  { %v2338_v38 = vpop.f32.mrf.mxu2  ;;  %v2364_v40 = vpop.f32.mrf.mxu3  ;;  %v6080_v25 = vld [vmem:[#allocation13 + $0x50] sm:$0xf]  ;;  %v6101_v26 = vor.u32 %v7241_v15, %v6098_v1  ;;  %v7254_v37 = vld [vmem:[#allocation13 + $0xd4] sm:$0xf0]  ;;  %v6120_v2 = vld [vmem:[#allocation13 + $0xa0] sm:$0xf] }
 0x582   :  { %v2378_v41 = vpack.c.bf16 %v2376_v34, %v2376_v34  ;;  %v2379_v42 = vpack.c.bf16 %v2377_v35, %v2377_v35  ;;  %v5938_v34 = vld [vmem:[#allocation13 + $0x138] sm:$0xf0]  ;;  %v7281_v35 = vld [vmem:[#allocation13 + $0x1b4] sm:$0xf]  ;;  %v5992_v38 = vld [vmem:[#allocation13 + $0x1a0] sm:$0xf] }
 0x583   :  { %v7280_v40 = vld [vmem:[#allocation13 + $0x1a4] sm:$0xf0]  ;;  %v6005_v44 = vor.u32 %v7281_v35, %v6002_v36  ;;  %v7238_v35 = vld [vmem:[#allocation13 + $0x54] sm:$0xf0]  ;;  %v6144_v36 = vld [vmem:[#allocation13 + $0xd0] sm:$0xf] }
 0x584   :  { %v8865_v49 = vsel %vm2385_vm5, %v2378_v41, 0  ;;  %v8867_v50 = vsel %vm2385_vm5, %v2379_v42, 0  ;;  %v5920_v41 = vld [vmem:[#allocation13 + $0x110] sm:$0xf]  ;;  %v5941_v42 = vor.u32 %v7265_v29, %v5938_v34  ;;  %v6154_v34 = vld [vmem:[#allocation13 + $0xe8] sm:$0xf0] }
 0x585   :  { %2399 = vmatpush.bf16.msrb.mxu0 %v8865_v49  ;;  %2412 = vmatpush.bf16.msrb.mxu2 %v8867_v50  ;;  %v7248_v3 = vld [vmem:[#allocation13 + $0xa4] sm:$0xf0]  ;;  %v7235_v4 = vld [vmem:[#allocation13 + $0x44] sm:$0xf]  ;;  %v6112_v15 = vld [vmem:[#allocation13 + $0x90] sm:$0xf] }
 0x586   :  { %2464 = vmatpush.bf16.msra.mxu1 %v8865_v49  ;;  %2477 = vmatpush.bf16.msrb.mxu3 %v8867_v50  ;;  %v7246_v16 = vld [vmem:[#allocation13 + $0x94] sm:$0xf0]  ;;  %v7233_v17 = vld [vmem:[#allocation13 + $0x34] sm:$0xf] }
 0x588   :  { %5907 = vmatmul.msk.bf16.vlgmr.msrb.gmra.mxu2 %vm2381_vm6, %v2380_v54  ;;  %5906 = vmatmul.msk.bf16.vlgmr.msrb.gmra.mxu0 %vm2381_vm6, %v2380_v54  ;;  %v5912_v54 = vld [vmem:[#allocation13 + $0x100] sm:$0xf] }
 0x589   :  { %2678 = vmatpush.bf16.msra.mxu0 %v5969_v46  ;;  %2691 = vmatpush.bf16.msra.mxu2 %v6033_v47  ;;  %v5993_v46 = vor.u32 %v7280_v40, %v5992_v38  ;;  %v5930_v47 = vld [vmem:[#allocation13 + $0x128] sm:$0xf0] }
 0x58a   :  { %5908 = vmatmul.msk.bf16.vlgmr.msra.gmra.mxu1 %vm2381_vm6, %v2453_v55  ;;  %5909 = vmatmul.msk.bf16.vlgmr.msrb.gmra.mxu3 %vm2381_vm6, %v2453_v55  ;;  %v7260_v55 = vld [vmem:[#allocation13 + $0x104] sm:$0xf0]  ;;  %v5933_v56 = vor.u32 %v7263_v43, %v5930_v47  ;;  %v6145_v43 = vor.u32 %v7254_v37, %v6144_v36  ;;  %v6136_v47 = vld [vmem:[#allocation13 + $0xc0] sm:$0xf]  ;;  %v7227_v37 = vld [vmem:[#allocation13 + $0x4] sm:$0xf] }
 0x58b   :  { %2704 = vmatpush.bf16.msrb.mxu1 %v5973_v57  ;;  %2717 = vmatpush.bf16.msra.mxu3 %v6037_v59  ;;  %v7261_v57 = vld [vmem:[#allocation13 + $0x114] sm:$0xf]  ;;  %v5921_v59 = vor.u32 %v7262_v52, %v5920_v41  ;;  %v5913_v11 = vor.u32 %v7260_v55, %v5912_v54  ;;  %v6081_v41 = vor.u32 %v7238_v35, %v6080_v25  ;;  %v7234_v54 = vld [vmem:[#allocation13 + $0x34] sm:$0xf0]  ;;  %v6128_v55 = vld [vmem:[#allocation13 + $0xb0] sm:$0xf] }
 0x58c   :  { %v6058_v25 = vld [vmem:[#allocation13 + $0x28] sm:$0xf0] }
 0x58d   :  { %2679 = vmatpush.bf16.msra.mxu0 %v5961_v60  ;;  %2692 = vmatpush.bf16.msra.mxu2 %v6025_v61  ;;  %v5985_v60 = vor.u32 %v7278_v53, %v5984_v51  ;;  %v5922_v61 = vld [vmem:[#allocation13 + $0x118] sm:$0xf0]  ;;  %v6064_v51 = vld [vmem:[#allocation13 + $0x30] sm:$0xf]  ;;  %v6137_v53 = vor.u32 %v7252_v30, %v6136_v47  ;;  %v6122_v35 = vld [vmem:[#allocation13 + $0xa8] sm:$0xf0] }
 0x58e   :  { %v5925_v7 = vor.u32 %v7261_v57, %v5922_v61  ;;  %v6065_v57 = vor.u32 %v7234_v54, %v6064_v51 }
 0x58f   :  { %2705 = vmatpush.bf16.msrb.mxu1 %v5965_v6  ;;  %2718 = vmatpush.bf16.msra.mxu3 %v6029_v8  ;;  %v7258_v6 = vld [vmem:[#allocation13 + $0xf4] sm:$0xf0]  ;;  %v7259_v8 = vld [vmem:[#allocation13 + $0x104] sm:$0xf] }
 0x591   :  { %2680 = vmatpush.bf16.msra.mxu0 %v5953_v9  ;;  %2693 = vmatpush.bf16.msra.mxu2 %v6017_v10  ;;  %v5914_v9 = vld [vmem:[#allocation13 + $0x108] sm:$0xf0]  ;;  %v5989_v10 = vor.u32 %v7277_v62, %v5986_v39  ;;  %v6048_v62 = vld [vmem:[#allocation13 + $0x10] sm:$0xf]  ;;  %v7230_v39 = vld [vmem:[#allocation13 + $0x14] sm:$0xf0] }
 0x592   :  { %v5917_v13 = vor.u32 %v7259_v8, %v5914_v9  ;;  %v6049_v63 = vor.u32 %v7230_v39, %v6048_v62  ;;  %v6040_v8 = vld [vmem:[#allocation13] sm:$0xf]  ;;  %v7228_v9 = vld [vmem:[#allocation13 + $0x4] sm:$0xf0]  ;;  %v7305_v62 = vld [vmem:[#allocation13 + $0x274] sm:$0xf] }
 0x593   :  { %2706 = vmatpush.bf16.msrb.mxu1 %v5957_v19  ;;  %2719 = vmatpush.bf16.msra.mxu3 %v6021_v20  ;;  %v6161_v19 = vor.u32 %v7258_v6, %v6160_v5  ;;  %v7257_v20 = vld [vmem:[#allocation13 + $0xf4] sm:$0xf]  ;;  %v6121_v5 = vor.u32 %v7248_v3, %v6120_v2  ;;  %v6074_v6 = vld [vmem:[#allocation13 + $0x48] sm:$0xf0]  ;;  %v7322_v3 = vld [vmem:[#allocation13 + $0x2f4] sm:$0xf0] }
 0x595   :  { %2681 = vmatpush.bf16.msra.mxu0 %v5945_v0  ;;  %2694 = vmatpush.bf16.msra.mxu2 %v6009_v21  ;;  %v6162_v0 = vld [vmem:[#allocation13 + $0xf8] sm:$0xf0]  ;;  %v7240_v21 = vld [vmem:[#allocation13 + $0x64] sm:$0xf0] }
 0x596   :  { %v6089_v29 = vor.u32 %v7240_v21, %v6088_v12  ;;  %v6146_v12 = vld [vmem:[#allocation13 + $0xd8] sm:$0xf0] }
 0x597   :  { %2707 = vmatpush.bf16.msrb.mxu1 %v5949_v28  ;;  %2720 = vmatpush.bf16.msra.mxu3 %v6013_v31  ;;  %v6165_v28 = vor.u32 %v7257_v20, %v6162_v0  ;;  %v6153_v31 = vor.u32 %v7256_v23, %v6152_v22  ;;  %v7251_v20 = vld [vmem:[#allocation13 + $0xc4] sm:$0xf]  ;;  %v6138_v0 = vld [vmem:[#allocation13 + $0xc8] sm:$0xf0]  ;;  %v6104_v22 = vld [vmem:[#allocation13 + $0x80] sm:$0xf] }
 0x598   :  { %v6141_v21 = vor.u32 %v7251_v20, %v6138_v0  ;;  %v7244_v23 = vld [vmem:[#allocation13 + $0x84] sm:$0xf0]  ;;  %v6210_v20 = vld [vmem:[#allocation13 + $0x250] sm:$0xf]  ;;  %v7302_v0 = vld [vmem:[#allocation13 + $0x254] sm:$0xf0] }
 0x599   :  { %2682 = vmatpush.bf16.msra.mxu0 %v5937_v32  ;;  %2695 = vmatpush.bf16.msra.mxu2 %v6001_v33  ;;  %v6090_v32 = vld [vmem:[#allocation13 + $0x68] sm:$0xf0]  ;;  %v7255_v33 = vld [vmem:[#allocation13 + $0xe4] sm:$0xf] }
 0x59a   :  { %v6093_v38 = vor.u32 %v7239_v27, %v6090_v32  ;;  %v6157_v40 = vor.u32 %v7255_v33, %v6154_v34  ;;  %v7249_v27 = vld [vmem:[#allocation13 + $0xb4] sm:$0xf]  ;;  %v6050_v32 = vld [vmem:[#allocation13 + $0x18] sm:$0xf0]  ;;  %v7247_v34 = vld [vmem:[#allocation13 + $0xa4] sm:$0xf] }
 0x59b   :  { %2708 = vmatpush.bf16.msrb.mxu1 %v5941_v42  ;;  %2721 = vmatpush.bf16.msra.mxu3 %v6005_v44  ;;  %v6072_v42 = vld [vmem:[#allocation13 + $0x40] sm:$0xf]  ;;  %v7237_v44 = vld [vmem:[#allocation13 + $0x54] sm:$0xf]  ;;  %v6125_v36 = vor.u32 %v7247_v34, %v6122_v35  ;;  %v6204_v34 = vld [vmem:[#allocation13 + $0x248] sm:$0xf0] }
 0x59d   :  { %2683 = vmatpush.bf16.msra.mxu0 %v5929_v45  ;;  %2696 = vmatpush.bf16.msra.mxu2 %v5993_v46  ;;  %v6082_v45 = vld [vmem:[#allocation13 + $0x58] sm:$0xf0]  ;;  %v7236_v46 = vld [vmem:[#allocation13 + $0x44] sm:$0xf0] }
 0x59e   :  { %v6085_v48 = vor.u32 %v7237_v44, %v6082_v45  ;;  %v6073_v52 = vor.u32 %v7236_v46, %v6072_v42  ;;  %v6114_v42 = vld [vmem:[#allocation13 + $0x98] sm:$0xf0]  ;;  %v7243_v44 = vld [vmem:[#allocation13 + $0x84] sm:$0xf]  ;;  %v6106_v45 = vld [vmem:[#allocation13 + $0x88] sm:$0xf0] }
 0x59f   :  { %2709 = vmatpush.bf16.msrb.mxu1 %v5933_v56  ;;  %2722 = vmatpush.bf16.msra.mxu3 %v5997_v58  ;;  %v7250_v56 = vld [vmem:[#allocation13 + $0xb4] sm:$0xf0]  ;;  %v6109_v46 = vor.u32 %v7243_v44, %v6106_v45  ;;  %v6194_v44 = vld [vmem:[#allocation13 + $0x230] sm:$0xf] }
 0x5a0   :  { %v6129_v58 = vor.u32 %v7250_v56, %v6128_v55  ;;  %v7298_v45 = vld [vmem:[#allocation13 + $0x234] sm:$0xf0] }
 0x5a1   :  { %2684 = vmatpush.bf16.msra.mxu0 %v5921_v59  ;;  %2697 = vmatpush.bf16.msra.mxu2 %v5985_v60  ;;  %v6056_v59 = vld [vmem:[#allocation13 + $0x20] sm:$0xf]  ;;  %v7232_v60 = vld [vmem:[#allocation13 + $0x24] sm:$0xf0] }
 0x5a2   :  { %v6057_v61 = vor.u32 %v7232_v60, %v6056_v59  ;;  %v2943_v60 = vld [vmem:[#allocation12 + $0x8] sm:$0xf] }
 0x5a3   :  { %2710 = vmatpush.bf16.msrb.mxu1 %v5925_v7  ;;  %2723 = vmatpush.bf16.msra.mxu3 %v5989_v10  ;;  %v6077_v7 = vor.u32 %v7235_v4, %v6074_v6  ;;  %v7253_v10 = vld [vmem:[#allocation13 + $0xd4] sm:$0xf]  ;;  %v6292_v6 = vld [vmem:[#allocation13 + $0x2f8] sm:$0xf0] }
 0x5a4   :  { %v7321_v4 = vld [vmem:[#allocation13 + $0x2f4] sm:$0xf] }
 0x5a5   :  { %2685 = vmatpush.bf16.msra.mxu0 %v5913_v11  ;;  %2698 = vmatpush.bf16.msra.mxu2 %v5977_v14  ;;  %v6041_v11 = vor.u32 %v7228_v9, %v6040_v8  ;;  %v6149_v14 = vor.u32 %v7253_v10, %v6146_v12  ;;  %v6218_v8 = vld [vmem:[#allocation13 + $0x260] sm:$0xf]  ;;  %v7304_v9 = vld [vmem:[#allocation13 + $0x264] sm:$0xf0]  ;;  %v7303_v10 = vld [vmem:[#allocation13 + $0x264] sm:$0xf] }
 0x5a6   :  { %v6220_v12 = vld [vmem:[#allocation13 + $0x268] sm:$0xf0] }
 0x5a7   :  { %2711 = vmatpush.bf16.msrb.mxu1 %v5917_v13  ;;  %2724 = vmatpush.bf16.msra.mxu3 %v5981_v24  ;;  %v7231_v13 = vld [vmem:[#allocation13 + $0x24] sm:$0xf]  ;;  %v6105_v24 = vor.u32 %v7244_v23, %v6104_v22  ;;  %v6211_v22 = vor.u32 %v7302_v0, %v6210_v20  ;;  %v6212_v23 = vld [vmem:[#allocation13 + $0x258] sm:$0xf0]  ;;  %v6172_v0 = vld [vmem:[#allocation13 + $0x208] sm:$0xf0] }
 0x5a8   :  { %v7291_v20 = vld [vmem:[#allocation13 + $0x204] sm:$0xf] }
 0x5a9   :  { %2890 = vmatpush.bf16.msrb.mxu0 %v6097_v18  ;;  %2903 = vmatpush.bf16.msrb.mxu2 %v6161_v19  ;;  %v6113_v18 = vor.u32 %v7246_v16, %v6112_v15  ;;  %v6066_v19 = vld [vmem:[#allocation13 + $0x38] sm:$0xf0]  ;;  %v6282_v15 = vld [vmem:[#allocation13 + $0x2e0] sm:$0xf]  ;;  %v7320_v16 = vld [vmem:[#allocation13 + $0x2e4] sm:$0xf0] }
 0x5aa   :  { %v6069_v1 = vor.u32 %v7233_v17, %v6066_v19  ;;  %v7319_v17 = vld [vmem:[#allocation13 + $0x2e4] sm:$0xf]  ;;  %v6284_v19 = vld [vmem:[#allocation13 + $0x2e8] sm:$0xf0] }
 0x5ab   :  { %2916 = vmatpush.bf16.msra.mxu1 %v6101_v26  ;;  %2929 = vmatpush.bf16.msrb.mxu3 %v6165_v28  ;;  %v6061_v26 = vor.u32 %v7231_v13, %v6058_v25  ;;  %v6130_v28 = vld [vmem:[#allocation13 + $0xb8] sm:$0xf0]  ;;  %v6274_v13 = vld [vmem:[#allocation13 + $0x2d0] sm:$0xf] }
 0x5ad   :  { %2891 = vmatpush.bf16.msrb.mxu0 %v6089_v29  ;;  %2904 = vmatpush.bf16.msrb.mxu2 %v6153_v31  ;;  %v6133_v29 = vor.u32 %v7249_v27, %v6130_v28  ;;  %v7229_v31 = vld [vmem:[#allocation13 + $0x14] sm:$0xf]  ;;  %v6276_v28 = vld [vmem:[#allocation13 + $0x2d8] sm:$0xf0] }
 0x5ae   :  { %v6053_v33 = vor.u32 %v7229_v31, %v6050_v32  ;;  %v7317_v27 = vld [vmem:[#allocation13 + $0x2d4] sm:$0xf]  ;;  %v7300_v32 = vld [vmem:[#allocation13 + $0x244] sm:$0xf0] }
 0x5af   :  { %2917 = vmatpush.bf16.msra.mxu1 %v6093_v38  ;;  %2930 = vmatpush.bf16.msrb.mxu3 %v6157_v40  ;;  %v6042_v38 = vld [vmem:[#allocation13 + $0x8] sm:$0xf0]  ;;  %v7245_v40 = vld [vmem:[#allocation13 + $0x94] sm:$0xf]  ;;  %v6279_v31 = vor.u32 %v7317_v27, %v6276_v28 }
 0x5b0   :  { %v6236_v28 = vld [vmem:[#allocation13 + $0x288] sm:$0xf0] }
 0x5b1   :  { %2892 = vmatpush.bf16.msrb.mxu0 %v6081_v41  ;;  %2905 = vmatpush.bf16.msrb.mxu2 %v6145_v43  ;;  %v6045_v41 = vor.u32 %v7227_v37, %v6042_v38  ;;  %v6117_v43 = vor.u32 %v7245_v40, %v6114_v42  ;;  %v6266_v37 = vld [vmem:[#allocation13 + $0x2c0] sm:$0xf]  ;;  %v7316_v38 = vld [vmem:[#allocation13 + $0x2c4] sm:$0xf0]  ;;  %v7315_v40 = vld [vmem:[#allocation13 + $0x2c4] sm:$0xf] }
 0x5b2   :  { %v6268_v42 = vld [vmem:[#allocation13 + $0x2c8] sm:$0xf0] }
 0x5b3   :  { %2918 = vmatpush.bf16.msra.mxu1 %v6085_v48  ;;  %2931 = vmatpush.bf16.msrb.mxu3 %v6149_v14  ;;  %v6223_v14 = vor.u32 %v7303_v10, %v6220_v12  ;;  %v6180_v10 = vld [vmem:[#allocation13 + $0x218] sm:$0xf0]  ;;  %v7310_v12 = vld [vmem:[#allocation13 + $0x294] sm:$0xf0] }
 0x5b5   :  { %2893 = vmatpush.bf16.msrb.mxu0 %v6073_v52  ;;  %2906 = vmatpush.bf16.msrb.mxu2 %v6137_v53 }
 0x5b7   :  { %2919 = vmatpush.bf16.msra.mxu1 %v6077_v7  ;;  %2932 = vmatpush.bf16.msrb.mxu3 %v6141_v21  ;;  %v6295_v7 = vor.u32 %v7321_v4, %v6292_v6  ;;  %v7301_v21 = vld [vmem:[#allocation13 + $0x254] sm:$0xf]  ;;  %v6252_v4 = vld [vmem:[#allocation13 + $0x2a8] sm:$0xf0]  ;;  %v6178_v6 = vld [vmem:[#allocation13 + $0x210] sm:$0xf] }
 0x5b8   :  { %v6215_v25 = vor.u32 %v7301_v21, %v6212_v23 }
 0x5b9   :  { %2894 = vmatpush.bf16.msrb.mxu0 %v6065_v57  ;;  %2907 = vmatpush.bf16.msrb.mxu2 %v6129_v58 }
 0x5bb   :  { %2920 = vmatpush.bf16.msra.mxu1 %v6069_v1  ;;  %2933 = vmatpush.bf16.msrb.mxu3 %v6133_v29  ;;  %v6287_v1 = vor.u32 %v7319_v17, %v6284_v19  ;;  %v6202_v29 = vld [vmem:[#allocation13 + $0x240] sm:$0xf]  ;;  %v6244_v17 = vld [vmem:[#allocation13 + $0x298] sm:$0xf0] }
 0x5bc   :  { %v6203_v35 = vor.u32 %v7300_v32, %v6202_v29 }
 0x5bd   :  { %2895 = vmatpush.bf16.msrb.mxu0 %v6057_v61  ;;  %2908 = vmatpush.bf16.msrb.mxu2 %v6121_v5  ;;  %v7306_v61 = vld [vmem:[#allocation13 + $0x274] sm:$0xf0] }
 0x5bf   :  { %2921 = vmatpush.bf16.msra.mxu1 %v6061_v26  ;;  %2934 = vmatpush.bf16.msrb.mxu3 %v6125_v36 }
 0x5c1   :  { %2896 = vmatpush.bf16.msrb.mxu0 %v6049_v63  ;;  %2909 = vmatpush.bf16.msrb.mxu2 %v6113_v18  ;;  %v6228_v63 = vld [vmem:[#allocation13 + $0x278] sm:$0xf0]  ;;  %v6283_v18 = vor.u32 %v7320_v16, %v6282_v15  ;;  %v7309_v16 = vld [vmem:[#allocation13 + $0x294] sm:$0xf] }
 0x5c2   :  { %v6231_v2 = vor.u32 %v7305_v62, %v6228_v63  ;;  %v6250_v63 = vld [vmem:[#allocation13 + $0x2a0] sm:$0xf]  ;;  %v6247_v19 = vor.u32 %v7309_v16, %v6244_v17 }
 0x5c3   :  { %2922 = vmatpush.bf16.msra.mxu1 %v6053_v33  ;;  %2935 = vmatpush.bf16.msrb.mxu3 %v6117_v43  ;;  %v7299_v33 = vld [vmem:[#allocation13 + $0x244] sm:$0xf]  ;;  %v6271_v43 = vor.u32 %v7315_v40, %v6268_v42 }
 0x5c4   :  { %v6207_v36 = vor.u32 %v7299_v33, %v6204_v34 }
 0x5c5   :  { %2897 = vmatpush.bf16.msrb.mxu0 %v6041_v11  ;;  %2910 = vmatpush.bf16.msrb.mxu2 %v6105_v24  ;;  %v6219_v11 = vor.u32 %v7304_v9, %v6218_v8  ;;  %v7318_v24 = vld [vmem:[#allocation13 + $0x2d4] sm:$0xf0]  ;;  %v7293_v8 = vld [vmem:[#allocation13 + $0x214] sm:$0xf] }
 0x5c6   :  { %v6275_v26 = vor.u32 %v7318_v24, %v6274_v13  ;;  %v6175_v13 = vor.u32 %v7291_v20, %v6172_v0  ;;  %v6234_v24 = vld [vmem:[#allocation13 + $0x280] sm:$0xf]  ;;  %v7371_v20 = vld [vmem:[#allocation16 + $0x174] sm:$0xf] }
 0x5c7   :  { %2923 = vmatpush.bf16.msra.mxu1 %v6045_v41  ;;  %2936 = vmatpush.bf16.msrb.mxu3 %v6109_v46  ;;  %v6267_v41 = vor.u32 %v7316_v38, %v6266_v37  ;;  %v7297_v46 = vld [vmem:[#allocation13 + $0x234] sm:$0xf] }
 0x605   :  { %v2401_v47 = vpop.f32.mrf.mxu0 }
 0x606   :  { %v2418_v58 = vpack.c.bf16 %v2401_v47, %v2401_v47  ;;  %v6195_v47 = vor.u32 %v7298_v45, %v6194_v44 }
 0x607   :  { %v2466_v30 = vpop.f32.mrf.mxu1 }
 0x608   :  { %v2483_v48 = vpack.c.bf16 %v2466_v30, %v2466_v30  ;;  %v6196_v30 = vld [vmem:[#allocation13 + $0x238] sm:$0xf0] }
 0x60a   :  { %2686 = vmatmul.bf16.vlgmr.msra.gmra.mxu0 %v2483_v48  ;;  %2712 = vmatmul.bf16.vlgmr.msrb.gmra.mxu1 %v2483_v48  ;;  %v6258_v48 = vld [vmem:[#allocation13 + $0x2b0] sm:$0xf] }
 0x60b   :  { %2954 = vmatpush.bf16.msra.mxu0 %v8865_v49  ;;  %v2414_v52 = vpop.f32.mrf.mxu2  ;;  %v6226_v49 = vld [vmem:[#allocation13 + $0x270] sm:$0xf] }
 0x60c   :  { %v2419_v59 = vpack.c.bf16 %v2414_v52, %v2414_v52  ;;  %v6227_v39 = vor.u32 %v7306_v61, %v6226_v49  ;;  %v7314_v52 = vld [vmem:[#allocation13 + $0x2b4] sm:$0xf0] }
 0x60d   :  { %v2479_v51 = vpop.f32.mrf.mxu3  ;;  %v2403_v54 = vpop.f32.mrf.mxu0 }
 0x60e   :  { %v2484_v53 = vpack.c.bf16 %v2479_v51, %v2479_v51  ;;  %3168 = vmatpush.bf16.msrb.mxu1 %v6227_v39  ;;  %v6199_v51 = vor.u32 %v7297_v46, %v6196_v30  ;;  %v7313_v54 = vld [vmem:[#allocation13 + $0x2b4] sm:$0xf] }
 0x60f   :  { %v2468_v55 = vpop.f32.mrf.mxu1 }
 0x610   :  { %2699 = vmatmul.bf16.vlgmr.msra.gmra.mxu2 %v2484_v53  ;;  %2725 = vmatmul.bf16.vlgmr.msra.gmra.mxu3 %v2484_v53  ;;  %v6259_v53 = vor.u32 %v7314_v52, %v6258_v48  ;;  %v6260_v55 = vld [vmem:[#allocation13 + $0x2b8] sm:$0xf0] }
 0x611   :  { %2967 = vmatpush.bf16.msra.mxu2 %v8867_v50  ;;  %v6290_v50 = vld [vmem:[#allocation13 + $0x2f0] sm:$0xf] }
 0x612   :  { %v6291_v5 = vor.u32 %v7322_v3, %v6290_v50  ;;  %3169 = vmatpush.bf16.msrb.mxu1 %v6219_v11  ;;  %v7311_v50 = vld [vmem:[#allocation13 + $0x2a4] sm:$0xf]  ;;  %v6242_v11 = vld [vmem:[#allocation13 + $0x290] sm:$0xf] }
 0x613   :  { %v2416_v56 = vpop.f32.mrf.mxu2  ;;  %v6243_v15 = vor.u32 %v7310_v12, %v6242_v11  ;;  %v6432_v11 = vld [vmem:[#allocation16 + $0x1f0] sm:$0xf]  ;;  %v7388_v12 = vld [vmem:[#allocation16 + $0x1f4] sm:$0xf0] }
 0x614   :  { %3181 = vmatpush.bf16.msra.mxu3 %v6291_v5  ;;  %v6186_v56 = vld [vmem:[#allocation13 + $0x220] sm:$0xf]  ;;  %v6255_v5 = vor.u32 %v7311_v50, %v6252_v4 }
 0x615   :  { %v2481_v57 = vpop.f32.mrf.mxu3 }
 0x616   :  { %3170 = vmatpush.bf16.msrb.mxu1 %v6211_v22  ;;  %v6263_v57 = vor.u32 %v7313_v54, %v6260_v55 }
 0x618   :  { %3182 = vmatpush.bf16.msra.mxu3 %v6283_v18  ;;  %v6170_v18 = vld [vmem:[#allocation13 + $0x200] sm:$0xf] }
 0x61a   :  { %2898 = vmatmul.bf16.vlgmr.msrb.gmra.mxu0 %v2418_v58  ;;  %2924 = vmatmul.bf16.vlgmr.msra.gmra.mxu1 %v2418_v58  ;;  %v7296_v58 = vld [vmem:[#allocation13 + $0x224] sm:$0xf0] }
 0x61b   :  { %3194 = vmatpush.bf16.msrb.mxu0 %v6231_v2  ;;  %3171 = vmatpush.bf16.msrb.mxu1 %v6203_v35  ;;  %v6187_v62 = vor.u32 %v7296_v58, %v6186_v56  ;;  %v7312_v2 = vld [vmem:[#allocation13 + $0x2a4] sm:$0xf0] }
 0x61c   :  { %3183 = vmatpush.bf16.msra.mxu3 %v6275_v26  ;;  %v6251_v3 = vor.u32 %v7312_v2, %v6250_v63  ;;  %v7307_v26 = vld [vmem:[#allocation13 + $0x284] sm:$0xf] }
 0x61d   :  { %v6239_v32 = vor.u32 %v7307_v26, %v6236_v28  ;;  %v6424_v26 = vld [vmem:[#allocation16 + $0x1e0] sm:$0xf]  ;;  %v7356_v28 = vld [vmem:[%s9103_s13 + $0x8] sm:$0xff] }
 0x61f   :  { %3195 = vmatpush.bf16.msrb.mxu0 %v6223_v14  ;;  %3172 = vmatpush.bf16.msrb.mxu1 %v6195_v47  ;;  %v6183_v14 = vor.u32 %v7293_v8, %v6180_v10  ;;  %v7372_v8 = vld [vmem:[#allocation16 + $0x174] sm:$0xf0] }
 0x620   :  { %2911 = vmatmul.bf16.vlgmr.msrb.gmra.mxu2 %v2419_v59  ;;  %2937 = vmatmul.bf16.vlgmr.msrb.gmra.mxu3 %v2419_v59  ;;  %v7295_v59 = vld [vmem:[#allocation13 + $0x224] sm:$0xf] }
 0x621   :  { %3207 = vmatpush.bf16.msrb.mxu2 %v6295_v7  ;;  %3184 = vmatpush.bf16.msra.mxu3 %v6267_v41  ;;  %v7294_v7 = vld [vmem:[#allocation13 + $0x214] sm:$0xf0] }
 0x622   :  { %v6179_v9 = vor.u32 %v7294_v7, %v6178_v6  ;;  %v6368_v7 = vld [vmem:[#allocation16 + $0x170] sm:$0xf] }
 0x623   :  { %3196 = vmatpush.bf16.msrb.mxu0 %v6215_v25  ;;  %3173 = vmatpush.bf16.msrb.mxu1 %v6187_v62  ;;  %v7308_v25 = vld [vmem:[#allocation13 + $0x284] sm:$0xf0]  ;;  %v6369_v0 = vor.u32 %v7372_v8, %v6368_v7 }
 0x624   :  { %v6235_v27 = vor.u32 %v7308_v25, %v6234_v24 }
 0x625   :  { %3208 = vmatpush.bf16.msrb.mxu2 %v6287_v1  ;;  %3185 = vmatpush.bf16.msra.mxu3 %v6259_v53  ;;  %v7292_v1 = vld [vmem:[#allocation13 + $0x204] sm:$0xf0] }
 0x626   :  { %v6171_v23 = vor.u32 %v7292_v1, %v6170_v18  ;;  %v7323_v18 = vld [vmem:[%s9103_s13] sm:$0xff] }
 0x627   :  { %3197 = vmatpush.bf16.msrb.mxu0 %v6207_v36  ;;  %3174 = vmatpush.bf16.msrb.mxu1 %v6179_v9  ;;  %v7370_v1 = vld [vmem:[#allocation16 + $0x164] sm:$0xf0] }
 0x629   :  { %3209 = vmatpush.bf16.msrb.mxu2 %v6279_v31  ;;  %3186 = vmatpush.bf16.msra.mxu3 %v6251_v3 }
 0x62a   :  { %6166 = vmatmul.msk.bf16.vlgmr.msra.gmra.mxu0 %vm2381_vm6, %v2943_v60 }
 0x62b   :  { %3198 = vmatpush.bf16.msrb.mxu0 %v6199_v51  ;;  %3175 = vmatpush.bf16.msrb.mxu1 %v6171_v23  ;;  %v7387_v23 = vld [vmem:[#allocation16 + $0x1f4] sm:$0xf] }
 0x62d   :  { %3210 = vmatpush.bf16.msrb.mxu2 %v6271_v43  ;;  %3187 = vmatpush.bf16.msra.mxu3 %v6243_v15 }
 0x630   :  { %6167 = vmatmul.msk.bf16.vlgmr.msra.gmra.mxu2 %vm2381_vm6, %v2943_v60  ;;  %v6188_v60 = vld [vmem:[#allocation13 + $0x228] sm:$0xf0] }
 0x631   :  { %v6191_v39 = vor.u32 %v7295_v59, %v6188_v60  ;;  %3211 = vmatpush.bf16.msrb.mxu2 %v6263_v57  ;;  %3188 = vmatpush.bf16.msra.mxu3 %v6235_v27  ;;  %v7386_v27 = vld [vmem:[#allocation16 + $0x1e4] sm:$0xf0] }
 0x633   :  { %3199 = vmatpush.bf16.msrb.mxu0 %v6191_v39 }
 0x635   :  { %3212 = vmatpush.bf16.msrb.mxu2 %v6255_v5 }
 0x637   :  { %3200 = vmatpush.bf16.msrb.mxu0 %v6183_v14 }
 0x639   :  { %3213 = vmatpush.bf16.msrb.mxu2 %v6247_v19  ;;  %v6360_v19 = vld [vmem:[#allocation16 + $0x160] sm:$0xf] }
 0x63b   :  { %3201 = vmatpush.bf16.msrb.mxu0 %v6175_v13  ;;  %v6434_v13 = vld [vmem:[#allocation16 + $0x1f8] sm:$0xf0] }
 0x63d   :  { %3214 = vmatpush.bf16.msrb.mxu2 %v6239_v32  ;;  %v7369_v32 = vld [vmem:[#allocation16 + $0x164] sm:$0xf] }
 0x687   :  { %v2687_v49 = vpop.f32.mrf.mxu0  ;;  %v2713_v61 = vpop.f32.mrf.mxu1 }
 0x68f   :  { %v2689_v21 = vpop.f32.mrf.mxu0  ;;  %v2715_v22 = vpop.f32.mrf.mxu1 }
 0x690   :  { %v6433_v21 = vor.u32 %v7388_v12, %v6432_v11  ;;  %v6370_v22 = vld [vmem:[#allocation16 + $0x178] sm:$0xf0]  ;;  %v7362_v12 = vld [vmem:[#allocation16 + $0x124] sm:$0xf0] }
 0x691   :  { %v6402_v11 = vld [vmem:[#allocation16 + $0x1b8] sm:$0xf0] }
 0x693   :  { %v2700_v29 = vpop.f32.mrf.mxu2  ;;  %v2726_v31 = vpop.f32.mrf.mxu3 }
 0x694   :  { %v2701_v33 = vadd.f32 %v2700_v29, %v2687_v49  ;;  %v2727_v34 = vadd.f32 %v2726_v31, %v2713_v61  ;;  %v3222_v49 = vld [vmem:[#allocation15] sm:$0x3]  ;;  %v6352_v29 = vld [vmem:[#allocation16 + $0x150] sm:$0xf]  ;;  %v6373_v31 = vor.u32 %v7371_v20, %v6370_v22  ;;  %v6394_v22 = vld [vmem:[#allocation16 + $0x1a8] sm:$0xf0] }
 0x695   :  { %v3224_v63 = vperm.slane %v3222_v49, 0  ;;  %v3225_v50 = vperm.slane %v3222_v49, 1 }
 0x697   :  { %v2899_v35 = vpop.f32.mrf.mxu0  ;;  %v2925_v36 = vpop.f32.mrf.mxu1 }
 0x698   :  { %v2900_v37 = vadd.f32 %v2899_v35, %v2701_v33  ;;  %v2926_v38 = vadd.f32 %v2925_v36, %v2727_v34  ;;  %v6437_v33 = vor.u32 %v7387_v23, %v6434_v13  ;;  %v6361_v34 = vor.u32 %v7370_v1, %v6360_v19  ;;  %v6362_v36 = vld [vmem:[#allocation16 + $0x168] sm:$0xf0]  ;;  %v7360_v23 = vld [vmem:[#allocation16 + $0x114] sm:$0xf0]  ;;  %v6384_v13 = vld [vmem:[#allocation16 + $0x190] sm:$0xf] }
 0x699   :  { %v6425_v35 = vor.u32 %v7386_v27, %v6424_v26  ;;  %v7376_v26 = vld [vmem:[#allocation16 + $0x194] sm:$0xf0]  ;;  %v6312_v27 = vld [vmem:[#allocation16 + $0x100] sm:$0xf] }
 0x69b   :  { %v2702_v40 = vpop.f32.mrf.mxu2  ;;  %v2728_v41 = vpop.f32.mrf.mxu3 }
 0x69c   :  { %v7368_v40 = vld [vmem:[#allocation16 + $0x154] sm:$0xf0]  ;;  %v6416_v41 = vld [vmem:[#allocation16 + $0x1d0] sm:$0xf] }
 0x69f   :  { %v2901_v42 = vpop.f32.mrf.mxu0  ;;  %v2927_v43 = vpop.f32.mrf.mxu1 }
 0x6a0   :  { %v7384_v42 = vld [vmem:[#allocation16 + $0x1d4] sm:$0xf0]  ;;  %v6344_v43 = vld [vmem:[#allocation16 + $0x140] sm:$0xf] }
 0x6a3   :  { %v2912_v44 = vpop.f32.mrf.mxu2  ;;  %v2938_v45 = vpop.f32.mrf.mxu3 }
 0x6a4   :  { %v2913_v46 = vadd.f32 %v2912_v44, %v2900_v37  ;;  %v2939_v47 = vadd.f32 %v2938_v45, %v2926_v38  ;;  %v7385_v37 = vld [vmem:[#allocation16 + $0x1e4] sm:$0xf]  ;;  %v6426_v38 = vld [vmem:[#allocation16 + $0x1e8] sm:$0xf0]  ;;  %v6365_v44 = vor.u32 %v7369_v32, %v6362_v36  ;;  %v7367_v45 = vld [vmem:[#allocation16 + $0x154] sm:$0xf] }
 0x6a5   :  { %v7375_v36 = vld [vmem:[#allocation16 + $0x194] sm:$0xf] }
 0x6a7   :  { %v2956_v30 = vpop.f32.mrf.mxu0 }
 0x6a8   :  { %v2973_v48 = vpack.c.bf16 %v2956_v30, %v2956_v30  ;;  %v6417_v30 = vor.u32 %v7384_v42, %v6416_v41  ;;  %v7374_v41 = vld [vmem:[#allocation16 + $0x184] sm:$0xf0]  ;;  %v7339_v42 = vld [vmem:[#allocation16 + $0x74] sm:$0xf0] }
 0x6aa   :  { %3176 = vmatmul.bf16.vlgmr.msrb.gmra.mxu1 %v2973_v48  ;;  %3202 = vmatmul.bf16.vlgmr.msrb.gmra.mxu0 %v2973_v48  ;;  %v6354_v48 = vld [vmem:[#allocation16 + $0x158] sm:$0xf0] }
 0x6ab   :  { %v2914_v52 = vpop.f32.mrf.mxu2  ;;  %v2940_v51 = vpop.f32.mrf.mxu3 }
 0x6ac   :  { %v7383_v52 = vld [vmem:[#allocation16 + $0x1d4] sm:$0xf]  ;;  %v6418_v51 = vld [vmem:[#allocation16 + $0x1d8] sm:$0xf0] }
 0x6af   :  { %v2958_v53 = vpop.f32.mrf.mxu0 }
 0x6b0   :  { %v7366_v53 = vld [vmem:[#allocation16 + $0x144] sm:$0xf0] }
 0x6b3   :  { %v2969_v54 = vpop.f32.mrf.mxu2 }
 0x6b4   :  { %v2974_v55 = vpack.c.bf16 %v2969_v54, %v2969_v54  ;;  %v6408_v54 = vld [vmem:[#allocation16 + $0x1c0] sm:$0xf] }
 0x6b6   :  { %3189 = vmatmul.bf16.vlgmr.msra.gmra.mxu3 %v2974_v55  ;;  %3215 = vmatmul.bf16.vlgmr.msrb.gmra.mxu2 %v2974_v55  ;;  %v7382_v55 = vld [vmem:[#allocation16 + $0x1c4] sm:$0xf0] }
 0x6b7   :  { %v6409_v49 = vor.u32 %v7382_v55, %v6408_v54  ;;  %v7338_v55 = vld [vmem:[#allocation16 + $0x74] sm:$0xf] }
 0x6bb   :  { %v2971_v56 = vpop.f32.mrf.mxu2 }
 0x6bc   :  { %v6336_v56 = vld [vmem:[#allocation16 + $0x130] sm:$0xf] }
 0x727   :  { %v3177_v57 = vpop.f32.mrf.mxu1  ;;  %v3203_v58 = vpop.f32.mrf.mxu0 }
 0x72f   :  { %v3179_v59 = vpop.f32.mrf.mxu1  ;;  %v3205_v60 = vpop.f32.mrf.mxu0 }
 0x730   :  { %v6421_v59 = vor.u32 %v7383_v52, %v6418_v51  ;;  %v6345_v60 = vor.u32 %v7366_v53, %v6344_v43  ;;  %v6560_v43 = vld [vmem:[#allocation16 + $0xf0] sm:$0xf]  ;;  %v6314_v52 = vld [vmem:[#allocation16 + $0x108] sm:$0xf0]  ;;  %v6488_v53 = vld [vmem:[#allocation16 + $0x60] sm:$0xf] }
 0x739   :  { %v3190_v61 = vpop.f32.mrf.mxu3  ;;  %v3216_v62 = vpop.f32.mrf.mxu2 }
 0x73a   :  { %v3191_v39 = vadd.f32 %v3190_v61, %v3177_v57  ;;  %v3217_v2 = vadd.f32 %v3216_v62, %v3203_v58  ;;  %v6357_v57 = vor.u32 %v7367_v45, %v6354_v48  ;;  %v7365_v58 = vld [vmem:[#allocation16 + $0x144] sm:$0xf]  ;;  %v6346_v61 = vld [vmem:[#allocation16 + $0x148] sm:$0xf0] }
 0x73b   :  { %v7381_v62 = vld [vmem:[#allocation16 + $0x1c4] sm:$0xf] }
 0x73c   :  { %v3220_v3 = vadd.f32 %v3191_v39, %v2913_v46  ;;  %v3221_v4 = vadd.f32 %v3217_v2, %v2939_v47  ;;  %v6429_v46 = vor.u32 %v7385_v37, %v6426_v38  ;;  %v6353_v47 = vor.u32 %v7368_v40, %v6352_v29  ;;  %v6410_v39 = vld [vmem:[#allocation16 + $0x1c8] sm:$0xf0]  ;;  %v6400_v2 = vld [vmem:[#allocation16 + $0x1b0] sm:$0xf]  ;;  %v6386_v37 = vld [vmem:[#allocation16 + $0x198] sm:$0xf0] }
 0x73d   :  { %v6496_v38 = vld [vmem:[#allocation16 + $0x70] sm:$0xf]  ;;  %v6376_v40 = vld [vmem:[#allocation16 + $0x180] sm:$0xf]  ;;  %v7357_v48 = vld [vmem:[#allocation16 + $0x104] sm:$0xf] }
 0x73e   :  { %v3228_v5 = vadd.f32 %v3224_v63, %v3220_v3  ;;  %v3229_v6 = vadd.f32 %v3225_v50, %v3221_v4  ;;  %v7364_v63 = vld [vmem:[#allocation16 + $0x134] sm:$0xf0]  ;;  %v6328_v3 = vld [vmem:[#allocation16 + $0x120] sm:$0xf]  ;;  %v6349_v4 = vor.u32 %v7365_v58, %v6346_v61  ;;  %v6497_v51 = vor.u32 %v7339_v42, %v6496_v38  ;;  %v7332_v42 = vld [vmem:[#allocation16 + $0x44] sm:$0xf] }
 0x73f   :  { %v7380_v50 = vld [vmem:[#allocation16 + $0x1b4] sm:$0xf0]  ;;  %v6337_v7 = vor.u32 %v7364_v63, %v6336_v56  ;;  %v6329_v1 = vor.u32 %v7362_v12, %v6328_v3  ;;  %v6498_v56 = vld [vmem:[#allocation16 + $0x78] sm:$0xf0]  ;;  %v6552_v58 = vld [vmem:[#allocation16 + $0xe0] sm:$0xf] }
 0x740   :  { %v3230_v9 = vmax.f32 %v3228_v5, 0.0  ;;  %v3231_v10 = vmax.f32 %v3229_v6, 0.0  ;;  %v7363_v5 = vld [vmem:[#allocation16 + $0x134] sm:$0xf]  ;;  %v6413_v6 = vor.u32 %v7381_v62, %v6410_v39  ;;  %v6401_v8 = vor.u32 %v7380_v50, %v6400_v2  ;;  %v6480_v62 = vld [vmem:[#allocation16 + $0x50] sm:$0xf] }
 0x741   :  { %v3192_v14 = vpop.f32.mrf.mxu3  ;;  %v3218_v15 = vpop.f32.mrf.mxu2  ;;  %v7335_v63 = vld [vmem:[#allocation16 + $0x54] sm:$0xf0]  ;;  %v6544_v2 = vld [vmem:[#allocation16 + $0xd0] sm:$0xf]  ;;  %v7349_v12 = vld [vmem:[#allocation16 + $0xc4] sm:$0xf0] }
 0x742   :  { %v3232_v16 = vpack.c.bf16 %v3230_v9, %v3230_v9  ;;  %v3233_v17 = vpack.c.bf16 %v3231_v10, %v3231_v10  ;;  %v6338_v9 = vld [vmem:[#allocation16 + $0x138] sm:$0xf0]  ;;  %v7379_v10 = vld [vmem:[#allocation16 + $0x1b4] sm:$0xf]  ;;  %v6392_v14 = vld [vmem:[#allocation16 + $0x1a0] sm:$0xf]  ;;  %v6481_v3 = vor.u32 %v7335_v63, %v6480_v62 }
 0x743   :  { %v7378_v15 = vld [vmem:[#allocation16 + $0x1a4] sm:$0xf0]  ;;  %v6405_v19 = vor.u32 %v7379_v10, %v6402_v11  ;;  %v7351_v50 = vld [vmem:[#allocation16 + $0xd4] sm:$0xf0]  ;;  %v6536_v11 = vld [vmem:[#allocation16 + $0xc0] sm:$0xf] }
 0x744   :  { %v8885_v24 = vsel %vm1531_vm3, %v3232_v16, 0  ;;  %v8888_v25 = vsel %vm1531_vm3, %v3233_v17, 0  ;;  %v6320_v16 = vld [vmem:[#allocation16 + $0x110] sm:$0xf]  ;;  %v6341_v17 = vor.u32 %v7363_v5, %v6338_v9  ;;  %v6393_v20 = vor.u32 %v7378_v15, %v6392_v14  ;;  %v6472_v5 = vld [vmem:[#allocation16 + $0x40] sm:$0xf] }
 0x745   :  { %3257 = vmatpush.bf16.msra.mxu1 %v8885_v24  ;;  %3271 = vmatpush.bf16.msrb.mxu3 %v8888_v25  ;;  %v7331_v9 = vld [vmem:[#allocation16 + $0x34] sm:$0xf0]  ;;  %v7336_v14 = vld [vmem:[#allocation16 + $0x64] sm:$0xf]  ;;  %v6537_v15 = vor.u32 %v7349_v12, %v6536_v11  ;;  %v7341_v62 = vld [vmem:[#allocation16 + $0x84] sm:$0xf0] }
 0x746   :  { %3330 = vmatpush.bf16.msra.mxu0 %v8885_v24  ;;  %3344 = vmatpush.bf16.msra.mxu2 %v8888_v25  ;;  %v7324_v11 = vld [vmem:[#allocation16 + $0x4] sm:$0xf]  ;;  %v6442_v12 = vld [vmem:[#allocation16 + $0x8] sm:$0xf0] }
 0x748   :  { %6301 = vmatmul.msk.bf16.vlgmr.msrb.gmra.mxu3 %vm1527_vm4, %v7323_v18  ;;  %6300 = vmatmul.msk.bf16.vlgmr.msra.gmra.mxu1 %vm1527_vm4, %v7323_v18  ;;  %v7361_v18 = vld [vmem:[#allocation16 + $0x124] sm:$0xf] }
 0x749   :  { %3546 = vmatpush.bf16.msrb.mxu1 %v6369_v0  ;;  %3560 = vmatpush.bf16.msra.mxu3 %v6433_v21  ;;  %v6330_v0 = vld [vmem:[#allocation16 + $0x128] sm:$0xf0]  ;;  %v7377_v21 = vld [vmem:[#allocation16 + $0x1a4] sm:$0xf] }
 0x74a   :  { %6308 = vmatmul.msk.bf16.vlgmr.msra.gmra.mxu0 %vm1527_vm4, %v7356_v28  ;;  %6309 = vmatmul.msk.bf16.vlgmr.msra.gmra.mxu2 %vm1527_vm4, %v7356_v28  ;;  %v7358_v28 = vld [vmem:[#allocation16 + $0x104] sm:$0xf0]  ;;  %v6333_v29 = vor.u32 %v7361_v18, %v6330_v0  ;;  %v6397_v32 = vor.u32 %v7377_v21, %v6394_v22  ;;  %v6378_v18 = vld [vmem:[#allocation16 + $0x188] sm:$0xf0]  ;;  %v7354_v21 = vld [vmem:[#allocation16 + $0xf4] sm:$0xf] }
 0x74b   :  { %3574 = vmatpush.bf16.msrb.mxu0 %v6373_v31  ;;  %3588 = vmatpush.bf16.msrb.mxu2 %v6437_v33  ;;  %v7359_v31 = vld [vmem:[#allocation16 + $0x114] sm:$0xf]  ;;  %v6321_v33 = vor.u32 %v7360_v23, %v6320_v16  ;;  %v6490_v16 = vld [vmem:[#allocation16 + $0x68] sm:$0xf0]  ;;  %v7329_v0 = vld [vmem:[#allocation16 + $0x24] sm:$0xf0] }
 0x74c   :  { %v6562_v23 = vld [vmem:[#allocation16 + $0xf8] sm:$0xf0] }
 0x74d   :  { %3547 = vmatpush.bf16.msrb.mxu1 %v6361_v34  ;;  %3561 = vmatpush.bf16.msra.mxu3 %v6425_v35  ;;  %v6385_v34 = vor.u32 %v7376_v26, %v6384_v13  ;;  %v6322_v35 = vld [vmem:[#allocation16 + $0x118] sm:$0xf0]  ;;  %v6528_v13 = vld [vmem:[#allocation16 + $0xb0] sm:$0xf]  ;;  %v7347_v26 = vld [vmem:[#allocation16 + $0xb4] sm:$0xf0] }
 0x74e   :  { %v6325_v45 = vor.u32 %v7359_v31, %v6322_v35  ;;  %v6482_v31 = vld [vmem:[#allocation16 + $0x58] sm:$0xf0]  ;;  %v7352_v35 = vld [vmem:[#allocation16 + $0xe4] sm:$0xf] }
 0x74f   :  { %3575 = vmatpush.bf16.msrb.mxu0 %v6365_v44  ;;  %3589 = vmatpush.bf16.msrb.mxu2 %v6429_v46  ;;  %v7355_v44 = vld [vmem:[#allocation16 + $0xf4] sm:$0xf0]  ;;  %v6389_v46 = vor.u32 %v7375_v36, %v6386_v37  ;;  %v6554_v37 = vld [vmem:[#allocation16 + $0xe8] sm:$0xf0] }
 0x750   :  { %v6561_v54 = vor.u32 %v7355_v44, %v6560_v43  ;;  %v6557_v38 = vor.u32 %v7352_v35, %v6554_v37  ;;  %v6474_v44 = vld [vmem:[#allocation16 + $0x48] sm:$0xf0]  ;;  %v7405_v35 = vld [vmem:[#allocation16 + $0x274] sm:$0xf0]  ;;  %v6634_v37 = vld [vmem:[#allocation16 + $0x278] sm:$0xf0] }
 0x751   :  { %3548 = vmatpush.bf16.msrb.mxu1 %v6353_v47  ;;  %3562 = vmatpush.bf16.msra.mxu3 %v6417_v30  ;;  %v6313_v47 = vor.u32 %v7358_v28, %v6312_v27  ;;  %v6377_v30 = vor.u32 %v7374_v41, %v6376_v40  ;;  %v6565_v27 = vor.u32 %v7354_v21, %v6562_v23  ;;  %v6520_v40 = vld [vmem:[#allocation16 + $0xa0] sm:$0xf]  ;;  %v7345_v41 = vld [vmem:[#allocation16 + $0xa4] sm:$0xf0] }
 0x752   :  { %v6529_v28 = vor.u32 %v7347_v26, %v6528_v13  ;;  %v6521_v43 = vor.u32 %v7345_v41, %v6520_v40  ;;  %v6624_v40 = vld [vmem:[#allocation16 + $0x260] sm:$0xf]  ;;  %v7403_v41 = vld [vmem:[#allocation16 + $0x264] sm:$0xf0] }
 0x753   :  { %3576 = vmatpush.bf16.msrb.mxu0 %v6357_v57  ;;  %3590 = vmatpush.bf16.msrb.mxu2 %v6421_v59  ;;  %v7337_v57 = vld [vmem:[#allocation16 + $0x64] sm:$0xf0] }
 0x754   :  { %v7353_v59 = vld [vmem:[#allocation16 + $0xe4] sm:$0xf0]  ;;  %v6489_v61 = vor.u32 %v7337_v57, %v6488_v53  ;;  %v6512_v53 = vld [vmem:[#allocation16 + $0x90] sm:$0xf]  ;;  %v6466_v57 = vld [vmem:[#allocation16 + $0x38] sm:$0xf0] }
 0x755   :  { %3549 = vmatpush.bf16.msrb.mxu1 %v6345_v60  ;;  %3563 = vmatpush.bf16.msra.mxu3 %v6409_v49  ;;  %v6317_v60 = vor.u32 %v7357_v48, %v6314_v52  ;;  %v6501_v49 = vor.u32 %v7338_v55, %v6498_v56  ;;  %v6553_v39 = vor.u32 %v7353_v59, %v6552_v58  ;;  %v6546_v52 = vld [vmem:[#allocation16 + $0xd8] sm:$0xf0]  ;;  %v7330_v55 = vld [vmem:[#allocation16 + $0x34] sm:$0xf]  ;;  %v7348_v59 = vld [vmem:[#allocation16 + $0xc4] sm:$0xf] }
 0x756   :  { %v6469_v58 = vor.u32 %v7330_v55, %v6466_v57  ;;  %v7420_v55 = vld [vmem:[#allocation16 + $0x2f4] sm:$0xf]  ;;  %v6698_v57 = vld [vmem:[#allocation16 + $0x2f8] sm:$0xf0] }
 0x757   :  { %3577 = vmatpush.bf16.msrb.mxu0 %v6349_v4  ;;  %3591 = vmatpush.bf16.msrb.mxu2 %v6413_v6  ;;  %v6545_v4 = vor.u32 %v7351_v50, %v6544_v2  ;;  %v7333_v6 = vld [vmem:[#allocation16 + $0x44] sm:$0xf0]  ;;  %v6458_v2 = vld [vmem:[#allocation16 + $0x28] sm:$0xf0] }
 0x759   :  { %3550 = vmatpush.bf16.msrb.mxu1 %v6337_v7  ;;  %3564 = vmatpush.bf16.msra.mxu3 %v6401_v8  ;;  %v6473_v7 = vor.u32 %v7333_v6, %v6472_v5  ;;  %v6464_v8 = vld [vmem:[#allocation16 + $0x30] sm:$0xf]  ;;  %v7326_v6 = vld [vmem:[#allocation16 + $0x14] sm:$0xf] }
 0x75a   :  { %v6465_v10 = vor.u32 %v7331_v9, %v6464_v8  ;;  %v7344_v8 = vld [vmem:[#allocation16 + $0xa4] sm:$0xf] }
 0x75b   :  { %3578 = vmatpush.bf16.msrb.mxu0 %v6341_v17  ;;  %3592 = vmatpush.bf16.msrb.mxu2 %v6405_v19  ;;  %v7373_v17 = vld [vmem:[#allocation16 + $0x184] sm:$0xf]  ;;  %v6493_v19 = vor.u32 %v7336_v14, %v6490_v16  ;;  %v6514_v16 = vld [vmem:[#allocation16 + $0x98] sm:$0xf0] }
 0x75d   :  { %3551 = vmatpush.bf16.msrb.mxu1 %v6329_v1  ;;  %3565 = vmatpush.bf16.msra.mxu3 %v6393_v20  ;;  %v6381_v1 = vor.u32 %v7373_v17, %v6378_v18  ;;  %v6456_v20 = vld [vmem:[#allocation16 + $0x20] sm:$0xf]  ;;  %v6445_v17 = vor.u32 %v7324_v11, %v6442_v12  ;;  %v6680_v11 = vld [vmem:[#allocation16 + $0x2d0] sm:$0xf]  ;;  %v7417_v12 = vld [vmem:[#allocation16 + $0x2d4] sm:$0xf0] }
 0x75e   :  { %v6457_v22 = vor.u32 %v7329_v0, %v6456_v20 }
 0x75f   :  { %3579 = vmatpush.bf16.msrb.mxu0 %v6333_v29  ;;  %3593 = vmatpush.bf16.msrb.mxu2 %v6397_v32  ;;  %v7334_v29 = vld [vmem:[#allocation16 + $0x54] sm:$0xf] }
 0x760   :  { %v6485_v32 = vor.u32 %v7334_v29, %v6482_v31 }
 0x761   :  { %3552 = vmatpush.bf16.msrb.mxu1 %v6321_v33  ;;  %3566 = vmatpush.bf16.msra.mxu3 %v6385_v34  ;;  %v6448_v33 = vld [vmem:[#allocation16 + $0x10] sm:$0xf]  ;;  %v7327_v34 = vld [vmem:[#allocation16 + $0x14] sm:$0xf0] }
 0x762   :  { %v6449_v36 = vor.u32 %v7327_v34, %v6448_v33  ;;  %v7389_v34 = vld [vmem:[%s9103_s13 + $0x10] sm:$0xff] }
 0x763   :  { %3580 = vmatpush.bf16.msrb.mxu0 %v6325_v45  ;;  %3594 = vmatpush.bf16.msrb.mxu2 %v6389_v46  ;;  %v6477_v45 = vor.u32 %v7332_v42, %v6474_v44  ;;  %v6440_v46 = vld [vmem:[#allocation16] sm:$0xf]  ;;  %v7402_v42 = vld [vmem:[#allocation16 + $0x264] sm:$0xf]  ;;  %v6626_v44 = vld [vmem:[#allocation16 + $0x268] sm:$0xf0] }
 0x765   :  { %3553 = vmatpush.bf16.msrb.mxu1 %v6313_v47  ;;  %3567 = vmatpush.bf16.msra.mxu3 %v6377_v30  ;;  %v7325_v47 = vld [vmem:[#allocation16 + $0x4] sm:$0xf0]  ;;  %v7350_v30 = vld [vmem:[#allocation16 + $0xd4] sm:$0xf] }
 0x766   :  { %v6441_v48 = vor.u32 %v7325_v47, %v6440_v46  ;;  %v6616_v46 = vld [vmem:[#allocation16 + $0x250] sm:$0xf]  ;;  %v7401_v47 = vld [vmem:[#allocation16 + $0x254] sm:$0xf0] }
 0x767   :  { %3581 = vmatpush.bf16.msrb.mxu0 %v6317_v60  ;;  %3595 = vmatpush.bf16.msrb.mxu2 %v6381_v1  ;;  %v6538_v60 = vld [vmem:[#allocation16 + $0xc8] sm:$0xf0] }
 0x768   :  { %v6506_v1 = vld [vmem:[#allocation16 + $0x88] sm:$0xf0] }
 0x769   :  { %3762 = vmatpush.bf16.msra.mxu1 %v6497_v51  ;;  %3776 = vmatpush.bf16.msrb.mxu3 %v6561_v54  ;;  %v6549_v51 = vor.u32 %v7350_v30, %v6546_v52  ;;  %v7343_v54 = vld [vmem:[#allocation16 + $0x94] sm:$0xf0]  ;;  %v7400_v30 = vld [vmem:[#allocation16 + $0x254] sm:$0xf]  ;;  %v6618_v52 = vld [vmem:[#allocation16 + $0x258] sm:$0xf0] }
 0x76a   :  { %v6513_v56 = vor.u32 %v7343_v54, %v6512_v53  ;;  %v6696_v53 = vld [vmem:[#allocation16 + $0x2f0] sm:$0xf]  ;;  %v7421_v54 = vld [vmem:[#allocation16 + $0x2f4] sm:$0xf0] }
 0x76b   :  { %3790 = vmatpush.bf16.msra.mxu0 %v6501_v49  ;;  %3804 = vmatpush.bf16.msra.mxu2 %v6565_v27  ;;  %v6541_v49 = vor.u32 %v7348_v59, %v6538_v60  ;;  %v6608_v59 = vld [vmem:[#allocation16 + $0x240] sm:$0xf]  ;;  %v7399_v60 = vld [vmem:[#allocation16 + $0x244] sm:$0xf0] }
 0x76d   :  { %3763 = vmatpush.bf16.msra.mxu1 %v6489_v61  ;;  %3777 = vmatpush.bf16.msrb.mxu3 %v6553_v39  ;;  %v6504_v61 = vld [vmem:[#allocation16 + $0x80] sm:$0xf]  ;;  %v7328_v39 = vld [vmem:[#allocation16 + $0x24] sm:$0xf] }
 0x76e   :  { %v6505_v63 = vor.u32 %v7341_v62, %v6504_v61  ;;  %v6461_v50 = vor.u32 %v7328_v39, %v6458_v2  ;;  %v6609_v61 = vor.u32 %v7399_v60, %v6608_v59  ;;  %v6610_v62 = vld [vmem:[#allocation16 + $0x248] sm:$0xf0]  ;;  %v7419_v2 = vld [vmem:[#allocation16 + $0x2e4] sm:$0xf0]  ;;  %v7409_v59 = vld [vmem:[#allocation16 + $0x294] sm:$0xf0] }
 0x76f   :  { %3791 = vmatpush.bf16.msra.mxu0 %v6493_v19  ;;  %3805 = vmatpush.bf16.msra.mxu2 %v6557_v38  ;;  %v7340_v19 = vld [vmem:[#allocation16 + $0x84] sm:$0xf]  ;;  %v7408_v60 = vld [vmem:[#allocation16 + $0x294] sm:$0xf] }
 0x770   :  { %v6509_v20 = vor.u32 %v7340_v19, %v6506_v1  ;;  %v6592_v1 = vld [vmem:[#allocation16 + $0x220] sm:$0xf] }
 0x771   :  { %3764 = vmatpush.bf16.msra.mxu1 %v6481_v3  ;;  %3778 = vmatpush.bf16.msrb.mxu3 %v6545_v4  ;;  %v7346_v3 = vld [vmem:[#allocation16 + $0xb4] sm:$0xf]  ;;  %v6530_v4 = vld [vmem:[#allocation16 + $0xb8] sm:$0xf0] }
 0x772   :  { %v6533_v5 = vor.u32 %v7346_v3, %v6530_v4  ;;  %v6690_v4 = vld [vmem:[#allocation16 + $0x2e8] sm:$0xf0] }
 0x773   :  { %3792 = vmatpush.bf16.msra.mxu0 %v6485_v32  ;;  %3806 = vmatpush.bf16.msra.mxu2 %v6549_v51  ;;  %v6621_v51 = vor.u32 %v7400_v30, %v6618_v52  ;;  %v6578_v30 = vld [vmem:[#allocation16 + $0x208] sm:$0xf0]  ;;  %v6656_v52 = vld [vmem:[#allocation16 + $0x2a0] sm:$0xf] }
 0x775   :  { %3765 = vmatpush.bf16.msra.mxu1 %v6473_v7  ;;  %3779 = vmatpush.bf16.msrb.mxu3 %v6537_v15  ;;  %v6450_v7 = vld [vmem:[#allocation16 + $0x18] sm:$0xf0]  ;;  %v7342_v15 = vld [vmem:[#allocation16 + $0x94] sm:$0xf] }
 0x776   :  { %v6453_v9 = vor.u32 %v7326_v6, %v6450_v7  ;;  %v6517_v18 = vor.u32 %v7342_v15, %v6514_v16  ;;  %v6600_v6 = vld [vmem:[#allocation16 + $0x230] sm:$0xf]  ;;  %v7397_v7 = vld [vmem:[#allocation16 + $0x234] sm:$0xf0]  ;;  %v6681_v15 = vor.u32 %v7417_v12, %v6680_v11  ;;  %v7416_v16 = vld [vmem:[#allocation16 + $0x2d4] sm:$0xf] }
 0x777   :  { %3793 = vmatpush.bf16.msra.mxu0 %v6477_v45  ;;  %3807 = vmatpush.bf16.msra.mxu2 %v6541_v49  ;;  %v6629_v45 = vor.u32 %v7402_v42, %v6626_v44  ;;  %v7398_v49 = vld [vmem:[#allocation16 + $0x244] sm:$0xf]  ;;  %v6576_v44 = vld [vmem:[#allocation16 + $0x200] sm:$0xf] }
 0x778   :  { %v6613_v39 = vor.u32 %v7398_v49, %v6610_v62  ;;  %v6650_v62 = vld [vmem:[#allocation16 + $0x298] sm:$0xf0] }
 0x779   :  { %3766 = vmatpush.bf16.msra.mxu1 %v6465_v10  ;;  %3780 = vmatpush.bf16.msrb.mxu3 %v6529_v28  ;;  %v6522_v10 = vld [vmem:[#allocation16 + $0xa8] sm:$0xf0] }
 0x77a   :  { %v6525_v14 = vor.u32 %v7344_v8, %v6522_v10  ;;  %v7396_v8 = vld [vmem:[#allocation16 + $0x234] sm:$0xf]  ;;  %v6602_v10 = vld [vmem:[#allocation16 + $0x238] sm:$0xf0] }
 0x77b   :  { %3794 = vmatpush.bf16.msra.mxu0 %v6469_v58  ;;  %3808 = vmatpush.bf16.msra.mxu2 %v6533_v5  ;;  %v6701_v58 = vor.u32 %v7420_v55, %v6698_v57  ;;  %v6658_v55 = vld [vmem:[#allocation16 + $0x2a8] sm:$0xf0] }
 0x77d   :  { %3767 = vmatpush.bf16.msra.mxu1 %v6457_v22  ;;  %3781 = vmatpush.bf16.msrb.mxu3 %v6521_v43  ;;  %v6625_v43 = vor.u32 %v7403_v41, %v6624_v40  ;;  %v7412_v40 = vld [vmem:[#allocation16 + $0x2b4] sm:$0xf]  ;;  %v6666_v41 = vld [vmem:[#allocation16 + $0x2b8] sm:$0xf0] }
 0x77e   :  { %v6669_v42 = vor.u32 %v7412_v40, %v6666_v41 }
 0x77f   :  { %3795 = vmatpush.bf16.msra.mxu0 %v6461_v50  ;;  %3809 = vmatpush.bf16.msra.mxu2 %v6525_v14  ;;  %v7418_v50 = vld [vmem:[#allocation16 + $0x2e4] sm:$0xf]  ;;  %v6605_v14 = vor.u32 %v7396_v8, %v6602_v10 }
 0x780   :  { %v6693_v5 = vor.u32 %v7418_v50, %v6690_v4  ;;  %v6640_v50 = vld [vmem:[#allocation16 + $0x280] sm:$0xf]  ;;  %v7406_v4 = vld [vmem:[#allocation16 + $0x284] sm:$0xf] }
 0x781   :  { %3768 = vmatpush.bf16.msra.mxu1 %v6449_v36  ;;  %3782 = vmatpush.bf16.msrb.mxu3 %v6513_v56  ;;  %v7404_v36 = vld [vmem:[#allocation16 + $0x274] sm:$0xf]  ;;  %v6697_v56 = vor.u32 %v7421_v54, %v6696_v53  ;;  %v7410_v53 = vld [vmem:[#allocation16 + $0x2a4] sm:$0xf] }
 0x782   :  { %v6637_v38 = vor.u32 %v7404_v36, %v6634_v37  ;;  %v6664_v36 = vld [vmem:[#allocation16 + $0x2b0] sm:$0xf]  ;;  %v6661_v57 = vor.u32 %v7410_v53, %v6658_v55 }
 0x783   :  { %3796 = vmatpush.bf16.msra.mxu0 %v6453_v9  ;;  %3810 = vmatpush.bf16.msra.mxu2 %v6517_v18  ;;  %v6601_v9 = vor.u32 %v7397_v7, %v6600_v6  ;;  %v6642_v6 = vld [vmem:[#allocation16 + $0x288] sm:$0xf0] }
 0x784   :  { %v6645_v8 = vor.u32 %v7406_v4, %v6642_v6  ;;  %v7440_v4 = vld [vmem:[#allocation19 + $0x10] sm:$0xff]  ;;  %v7431_v6 = vld [vmem:[%s9107_s17 + $0x38] sm:$0xff] }
 0x785   :  { %3769 = vmatpush.bf16.msra.mxu1 %v6441_v48  ;;  %3783 = vmatpush.bf16.msrb.mxu3 %v6505_v63  ;;  %v6617_v48 = vor.u32 %v7401_v47, %v6616_v46  ;;  %v6688_v63 = vld [vmem:[#allocation16 + $0x2e0] sm:$0xf]  ;;  %v7390_v46 = vld [vmem:[#allocation16 + $0x204] sm:$0xf] }
 0x786   :  { %v6689_v3 = vor.u32 %v7419_v2, %v6688_v63 }
 0x787   :  { %3797 = vmatpush.bf16.msra.mxu0 %v6445_v17  ;;  %3811 = vmatpush.bf16.msra.mxu2 %v6509_v20  ;;  %v6682_v17 = vld [vmem:[#allocation16 + $0x2d8] sm:$0xf0]  ;;  %v7395_v20 = vld [vmem:[#allocation16 + $0x224] sm:$0xf0] }
 0x788   :  { %v6685_v18 = vor.u32 %v7416_v16, %v6682_v17 }
 0x7c5   :  { %v3259_v13 = vpop.f32.mrf.mxu1 }
 0x7c7   :  { %v3332_v0 = vpop.f32.mrf.mxu0 }
 0x7cb   :  { %v3273_v28 = vpop.f32.mrf.mxu3 }
 0x7cd   :  { %v3346_v21 = vpop.f32.mrf.mxu2  ;;  %v3261_v29 = vpop.f32.mrf.mxu1 }
 0x7ce   :  { %v3278_v31 = vpack.c.bf16 %v3261_v29, %v3259_v13  ;;  %v6672_v13 = vld [vmem:[#allocation16 + $0x2c0] sm:$0xf]  ;;  %v6674_v29 = vld [vmem:[#allocation16 + $0x2c8] sm:$0xf0] }
 0x7cf   :  { %v3334_v22 = vpop.f32.mrf.mxu0 }
 0x7d0   :  { %v3351_v23 = vpack.c.bf16 %v3334_v22, %v3332_v0  ;;  %v7394_v0 = vld [vmem:[#allocation16 + $0x224] sm:$0xf]  ;;  %v6594_v22 = vld [vmem:[#allocation16 + $0x228] sm:$0xf0] }
 0x7d2   :  { %3554 = vmatmul.bf16.vlgmr.msrb.gmra.mxu1 %v3351_v23  ;;  %3582 = vmatmul.bf16.vlgmr.msrb.gmra.mxu0 %v3351_v23  ;;  %v6597_v23 = vor.u32 %v7394_v0, %v6594_v22 }
 0x7d3   :  { %3836 = vmatpush.bf16.msrb.mxu1 %v8885_v24  ;;  %v3275_v32 = vpop.f32.mrf.mxu3  ;;  %v6632_v24 = vld [vmem:[#allocation16 + $0x270] sm:$0xf] }
 0x7d4   :  { %v3279_v33 = vpack.c.bf16 %v3275_v32, %v3273_v28  ;;  %v6584_v32 = vld [vmem:[#allocation16 + $0x210] sm:$0xf] }
 0x7d5   :  { %v3348_v26 = vpop.f32.mrf.mxu2 }
 0x7d6   :  { %v3352_v27 = vpack.c.bf16 %v3348_v26, %v3346_v21  ;;  %v6593_v21 = vor.u32 %v7395_v20, %v6592_v1  ;;  %v7415_v26 = vld [vmem:[#allocation16 + $0x2c4] sm:$0xf0] }
 0x7d7   :  { %v6673_v28 = vor.u32 %v7415_v26, %v6672_v13 }
 0x7d8   :  { %3568 = vmatmul.bf16.vlgmr.msra.gmra.mxu3 %v3352_v27  ;;  %3596 = vmatmul.bf16.vlgmr.msrb.gmra.mxu2 %v3352_v27  ;;  %v7414_v27 = vld [vmem:[#allocation16 + $0x2c4] sm:$0xf] }
 0x7d9   :  { %3850 = vmatpush.bf16.msra.mxu3 %v8888_v25  ;;  %v6633_v25 = vor.u32 %v7405_v35, %v6632_v24  ;;  %4066 = vmatpush.bf16.msrb.mxu2 %v6697_v56  ;;  %v6586_v35 = vld [vmem:[#allocation16 + $0x218] sm:$0xf0] }
 0x7db   :  { %4052 = vmatpush.bf16.msrb.mxu0 %v6633_v25  ;;  %v7413_v25 = vld [vmem:[#allocation16 + $0x2b4] sm:$0xf0] }
 0x7dd   :  { %4067 = vmatpush.bf16.msrb.mxu2 %v6689_v3  ;;  %v7407_v3 = vld [vmem:[#allocation16 + $0x284] sm:$0xf0] }
 0x7df   :  { %4053 = vmatpush.bf16.msrb.mxu0 %v6625_v43 }
 0x7e1   :  { %4068 = vmatpush.bf16.msrb.mxu2 %v6681_v15 }
 0x7e2   :  { %3770 = vmatmul.bf16.vlgmr.msra.gmra.mxu1 %v3278_v31  ;;  %3798 = vmatmul.bf16.vlgmr.msra.gmra.mxu0 %v3278_v31  ;;  %v6677_v31 = vor.u32 %v7414_v27, %v6674_v29 }
 0x7e3   :  { %4080 = vmatpush.bf16.msra.mxu1 %v6637_v38  ;;  %4054 = vmatpush.bf16.msrb.mxu0 %v6617_v48  ;;  %v6665_v38 = vor.u32 %v7413_v25, %v6664_v36  ;;  %v6581_v48 = vor.u32 %v7390_v46, %v6578_v30 }
 0x7e5   :  { %4069 = vmatpush.bf16.msrb.mxu2 %v6673_v28 }
 0x7e7   :  { %4081 = vmatpush.bf16.msra.mxu1 %v6629_v45  ;;  %4055 = vmatpush.bf16.msrb.mxu0 %v6609_v61  ;;  %v7391_v45 = vld [vmem:[#allocation16 + $0x204] sm:$0xf0] }
 0x7e8   :  { %3784 = vmatmul.bf16.vlgmr.msrb.gmra.mxu3 %v3279_v33  ;;  %3812 = vmatmul.bf16.vlgmr.msra.gmra.mxu2 %v3279_v33  ;;  %v7393_v33 = vld [vmem:[#allocation16 + $0x214] sm:$0xf0]  ;;  %v6577_v47 = vor.u32 %v7391_v45, %v6576_v44 }
 0x7e9   :  { %4094 = vmatpush.bf16.msrb.mxu3 %v6701_v58  ;;  %v6585_v24 = vor.u32 %v7393_v33, %v6584_v32  ;;  %4070 = vmatpush.bf16.msrb.mxu2 %v6665_v38  ;;  %v6648_v58 = vld [vmem:[#allocation16 + $0x290] sm:$0xf]  ;;  %v4112_v38 = vld [vmem:[#allocation18] sm:$0x3] }
 0x7ea   :  { %v6649_v61 = vor.u32 %v7409_v59, %v6648_v58  ;;  %v4114_v45 = vperm.slane %v4112_v38, 0 }
 0x7eb   :  { %4082 = vmatpush.bf16.msra.mxu1 %v6621_v51  ;;  %4056 = vmatpush.bf16.msrb.mxu0 %v6601_v9  ;;  %v7411_v51 = vld [vmem:[#allocation16 + $0x2a4] sm:$0xf0] }
 0x7ec   :  { %v6657_v54 = vor.u32 %v7411_v51, %v6656_v52 }
 0x7ed   :  { %4095 = vmatpush.bf16.msrb.mxu3 %v6693_v5  ;;  %v6641_v5 = vor.u32 %v7407_v3, %v6640_v50  ;;  %v7457_v50 = vld [vmem:[%s9107_s17 + $0xf8] sm:$0xff] }
 0x7ee   :  { %4071 = vmatpush.bf16.msrb.mxu2 %v6657_v54  ;;  %v7422_v3 = vld [vmem:[#allocation19] sm:$0xff] }
 0x7ef   :  { %4083 = vmatpush.bf16.msra.mxu1 %v6613_v39  ;;  %4057 = vmatpush.bf16.msrb.mxu0 %v6593_v21  ;;  %v6653_v39 = vor.u32 %v7408_v60, %v6650_v62 }
 0x7f1   :  { %4096 = vmatpush.bf16.msrb.mxu3 %v6685_v18 }
 0x7f2   :  { %6572 = vmatmul.msk.bf16.vlgmr.msrb.gmra.mxu1 %vm1527_vm4, %v7389_v34  ;;  %4072 = vmatpush.bf16.msrb.mxu2 %v6649_v61 }
 0x7f3   :  { %4084 = vmatpush.bf16.msra.mxu1 %v6605_v14  ;;  %4058 = vmatpush.bf16.msrb.mxu0 %v6585_v24 }
 0x7f5   :  { %4097 = vmatpush.bf16.msrb.mxu3 %v6677_v31 }
 0x7f6   :  { %4073 = vmatpush.bf16.msrb.mxu2 %v6641_v5  ;;  %v7439_v5 = vld [vmem:[%s9107_s17 + $0x78] sm:$0xff] }
 0x7f7   :  { %4085 = vmatpush.bf16.msra.mxu1 %v6597_v23  ;;  %4059 = vmatpush.bf16.msrb.mxu0 %v6577_v47  ;;  %v4115_v47 = vperm.slane %v4112_v38, 1 }
 0x7f8   :  { %6573 = vmatmul.msk.bf16.vlgmr.msra.gmra.mxu3 %vm1527_vm4, %v7389_v34  ;;  %v7392_v34 = vld [vmem:[#allocation16 + $0x214] sm:$0xf] }
 0x7f9   :  { %v6589_v37 = vor.u32 %v7392_v34, %v6586_v35  ;;  %4098 = vmatpush.bf16.msrb.mxu3 %v6669_v42 }
 0x7fb   :  { %4086 = vmatpush.bf16.msra.mxu1 %v6589_v37 }
 0x7fd   :  { %4099 = vmatpush.bf16.msrb.mxu3 %v6661_v57 }
 0x7ff   :  { %4087 = vmatpush.bf16.msra.mxu1 %v6581_v48 }
 0x801   :  { %4100 = vmatpush.bf16.msrb.mxu3 %v6653_v39 }
 0x805   :  { %4101 = vmatpush.bf16.msrb.mxu3 %v6645_v8  ;;  %v7456_v8 = vld [vmem:[%s9107_s17 + $0xf0] sm:$0xff] }
 0x84f   :  { %v3555_v19 = vpop.f32.mrf.mxu1  ;;  %v3583_v21 = vpop.f32.mrf.mxu0 }
 0x857   :  { %v3557_v43 = vpop.f32.mrf.mxu1  ;;  %v3585_v23 = vpop.f32.mrf.mxu0 }
 0x85b   :  { %v3569_v56 = vpop.f32.mrf.mxu3  ;;  %v3597_v22 = vpop.f32.mrf.mxu2 }
 0x85c   :  { %v3570_v49 = vadd.f32 %v3569_v56, %v3555_v19  ;;  %v3598_v24 = vadd.f32 %v3597_v22, %v3583_v21  ;;  %v7444_v21 = vld [vmem:[%s9107_s17 + $0x90] sm:$0xff] }
 0x85d   :  { %v7452_v22 = vld [vmem:[%s9107_s17 + $0xd0] sm:$0xff] }
 0x85f   :  { %v3771_v63 = vpop.f32.mrf.mxu1  ;;  %v3799_v26 = vpop.f32.mrf.mxu0 }
 0x860   :  { %v3772_v2 = vadd.f32 %v3771_v63, %v3570_v49  ;;  %v3800_v35 = vadd.f32 %v3799_v26, %v3598_v24  ;;  %v7442_v26 = vld [vmem:[%s9107_s17 + $0x80] sm:$0xff]  ;;  %v7425_v24 = vld [vmem:[%s9107_s17 + $0x8] sm:$0xff] }
 0x863   :  { %v3571_v7 = vpop.f32.mrf.mxu3  ;;  %v3599_v13 = vpop.f32.mrf.mxu2 }
 0x864   :  { %v3572_v9 = vadd.f32 %v3571_v7, %v3557_v43  ;;  %v3600_v37 = vadd.f32 %v3599_v13, %v3585_v23  ;;  %v7448_v7 = vld [vmem:[%s9107_s17 + $0xb0] sm:$0xff]  ;;  %v7443_v23 = vld [vmem:[%s9107_s17 + $0x88] sm:$0xff] }
 0x865   :  { %v7451_v13 = vld [vmem:[%s9107_s17 + $0xc8] sm:$0xff] }
 0x867   :  { %v3773_v10 = vpop.f32.mrf.mxu1  ;;  %v3801_v28 = vpop.f32.mrf.mxu0 }
 0x868   :  { %v3774_v11 = vadd.f32 %v3773_v10, %v3572_v9  ;;  %v3802_v41 = vadd.f32 %v3801_v28, %v3600_v37  ;;  %v7438_v9 = vld [vmem:[%s9107_s17 + $0x70] sm:$0xff]  ;;  %v7428_v28 = vld [vmem:[%s9107_s17 + $0x20] sm:$0xff] }
 0x869   :  { %v7430_v10 = vld [vmem:[%s9107_s17 + $0x30] sm:$0xff] }
 0x86b   :  { %v3785_v12 = vpop.f32.mrf.mxu3  ;;  %v3813_v27 = vpop.f32.mrf.mxu2 }
 0x86c   :  { %v3786_v14 = vadd.f32 %v3785_v12, %v3772_v2  ;;  %v3814_v40 = vadd.f32 %v3813_v27, %v3800_v35  ;;  %v7449_v2 = vld [vmem:[%s9107_s17 + $0xb8] sm:$0xff]  ;;  %v7455_v12 = vld [vmem:[%s9107_s17 + $0xe8] sm:$0xff]  ;;  %v7450_v27 = vld [vmem:[%s9107_s17 + $0xc0] sm:$0xff] }
 0x86d   :  { %v7432_v35 = vld [vmem:[%s9107_s17 + $0x40] sm:$0xff] }
 0x86f   :  { %v3838_v15 = vpop.f32.mrf.mxu1 }
 0x873   :  { %v3787_v16 = vpop.f32.mrf.mxu3  ;;  %v3815_v29 = vpop.f32.mrf.mxu2 }
 0x874   :  { %v3788_v17 = vadd.f32 %v3787_v16, %v3774_v11  ;;  %v3816_v52 = vadd.f32 %v3815_v29, %v3802_v41  ;;  %v7447_v11 = vld [vmem:[%s9107_s17 + $0xa8] sm:$0xff]  ;;  %v7446_v16 = vld [vmem:[%s9107_s17 + $0xa0] sm:$0xff]  ;;  %v7435_v29 = vld [vmem:[%s9107_s17 + $0x58] sm:$0xff] }
 0x877   :  { %v3840_v18 = vpop.f32.mrf.mxu1 }
 0x878   :  { %v3857_v19 = vpack.c.bf16 %v3840_v18, %v3838_v15  ;;  %v7429_v15 = vld [vmem:[%s9107_s17 + $0x28] sm:$0xff]  ;;  %v7436_v18 = vld [vmem:[%s9107_s17 + $0x60] sm:$0xff] }
 0x87a   :  { %4060 = vmatmul.bf16.vlgmr.msrb.gmra.mxu0 %v3857_v19  ;;  %4088 = vmatmul.bf16.vlgmr.msra.gmra.mxu1 %v3857_v19  ;;  %v7445_v19 = vld [vmem:[%s9107_s17 + $0x98] sm:$0xff] }
 0x87b   :  { %v3852_v1 = vpop.f32.mrf.mxu3 }
 0x883   :  { %v3854_v20 = vpop.f32.mrf.mxu3 }
 0x884   :  { %v3858_v0 = vpack.c.bf16 %v3854_v20, %v3852_v1  ;;  %v7453_v1 = vld [vmem:[%s9107_s17 + $0xd8] sm:$0xff]  ;;  %v7423_v20 = vld [vmem:[#allocation19 + $0x8] sm:$0xff] }
 0x886   :  { %4074 = vmatmul.bf16.vlgmr.msrb.gmra.mxu2 %v3858_v0  ;;  %4102 = vmatmul.bf16.vlgmr.msrb.gmra.mxu3 %v3858_v0  ;;  %v7441_v0 = vld [vmem:[#allocation19 + $0x18] sm:$0xff] }
 0x8f7   :  { %v4061_v31 = vpop.f32.mrf.mxu0  ;;  %v4089_v32 = vpop.f32.mrf.mxu1 }
 0x8ff   :  { %v4063_v42 = vpop.f32.mrf.mxu0  ;;  %v4091_v43 = vpop.f32.mrf.mxu1 }
 0x909   :  { %v4075_v33 = vpop.f32.mrf.mxu2  ;;  %v4103_v34 = vpop.f32.mrf.mxu3 }
 0x90a   :  { %v4076_v36 = vadd.f32 %v4075_v33, %v4061_v31  ;;  %v4104_v25 = vadd.f32 %v4103_v34, %v4089_v32  ;;  %v7427_v31 = vld [vmem:[%s9107_s17 + $0x18] sm:$0xff]  ;;  %v7434_v32 = vld [vmem:[%s9107_s17 + $0x50] sm:$0xff]  ;;  %v7433_v34 = vld [vmem:[%s9107_s17 + $0x48] sm:$0xff] }
 0x90b   :  { %v7426_v33 = vld [vmem:[%s9107_s17 + $0x10] sm:$0xff] }
 0x90c   :  { %v4108_v44 = vadd.f32 %v4076_v36, %v3786_v14  ;;  %v4109_v46 = vadd.f32 %v4104_v25, %v3814_v40  ;;  %v7437_v14 = vld [vmem:[%s9107_s17 + $0x68] sm:$0xff]  ;;  %v7424_v36 = vld [vmem:[%s9107_s17] sm:$0xff] }
 0x90e   :  { %v4118_v54 = vadd.f32 %v4114_v45, %v4108_v44  ;;  %v4119_v55 = vadd.f32 %v4115_v47, %v4109_v46 }
 0x910   :  { %v4122_v60 = vmax.f32 %v4118_v54, 0.0  ;;  %v4123_v49 = vmax.f32 %v4119_v55, 0.0 }
 0x911   :  { %v4077_v30 = vpop.f32.mrf.mxu2  ;;  %v4105_v48 = vpop.f32.mrf.mxu3 }
 0x912   :  { %v4078_v51 = vadd.f32 %v4077_v30, %v4063_v42  ;;  %v4106_v53 = vadd.f32 %v4105_v48, %v4091_v43 }
 0x914   :  { %v4110_v56 = vadd.f32 %v4078_v51, %v3788_v17  ;;  %v4111_v57 = vadd.f32 %v4106_v53, %v3816_v52  ;;  %v7454_v17 = vld [vmem:[%s9107_s17 + $0xe0] sm:$0xff] }
 0x916   :  { %v4120_v58 = vadd.f32 %v4114_v45, %v4110_v56  ;;  %v4121_v59 = vadd.f32 %v4115_v47, %v4111_v57 }
 0x918   :  { %v4124_v61 = vmax.f32 %v4120_v58, 0.0  ;;  %v4125_v62 = vmax.f32 %v4121_v59, 0.0 }
 0x91a   :  { %v8908_v39 = vpack.c.bf16 %v4124_v61, %v4122_v60  ;;  %v8910_v63 = vpack.c.bf16 %v4125_v62, %v4123_v49  ;;  %v7458_v61 = vld [vmem:[#allocation19 + $0x20] sm:$0xff]  ;;  %v7459_v62 = vld [vmem:[#allocation19 + $0x28] sm:$0xff] }
 0x91c   :  { %4155 = vmatpush.bf16.msra.mxu0 %v8908_v39  ;;  %4174 = vmatpush.bf16.msra.mxu2 %v8910_v63 }
 0x91d   :  { %4250 = vmatpush.bf16.msrb.mxu1 %v8908_v39  ;;  %4269 = vmatpush.bf16.msra.mxu3 %v8910_v63 }
 0x91f   :  { %6712 = vmatmul.msk.bf16.vlgmr.msra.gmra.mxu2 %vm680_vm2, %v7422_v3  ;;  %6710 = vmatmul.msk.bf16.vlgmr.msra.gmra.mxu0 %vm680_vm2, %v7422_v3  ;;  %v7464_v3 = vld [vmem:[%s9107_s17 + $0x120] sm:$0xff] }
 0x920   :  { %4414 = vmatpush.bf16.msrb.mxu0 %v7449_v2  ;;  %4433 = vmatpush.bf16.msrb.mxu2 %v7457_v50  ;;  %v7465_v2 = vld [vmem:[%s9107_s17 + $0x128] sm:$0xff]  ;;  %v7475_v50 = vld [vmem:[%s9107_s17 + $0x178] sm:$0xff] }
 0x921   :  { %6724 = vmatmul.msk.bf16.vlgmr.msra.gmra.mxu3 %vm680_vm2, %v7440_v4  ;;  %6722 = vmatmul.msk.bf16.vlgmr.msrb.gmra.mxu1 %vm680_vm2, %v7440_v4  ;;  %v7474_v4 = vld [vmem:[%s9107_s17 + $0x170] sm:$0xff] }
 0x922   :  { %4567 = vmatpush.bf16.msrb.mxu3 %v7439_v5  ;;  %4548 = vmatpush.bf16.msra.mxu1 %v7431_v6  ;;  %v7463_v5 = vld [vmem:[%s9107_s17 + $0x118] sm:$0xff]  ;;  %v7473_v6 = vld [vmem:[%s9107_s17 + $0x168] sm:$0xff] }
 0x924   :  { %4415 = vmatpush.bf16.msrb.mxu0 %v7448_v7  ;;  %4434 = vmatpush.bf16.msrb.mxu2 %v7456_v8  ;;  %v7462_v8 = vld [vmem:[%s9107_s17 + $0x110] sm:$0xff] }
 0x926   :  { %4568 = vmatpush.bf16.msrb.mxu3 %v7438_v9  ;;  %4549 = vmatpush.bf16.msra.mxu1 %v7430_v10  ;;  %v7472_v9 = vld [vmem:[%s9107_s17 + $0x160] sm:$0xff]  ;;  %v7461_v10 = vld [vmem:[%s9107_s17 + $0x108] sm:$0xff] }
 0x928   :  { %4416 = vmatpush.bf16.msrb.mxu0 %v7447_v11  ;;  %4435 = vmatpush.bf16.msrb.mxu2 %v7455_v12  ;;  %v7471_v11 = vld [vmem:[%s9107_s17 + $0x158] sm:$0xff] }
 0x92a   :  { %4569 = vmatpush.bf16.msrb.mxu3 %v7437_v14  ;;  %4550 = vmatpush.bf16.msra.mxu1 %v7429_v15  ;;  %v7460_v14 = vld [vmem:[%s9107_s17 + $0x100] sm:$0xff]  ;;  %v7470_v15 = vld [vmem:[%s9107_s17 + $0x150] sm:$0xff] }
 0x92c   :  { %4417 = vmatpush.bf16.msrb.mxu0 %v7446_v16  ;;  %4436 = vmatpush.bf16.msrb.mxu2 %v7454_v17  ;;  %v7469_v17 = vld [vmem:[%s9107_s17 + $0x148] sm:$0xff] }
 0x92e   :  { %4570 = vmatpush.bf16.msrb.mxu3 %v7436_v18  ;;  %4551 = vmatpush.bf16.msra.mxu1 %v7428_v28 }
 0x92f   :  { %6713 = vmatmul.msk.bf16.gmra.mxu2 %vm680_vm2, %v7423_v20  ;;  %6711 = vmatmul.msk.bf16.gmra.mxu0 %vm680_vm2, %v7423_v20 }
 0x930   :  { %4418 = vmatpush.bf16.msrb.mxu0 %v7445_v19  ;;  %4437 = vmatpush.bf16.msrb.mxu2 %v7453_v1  ;;  %v7468_v1 = vld [vmem:[%s9107_s17 + $0x140] sm:$0xff] }
 0x931   :  { %6725 = vmatmul.msk.bf16.gmra.mxu3 %vm680_vm2, %v7441_v0  ;;  %6723 = vmatmul.msk.bf16.gmra.mxu1 %vm680_vm2, %v7441_v0 }
 0x932   :  { %4571 = vmatpush.bf16.msrb.mxu3 %v7435_v29  ;;  %4552 = vmatpush.bf16.msra.mxu1 %v7427_v31 }
 0x934   :  { %4419 = vmatpush.bf16.msrb.mxu0 %v7444_v21  ;;  %4438 = vmatpush.bf16.msrb.mxu2 %v7452_v22 }
 0x936   :  { %4572 = vmatpush.bf16.msrb.mxu3 %v7434_v32  ;;  %4553 = vmatpush.bf16.msra.mxu1 %v7426_v33 }
 0x938   :  { %4420 = vmatpush.bf16.msrb.mxu0 %v7443_v23  ;;  %4439 = vmatpush.bf16.msrb.mxu2 %v7451_v13 }
 0x93a   :  { %4573 = vmatpush.bf16.msrb.mxu3 %v7433_v34  ;;  %4554 = vmatpush.bf16.msra.mxu1 %v7425_v24 }
 0x93c   :  { %4421 = vmatpush.bf16.msrb.mxu0 %v7442_v26  ;;  %4440 = vmatpush.bf16.msrb.mxu2 %v7450_v27 }
 0x93e   :  { %4574 = vmatpush.bf16.msrb.mxu3 %v7432_v35  ;;  %4555 = vmatpush.bf16.msra.mxu1 %v7424_v36 }
 0x940   :  { %4614 = vmatpush.bf16.msra.mxu0 %v8908_v39  ;;  %4633 = vmatpush.bf16.msra.mxu2 %v8910_v63  ;;  %v7467_v39 = vld [vmem:[%s9107_s17 + $0x138] sm:$0xff]  ;;  %v7466_v63 = vld [vmem:[%s9107_s17 + $0x130] sm:$0xff] }
 0x942   :  { %4778 = vmatpush.bf16.msrb.mxu1 %v7467_v39  ;;  %4797 = vmatpush.bf16.msra.mxu3 %v7475_v50 }
 0x946   :  { %4779 = vmatpush.bf16.msrb.mxu1 %v7466_v63  ;;  %4798 = vmatpush.bf16.msra.mxu3 %v7474_v4 }
 0x94a   :  { %4780 = vmatpush.bf16.msrb.mxu1 %v7465_v2  ;;  %4799 = vmatpush.bf16.msra.mxu3 %v7473_v6 }
 0x94e   :  { %4781 = vmatpush.bf16.msrb.mxu1 %v7464_v3  ;;  %4800 = vmatpush.bf16.msra.mxu3 %v7472_v9 }
 0x952   :  { %4782 = vmatpush.bf16.msrb.mxu1 %v7463_v5  ;;  %4801 = vmatpush.bf16.msra.mxu3 %v7471_v11 }
 0x956   :  { %4783 = vmatpush.bf16.msrb.mxu1 %v7462_v8  ;;  %4802 = vmatpush.bf16.msra.mxu3 %v7470_v15 }
 0x95a   :  { %4784 = vmatpush.bf16.msrb.mxu1 %v7461_v10  ;;  %4803 = vmatpush.bf16.msra.mxu3 %v7469_v17 }
 0x95e   :  { %4785 = vmatpush.bf16.msrb.mxu1 %v7460_v14  ;;  %4804 = vmatpush.bf16.msra.mxu3 %v7468_v1 }
 0x99c   :  { %v4157_v25 = vpop.f32.mrf.mxu0 }
 0x99e   :  { %v4252_v37 = vpop.f32.mrf.mxu1 }
 0x9a2   :  { %v4176_v38 = vpop.f32.mrf.mxu2 }
 0x9a4   :  { %v4271_v40 = vpop.f32.mrf.mxu3  ;;  %v4159_v41 = vpop.f32.mrf.mxu0 }
 0x9a5   :  { %v4186_v43 = vpack.c.bf16 %v4159_v41, %v4157_v25 }
 0x9a6   :  { %v4254_v42 = vpop.f32.mrf.mxu1 }
 0x9a7   :  { %v4281_v44 = vpack.c.bf16 %v4254_v42, %v4252_v37  ;;  %4556 = vmatmul.bf16.vlgmr.msra.gmra.mxu1 %v4186_v43 }
 0x9a9   :  { %4422 = vmatmul.bf16.vlgmr.msrb.gmra.mxu0 %v4281_v44 }
 0x9aa   :  { %v4178_v45 = vpop.f32.mrf.mxu2 }
 0x9ab   :  { %v4187_v47 = vpack.c.bf16 %v4178_v45, %v4176_v38 }
 0x9ac   :  { %v4273_v46 = vpop.f32.mrf.mxu3  ;;  %v4162_v48 = vpop.f32.mrf.mxu0 }
 0x9ad   :  { %v4282_v30 = vpack.c.bf16 %v4273_v46, %v4271_v40  ;;  %4575 = vmatmul.bf16.vlgmr.msrb.gmra.mxu3 %v4187_v47 }
 0x9ae   :  { %v4257_v52 = vpop.f32.mrf.mxu1 }
 0x9af   :  { %4441 = vmatmul.bf16.vlgmr.msrb.gmra.mxu2 %v4282_v30 }
 0x9b2   :  { %v4181_v51 = vpop.f32.mrf.mxu2 }
 0x9b4   :  { %v4276_v53 = vpop.f32.mrf.mxu3  ;;  %v4164_v54 = vpop.f32.mrf.mxu0 }
 0x9b5   :  { %v4188_v56 = vpack.c.bf16 %v4164_v54, %v4162_v48 }
 0x9b6   :  { %v4259_v55 = vpop.f32.mrf.mxu1 }
 0x9b7   :  { %v4283_v57 = vpack.c.bf16 %v4259_v55, %v4257_v52  ;;  %4561 = vmatmul.bf16.gmra.mxu1 %v4188_v56 }
 0x9b9   :  { %4427 = vmatmul.bf16.gmra.mxu0 %v4283_v57 }
 0x9ba   :  { %v4183_v58 = vpop.f32.mrf.mxu2 }
 0x9bb   :  { %v4189_v60 = vpack.c.bf16 %v4183_v58, %v4181_v51 }
 0x9bc   :  { %v4278_v59 = vpop.f32.mrf.mxu3 }
 0x9bd   :  { %v4284_v49 = vpack.c.bf16 %v4278_v59, %v4276_v53  ;;  %4580 = vmatmul.bf16.gmra.mxu3 %v4189_v60  ;;  %v7493_v53 = vld [vmem:[#allocation21] ss:$0 sm:$0xff] }
 0x9bf   :  { %4446 = vmatmul.bf16.gmra.mxu2 %v4284_v49 }
 0x9c9   :  { %6894 = vmatmul.msk.bf16.vlgmr.msra.gmra.mxu0 %vm680_vm2, %v7458_v61 }
 0x9cf   :  { %6896 = vmatmul.msk.bf16.vlgmr.msra.gmra.mxu2 %vm680_vm2, %v7458_v61 }
 0x9d9   :  { %6895 = vmatmul.msk.bf16.gmra.mxu0 %vm680_vm2, %v7459_v62 }
 0x9df   :  { %6897 = vmatmul.msk.bf16.gmra.mxu2 %vm680_vm2, %v7459_v62 }
 0xa24   :  { %v4557_v38 = vpop.f32.mrf.mxu1 }
 0xa26   :  { %v4423_v7 = vpop.f32.mrf.mxu0 }
 0xa2c   :  { %v4559_v41 = vpop.f32.mrf.mxu1 }
 0xa2e   :  { %v4425_v12 = vpop.f32.mrf.mxu0 }
 0xa30   :  { %v4576_v40 = vpop.f32.mrf.mxu3 }
 0xa32   :  { %v4442_v16 = vpop.f32.mrf.mxu2 }
 0xa33   :  { %v4443_v18 = vadd.f32 %v4442_v16, %v4423_v7 }
 0xa34   :  { %v4562_v43 = vpop.f32.mrf.mxu1 }
 0xa35   :  { %v4558_v30 = vadd.f32 %v4557_v38, %v4443_v18 }
 0xa36   :  { %v4428_v19 = vpop.f32.mrf.mxu0 }
 0xa37   :  { %v4577_v52 = vadd.f32 %v4576_v40, %v4558_v30 }
 0xa38   :  { %v4578_v42 = vpop.f32.mrf.mxu3 }
 0xa3a   :  { %v4444_v20 = vpop.f32.mrf.mxu2 }
 0xa3b   :  { %v4445_v0 = vadd.f32 %v4444_v20, %v4425_v12 }
 0xa3c   :  { %v4564_v45 = vpop.f32.mrf.mxu1 }
 0xa3d   :  { %v4560_v56 = vadd.f32 %v4559_v41, %v4445_v0 }
 0xa3e   :  { %v4430_v21 = vpop.f32.mrf.mxu0 }
 0xa3f   :  { %v4579_v60 = vadd.f32 %v4578_v42, %v4560_v56 }
 0xa40   :  { %v4581_v44 = vpop.f32.mrf.mxu3 }
 0xa42   :  { %v4447_v22 = vpop.f32.mrf.mxu2 }
 0xa43   :  { %v4448_v23 = vadd.f32 %v4447_v22, %v4428_v19 }
 0xa45   :  { %v4563_v39 = vadd.f32 %v4562_v43, %v4448_v23 }
 0xa46   :  { %v4616_v13 = vpop.f32.mrf.mxu0 }
 0xa47   :  { %v4582_v5 = vadd.f32 %v4581_v44, %v4563_v39 }
 0xa48   :  { %v4583_v46 = vpop.f32.mrf.mxu3 }
 0xa4a   :  { %v4449_v26 = vpop.f32.mrf.mxu2 }
 0xa4b   :  { %v4450_v27 = vadd.f32 %v4449_v26, %v4430_v21 }
 0xa4d   :  { %v4565_v10 = vadd.f32 %v4564_v45, %v4450_v27 }
 0xa4e   :  { %v4618_v28 = vpop.f32.mrf.mxu0 }
 0xa4f   :  { %v4645_v29 = vpack.c.bf16 %v4618_v28, %v4616_v13  ;;  %v4584_v17 = vadd.f32 %v4583_v46, %v4565_v10 }
 0xa51   :  { %4786 = vmatmul.bf16.vlgmr.msrb.gmra.mxu1 %v4645_v29 }
 0xa52   :  { %v4635_v31 = vpop.f32.mrf.mxu2 }
 0xa56   :  { %v4621_v32 = vpop.f32.mrf.mxu0 }
 0xa5a   :  { %v4637_v33 = vpop.f32.mrf.mxu2 }
 0xa5b   :  { %v4646_v34 = vpack.c.bf16 %v4637_v33, %v4635_v31 }
 0xa5d   :  { %4805 = vmatmul.bf16.vlgmr.msra.gmra.mxu3 %v4646_v34 }
 0xa5e   :  { %v4623_v24 = vpop.f32.mrf.mxu0 }
 0xa5f   :  { %v4647_v35 = vpack.c.bf16 %v4623_v24, %v4621_v32 }
 0xa61   :  { %4791 = vmatmul.bf16.gmra.mxu1 %v4647_v35 }
 0xa62   :  { %v4640_v36 = vpop.f32.mrf.mxu2 }
 0xa6a   :  { %v4642_v25 = vpop.f32.mrf.mxu2 }
 0xa6b   :  { %v4648_v37 = vpack.c.bf16 %v4642_v25, %v4640_v36 }
 0xa6d   :  { %4810 = vmatmul.bf16.gmra.mxu3 %v4648_v37 }
 0xace   :  { %v4787_v47 = vpop.f32.mrf.mxu1 }
 0xad6   :  { %v4789_v55 = vpop.f32.mrf.mxu1 }
 0xade   :  { %v4792_v2 = vpop.f32.mrf.mxu1 }
 0xae0   :  { %v4806_v48 = vpop.f32.mrf.mxu3 }
 0xae1   :  { %v4807_v51 = vadd.f32 %v4806_v48, %v4787_v47 }
 0xae3   :  { %v4816_v54 = vadd.f32 %v4807_v51, %v4577_v52 }
 0xae5   :  { %v4824_v57 = vadd.f32 %v7493_v53, %v4816_v54 }
 0xae6   :  { %v4794_v14 = vpop.f32.mrf.mxu1 }
 0xae7   :  { %v4828_v58 = vsub.f32 0.0, %v4824_v57 }
 0xae8   :  { %v4808_v59 = vpop.f32.mrf.mxu3 }
 0xae9   :  { %v4832_v49 = vmul.f32 1.442695, %v4828_v58  ;;  %v4809_v61 = vadd.f32 %v4808_v59, %v4789_v55 }
 0xaeb   :  { %7494 = vpow2.f32 %v4832_v49  ;;  %v4817_v62 = vadd.f32 %v4809_v61, %v4579_v60 }
 0xaed   :  { %v4825_v63 = vadd.f32 %v7493_v53, %v4817_v62 }
 0xaef   :  { %v4829_v50 = vsub.f32 0.0, %v4825_v63 }
 0xaf0   :  { %v4811_v3 = vpop.f32.mrf.mxu3 }
 0xaf1   :  { %v7495_v4 = vpop.eup %7494  ;;  %v4834_v6 = vmul.f32 1.442695, %v4829_v50  ;;  %v4812_v7 = vadd.f32 %v4811_v3, %v4792_v2 }
 0xaf2   :  { %v4840_v8 = vadd.f32 1.0, %v7495_v4 }
 0xaf3   :  { %7496 = vpow2.f32 %v4834_v6  ;;  %v4818_v9 = vadd.f32 %v4812_v7, %v4582_v5 }
 0xaf4   :  { %7498 = vrcp.f32 %v4840_v8 }
 0xaf5   :  { %v4826_v11 = vadd.f32 %v7493_v53, %v4818_v9 }
 0xaf7   :  { %v4830_v12 = vsub.f32 0.0, %v4826_v11 }
 0xaf8   :  { %v4813_v15 = vpop.f32.mrf.mxu3 }
 0xaf9   :  { %v7497_v16 = vpop.eup %7496  ;;  %v4836_v18 = vmul.f32 1.442695, %v4830_v12  ;;  %v4814_v19 = vadd.f32 %v4813_v15, %v4794_v14 }
 0xafa   :  { %v7499_v1 = vpop.eup %7498  ;;  %v4841_v20 = vadd.f32 1.0, %v7497_v16 }
 0xafb   :  { %4848 = vst.msk [vmem:[%s9109_s19] sm:$0xff] %vm406_vm1, %v7499_v1  ;;  %7500 = vpow2.f32 %v4836_v18  ;;  %v4819_v0 = vadd.f32 %v4814_v19, %v4584_v17 }
 0xafc   :  { %7502 = vrcp.f32 %v4841_v20 }
 0xafd   :  { %v4827_v21 = vadd.f32 %v7493_v53, %v4819_v0 }
 0xaff   :  { %v4831_v22 = vsub.f32 0.0, %v4827_v21 }
 0xb01   :  { %v7501_v23 = vpop.eup %7500  ;;  %v4838_v13 = vmul.f32 1.442695, %v4831_v22 }
 0xb02   :  { %v7503_v26 = vpop.eup %7502  ;;  %v4842_v27 = vadd.f32 1.0, %v7501_v23 }
 0xb03   :  { %4849 = vst.msk [vmem:[%s9109_s19 + $0x8] sm:$0xff] %vm406_vm1, %v7503_v26  ;;  %7504 = vpow2.f32 %v4838_v13 }
 0xb04   :  { %7506 = vrcp.f32 %v4842_v27 }
 0xb09   :  { %v7505_v28 = vpop.eup %7504 }
 0xb0a   :  { %v7507_v29 = vpop.eup %7506  ;;  %v4843_v31 = vadd.f32 1.0, %v7505_v28 }
 0xb0b   :  { %4850 = vst.msk [vmem:[%s9109_s19 + $0x10] sm:$0xff] %vm406_vm1, %v7507_v29 }
 0xb0c   :  { %7508 = vrcp.f32 %v4843_v31 }
 0xb12   :  { %v7509_v32 = vpop.eup %7508 }
 0xb13   :  { %4851 = vst.msk [vmem:[%s9109_s19 + $0x18] sm:$0xff] %vm406_vm1, %v7509_v32 }
 0xb14   :  { %4856 = vsyncpa [#allocation3], 1 }
 0xb15   :  { %4857 = vsyncpa [#allocation5], 1 }
 0xb16   :  { %4858 = vsyncpa [#allocation8], 1 }
 0xb17   :  { %4859 = vsyncpa [#allocation11], 1 }
 0xb18   :  { %4860 = vsyncpa [#allocation14], 1 }
 0xb19   :  { %4861 = vsyncpa [#allocation17], 1 }
 0xb1a   :  { %4862 = vsyncpa [#allocation20], 1 }

</bundles_post_ra>
